<compile_context>
chip_gen: v5e
topology: v5e:2x2
jax: 0.10.0
libtpu: 0.0.40
codegen_flags: <defaults>
</compile_context>

<pallas_src>
from functools import partial

import jax
import jax.numpy as jnp
import numpy as np
from jax.experimental import pallas as pl
from jax.experimental.pallas import tpu as pltpu

BACKBONE_OUT = 64
NUM_CLASSES = 20
SEM_IGNORE = -1        # semantic_ignore_index
INST_IGNORE = -1       # instance_ignore_index
BN_EPS = 1e-3

FUSED_LANES = 128      # fused (w1 || wseg) matmul output width (lane-dense)
BIAS_LANES = 4         # bias head output lanes: [bias(3) | pad(1)]


def _round_up(x, m):
    return ((x + m - 1) // m) * m


def _grid_semantics():
    """CORE_PARALLEL on v7x (2 TensorCores / chip), plain parallel elsewhere."""
    kind = ""
    try:
        kind = jax.devices()[0].device_kind.lower()
    except Exception:
        pass
    if ("v7" in kind or kind.startswith("tpu7")) and hasattr(pltpu, "CORE_PARALLEL"):
        return (pltpu.CORE_PARALLEL,)
    return ("parallel",)


# --------------------------------------------------------------------------------------
# Pass 1: fused (w1 || wseg) matmul -> centered BN statistics partials, semantic logits,
#         and cross-entropy partial sums.  Padded rows are excluded via a row-index mask
#         (stats) and segment == ignore (CE).
# --------------------------------------------------------------------------------------
def _stats_seg_kernel(feat_ref, seg_ref, wcat_ref, bcat_ref,
                      logit_ref, part_ref, *, c, n_total, tile):
    feat = feat_ref[...]                                              # (T, C) bf16
    hcat = jnp.dot(feat, wcat_ref[...],
                   preferred_element_type=jnp.float32) + bcat_ref[...]
    g = hcat[:, 0:c]                                                  # pre-BN hidden (no b1)
    logit = hcat[:, c:c + NUM_CLASSES]                                # (T, 20) f32

    logit_ref[...] = logit.astype(jnp.bfloat16)

    # ---- centered per-tile BN statistics (Chan-combined in wrapper) ----
    row = pl.program_id(0) * tile + jax.lax.broadcasted_iota(jnp.int32, (tile, 1), 0)
    valid = (row < n_total).astype(jnp.float32)                       # (T, 1)
    cnt = jnp.sum(valid, keepdims=True)                               # (1, 1)
    s1 = jnp.sum(g * valid, axis=0, keepdims=True)                    # (1, C)
    mu = s1 / jnp.maximum(cnt, 1.0)
    d = (g - mu) * valid
    m2 = jnp.sum(d * d, axis=0, keepdims=True)                        # (1, C)

    # ---- CrossEntropy(ignore_index=-1) partials ----
    seg = seg_ref[...]                                                # (T, 1) int32
    mx = jnp.max(logit, axis=1, keepdims=True)
    lse = jnp.log(jnp.sum(jnp.exp(logit - mx), axis=1, keepdims=True)) + mx
    cls_iota = jax.lax.broadcasted_iota(jnp.int32, logit.shape, 1)
    onehot = (cls_iota == seg).astype(jnp.float32)
    picked = jnp.sum(logit * onehot, axis=1, keepdims=True)
    seg_valid = (seg != SEM_IGNORE).astype(jnp.float32)
    seg_num = jnp.sum((lse - picked) * seg_valid, keepdims=True)      # (1, 1)
    seg_cnt = jnp.sum(seg_valid, keepdims=True)

    part = jnp.concatenate(
        [s1, m2, cnt, seg_num, seg_cnt, jnp.zeros((1, 5), jnp.float32)], axis=1)
    part_ref[...] = part.reshape(1, 1, 2 * c + 8)


# --------------------------------------------------------------------------------------
# Pass 2: bias head (linear -> folded train-mode BN -> ReLU -> linear) + L1 / cosine
#         loss partial sums.  geo stream packs [bias_gt(3) | instance_mask(1)].
# --------------------------------------------------------------------------------------
def _bias_kernel(feat_ref, geo_ref, w1_ref, scale_ref, shift_ref, w2_ref, b2_ref,
                 bias_ref, part_ref):
    feat = feat_ref[...]                                              # (T, C) bf16
    g = jnp.dot(feat, w1_ref[...], preferred_element_type=jnp.float32)
    h = jnp.maximum(g * scale_ref[...] + shift_ref[...], 0.0)         # folded BN + ReLU
    bias4 = jnp.dot(h.astype(jnp.bfloat16), w2_ref[...],
                    preferred_element_type=jnp.float32) + b2_ref[...]
    bias_pred = bias4[:, 0:3]

    bias_ref[...] = bias4.astype(jnp.bfloat16)

    bias_gt = geo_ref[:, 0:3]
    mask = geo_ref[:, 3:4]                                            # 0/1, 0 on pad rows

    l1 = jnp.sum(jnp.abs(bias_pred - bias_gt), axis=1, keepdims=True)
    l1_num = jnp.sum(l1 * mask, keepdims=True)

    pn = bias_pred / (jnp.sqrt(jnp.sum(bias_pred * bias_pred, axis=1, keepdims=True)) + 1e-8)
    gn = bias_gt / (jnp.sqrt(jnp.sum(bias_gt * bias_gt, axis=1, keepdims=True)) + 1e-8)
    cos = -jnp.sum(pn * gn, axis=1, keepdims=True)
    cos_num = jnp.sum(cos * mask, keepdims=True)
    mask_cnt = jnp.sum(mask, keepdims=True)

    part = jnp.concatenate(
        [l1_num, cos_num, mask_cnt, jnp.zeros((1, 5), jnp.float32)], axis=1)
    part_ref[...] = part.reshape(1, 1, 8)


# --------------------------------------------------------------------------------------
# Wrapper
# --------------------------------------------------------------------------------------
@partial(jax.jit, static_argnames=("tile_n",))
def point_group_forward(feat, coord, instance_center, segment, instance, params,
                        tile_n=8192):
    n, c = feat.shape
    assert c + NUM_CLASSES <= FUSED_LANES

    tile = min(_round_up(tile_n, 16), _round_up(n, 16))
    n_pad = _round_up(n, tile)
    num_tiles = n_pad // tile
    pad = n_pad - n

    # ---- pack / pad inputs (padded rows: feat/geo = 0, segment = ignore) ----
    feat_p = jnp.pad(feat, ((0, pad), (0, 0))).astype(jnp.bfloat16)
    seg_p = jnp.full((n_pad, 1), SEM_IGNORE, jnp.int32)
    seg_p = seg_p.at[:n, 0].set(segment.astype(jnp.int32))
    geo = jnp.zeros((n_pad, 4), jnp.float32)
    geo = geo.at[:n, 0:3].set(instance_center - coord)                # bias_gt
    geo = geo.at[:n, 3].set((instance != INST_IGNORE).astype(jnp.float32))

    # ---- fused / padded weights (b1 cancels out of the folded BN -> not needed) ----
    w_cat = jnp.zeros((c, FUSED_LANES), jnp.float32)
    w_cat = w_cat.at[:, 0:c].set(params["w1"])
    w_cat = w_cat.at[:, c:c + NUM_CLASSES].set(params["wseg"])
    w_cat = w_cat.astype(jnp.bfloat16)
    b_cat = jnp.zeros((1, FUSED_LANES), jnp.float32)
    b_cat = b_cat.at[:, c:c + NUM_CLASSES].set(params["bseg"])
    w1_bf = params["w1"].astype(jnp.bfloat16)
    w2_p = (jnp.zeros((c, BIAS_LANES), jnp.float32)
            .at[:, 0:3].set(params["w2"]).astype(jnp.bfloat16))
    b2_p = jnp.zeros((1, BIAS_LANES), jnp.float32).at[:, 0:3].set(params["b2"])

    cparams = pltpu.CompilerParams(
        dimension_semantics=_grid_semantics(),
        vmem_limit_bytes=48 * 1024 * 1024,
    )

    # ---------------- pass 1: BN statistics + seg head + CE partials -------------------
    logit_padded, part1 = pl.pallas_call(
        partial(_stats_seg_kernel, c=c, n_total=n, tile=tile),
        out_shape=(
            jax.ShapeDtypeStruct((n_pad, NUM_CLASSES), jnp.bfloat16),
            jax.ShapeDtypeStruct((num_tiles, 1, 2 * c + 8), jnp.float32),
        ),
        grid_spec=pltpu.PrefetchScalarGridSpec(
            num_scalar_prefetch=0,
            grid=(num_tiles,),
            in_specs=[
                pl.BlockSpec((tile, c), lambda i: (i, 0)),              # feat tile
                pl.BlockSpec((tile, 1), lambda i: (i, 0)),              # segment labels
                pl.BlockSpec((c, FUSED_LANES), lambda i: (0, 0)),       # w1 || wseg
                pl.BlockSpec((1, FUSED_LANES), lambda i: (0, 0)),       # 0  || bseg
            ],
            out_specs=(
                pl.BlockSpec((tile, NUM_CLASSES), lambda i: (i, 0)),    # bf16 logits
                pl.BlockSpec((1, 1, 2 * c + 8), lambda i: (i, 0, 0)),   # per-tile partials
            ),
        ),
        compiler_params=cparams,
        cost_estimate=pl.CostEstimate(
            flops=2 * n_pad * c * FUSED_LANES,
            transcendentals=n_pad * (NUM_CLASSES + 1),
            bytes_accessed=n_pad * (c * 2 + 4 + NUM_CLASSES * 2)
                           + c * FUSED_LANES * 2 + num_tiles * (2 * c + 8) * 4,
        ),
    )(feat_p, seg_p, w_cat, b_cat)

    # ---- combine per-tile centered statistics (Chan) -> folded BN scale/shift ----
    p1 = part1[:, 0, :]                                               # (num_tiles, 2C+8)
    s1_i = p1[:, 0:c]
    m2_i = p1[:, c:2 * c]
    cnt_i = p1[:, 2 * c:2 * c + 1]
    seg_num = jnp.sum(p1[:, 2 * c + 1])
    seg_cnt = jnp.sum(p1[:, 2 * c + 2])

    n_f = jnp.sum(cnt_i)
    mean_g = jnp.sum(s1_i, axis=0) / n_f                              # (C,)
    mu_i = s1_i / jnp.maximum(cnt_i, 1.0)
    m2_tot = jnp.sum(m2_i, axis=0) + jnp.sum(cnt_i * (mu_i - mean_g[None, :]) ** 2, axis=0)
    var_g = m2_tot / n_f                                              # biased batch variance
    inv_std = jax.lax.rsqrt(var_g + BN_EPS)
    bn_scale = params["gamma"] * inv_std                              # (1, C)
    bn_shift = params["beta"] - mean_g * bn_scale                     # (1, C)

    # --------------------- pass 2: bias head + L1 / cosine partials --------------------
    bias_padded, part2 = pl.pallas_call(
        _bias_kernel,
        out_shape=(
            jax.ShapeDtypeStruct((n_pad, BIAS_LANES), jnp.bfloat16),
            jax.ShapeDtypeStruct((num_tiles, 1, 8), jnp.float32),
        ),
        grid_spec=pltpu.PrefetchScalarGridSpec(
            num_scalar_prefetch=0,
            grid=(num_tiles,),
            in_specs=[
                pl.BlockSpec((tile, c), lambda i: (i, 0)),              # feat tile
                pl.BlockSpec((tile, 4), lambda i: (i, 0)),              # bias_gt | mask
                pl.BlockSpec((c, c), lambda i: (0, 0)),                 # w1
                pl.BlockSpec((1, c), lambda i: (0, 0)),                 # BN scale
                pl.BlockSpec((1, c), lambda i: (0, 0)),                 # BN shift
                pl.BlockSpec((c, BIAS_LANES), lambda i: (0, 0)),        # w2 (padded)
                pl.BlockSpec((1, BIAS_LANES), lambda i: (0, 0)),        # b2 (padded)
            ],
            out_specs=(
                pl.BlockSpec((tile, BIAS_LANES), lambda i: (i, 0)),     # bf16 bias_pred
                pl.BlockSpec((1, 1, 8), lambda i: (i, 0, 0)),           # per-tile partials
            ),
        ),
        compiler_params=cparams,
        cost_estimate=pl.CostEstimate(
            flops=2 * n_pad * c * (c + BIAS_LANES),
            transcendentals=n_pad * 4,
            bytes_accessed=n_pad * (c * 2 + 16 + BIAS_LANES * 2)
                           + c * (c + BIAS_LANES) * 2 + num_tiles * 8 * 4,
        ),
    )(feat_p, geo, w1_bf, bn_scale, bn_shift, w2_p, b2_p)

    p2 = jnp.sum(part2[:, 0, :], axis=0)
    seg_loss = seg_num / jnp.maximum(seg_cnt, 1.0)        # guard all-ignored batch (no NaN)
    bias_l1_loss = p2[0] / (p2[2] + 1e-8)
    bias_cosine_loss = p2[1] / (p2[2] + 1e-8)
    loss = seg_loss + bias_l1_loss + bias_cosine_loss

    return dict(
        bias_pred=bias_padded[:n, 0:3],                   # bf16
        logit_pred=logit_padded[:n],                      # bf16
        loss=loss,
        seg_loss=seg_loss,
        bias_l1_loss=bias_l1_loss,
        bias_cosine_loss=bias_cosine_loss,
    )


# --------------------------------------------------------------------------------------
# Pure-JAX reference mirroring the PyTorch training forward (f32 throughout).
# --------------------------------------------------------------------------------------
def reference_forward(feat, coord, instance_center, segment, instance, params):
    h = feat @ params["w1"] + params["b1"]
    mean = jnp.mean(h, axis=0, keepdims=True)
    var = jnp.mean((h - mean) ** 2, axis=0, keepdims=True)
    h = (h - mean) / jnp.sqrt(var + BN_EPS) * params["gamma"] + params["beta"]
    h = jnp.maximum(h, 0.0)
    bias_pred = h @ params["w2"] + params["b2"]
    logit = feat @ params["wseg"] + params["bseg"]

    logp = logit - jax.scipy.special.logsumexp(logit, axis=1, keepdims=True)
    valid = (segment != SEM_IGNORE).astype(jnp.float32)
    safe_seg = jnp.where(segment == SEM_IGNORE, 0, segment)
    nll = -jnp.take_along_axis(logp, safe_seg[:, None], axis=1)[:, 0]
    seg_loss = jnp.sum(nll * valid) / jnp.sum(valid)

    mask = (instance != INST_IGNORE).astype(jnp.float32)
    bias_gt = instance_center - coord
    bias_dist = jnp.sum(jnp.abs(bias_pred - bias_gt), axis=-1)
    bias_l1 = jnp.sum(bias_dist * mask) / (jnp.sum(mask) + 1e-8)
    pn = bias_pred / (jnp.linalg.norm(bias_pred, axis=1, keepdims=True) + 1e-8)
    gn = bias_gt / (jnp.linalg.norm(bias_gt, axis=1, keepdims=True) + 1e-8)
    cos = -jnp.sum(pn * gn, axis=-1)
    bias_cos = jnp.sum(cos * mask) / (jnp.sum(mask) + 1e-8)
    return seg_loss + bias_l1 + bias_cos, seg_loss, bias_l1, bias_cos


def init_params(key, c=BACKBONE_OUT, num_classes=NUM_CLASSES):
    ks = jax.random.split(key, 6)
    scale1 = 1.0 / np.sqrt(c)
    return dict(
        w1=jax.random.uniform(ks[0], (c, c), jnp.float32, -scale1, scale1),
        b1=jax.random.uniform(ks[1], (1, c), jnp.float32, -scale1, scale1),
        gamma=jnp.ones((1, c), jnp.float32),
        beta=jnp.zeros((1, c), jnp.float32),
        w2=jax.random.uniform(ks[2], (c, 3), jnp.float32, -scale1, scale1),
        b2=jax.random.uniform(ks[3], (1, 3), jnp.float32, -scale1, scale1),
        wseg=jax.random.uniform(ks[4], (c, num_classes), jnp.float32, -scale1, scale1),
        bseg=jax.random.uniform(ks[5], (1, num_classes), jnp.float32, -scale1, scale1),
    )


if __name__ == "__main__":
    N = 300      # deliberately not tile-aligned: exercises padding + multi-tile path
    key = jax.random.PRNGKey(0)
    k_feat, k_coord, k_cent, k_seg, k_inst, k_ign, k_par = jax.random.split(key, 7)

    feat = jax.random.normal(k_feat, (N, BACKBONE_OUT), jnp.float32)
    coord = jax.random.normal(k_coord, (N, 3), jnp.float32) * 2.0
    instance_center = coord + 0.3 * jax.random.normal(k_cent, (N, 3), jnp.float32)
    segment = jax.random.randint(k_seg, (N,), 0, NUM_CLASSES, jnp.int32)
    instance = jax.random.randint(k_inst, (N,), 0, 8, jnp.int32)
    ign = jax.random.uniform(k_ign, (N,), jnp.float32) < 0.1
    segment = jnp.where(ign, SEM_IGNORE, segment)
    instance = jnp.where(ign, INST_IGNORE, instance)

    params = init_params(k_par)

    # tile_n=128 -> 3 tiles + 84 padded rows: exercises cross-tile Chan BN-stat combine
    # and cross-tile loss accumulation at small test size (production default: 8192).
    out = point_group_forward(feat, coord, instance_center, segment, instance,
                              params, tile_n=128)
    jax.block_until_ready(out)

    ref_loss, ref_seg, ref_l1, ref_cos = reference_forward(
        feat, coord, instance_center, segment, instance, params)
    np.testing.assert_allclose(np.asarray(out["loss"]), np.asarray(ref_loss), rtol=5e-2, atol=5e-2)
    np.testing.assert_allclose(np.asarray(out["seg_loss"]), np.asarray(ref_seg), rtol=5e-2, atol=5e-2)
    np.testing.assert_allclose(np.asarray(out["bias_l1_loss"]), np.asarray(ref_l1), rtol=5e-2, atol=5e-2)
    np.testing.assert_allclose(np.asarray(out["bias_cosine_loss"]), np.asarray(ref_cos), rtol=5e-2, atol=5e-2)

    print("KERNEL_OK")
</pallas_src>

<mosaic_0001>
module attributes {stable_mosaic.version = 11 : i64} {
  func.func @_stats_seg_kernel(%arg0: i32, %arg1: memref<128x64xbf16, #tpu.memory_space<vmem>>, %arg2: memref<128x1xi32, #tpu.memory_space<vmem>>, %arg3: memref<64x128xbf16, #tpu.memory_space<vmem>>, %arg4: memref<1x128xf32, #tpu.memory_space<vmem>>, %arg5: memref<128x20xbf16, #tpu.memory_space<vmem>>, %arg6: memref<1x1x136xf32, #tpu.memory_space<vmem>>) attributes {dimension_semantics = [#tpu.dimension_semantics<parallel>], iteration_bounds = array<i64: 3>, scalar_prefetch = 0 : i64, scratch_operands = 0 : i64, tpu.core_type = #tpu.core_type<tc>, window_params = [{transform_indices = @transform_0, window_bounds = array<i64: 128, 64>}, {transform_indices = @transform_1, window_bounds = array<i64: 128, 1>}, {pipeline_mode = #tpu.pipeline_mode<synchronous>, transform_indices = @transform_2, window_bounds = array<i64: 64, 128>}, {pipeline_mode = #tpu.pipeline_mode<synchronous>, transform_indices = @transform_3, window_bounds = array<i64: 1, 128>}, {transform_indices = @transform_4, window_bounds = array<i64: 128, 20>}, {transform_indices = @transform_5, window_bounds = array<i64: 1, 1, 136>}]} {
    %c0 = arith.constant 0 : index
    %c0_0 = arith.constant 0 : index
    %0 = vector.load %arg1[%c0, %c0_0] : memref<128x64xbf16, #tpu.memory_space<vmem>>, vector<128x64xbf16>
    %c0_1 = arith.constant 0 : index
    %c0_2 = arith.constant 0 : index
    %1 = vector.load %arg3[%c0_1, %c0_2] : memref<64x128xbf16, #tpu.memory_space<vmem>>, vector<64x128xbf16>
    %cst = arith.constant dense<0.000000e+00> : vector<128x128xf32>
    %2 = tpu.matmul %0, %1, %cst {dimension_numbers = #tpu.dot_dimension_numbers<[1], [0], [0], [1], [0, 0, 1, 1], [], []>} : vector<128x64xbf16>, vector<64x128xbf16>, vector<128x128xf32> -> vector<128x128xf32>
    %c0_3 = arith.constant 0 : index
    %c0_4 = arith.constant 0 : index
    %3 = vector.load %arg4[%c0_3, %c0_4] : memref<1x128xf32, #tpu.memory_space<vmem>>, vector<1x128xf32>
    %4 = vector.broadcast %3 : vector<1x128xf32> to vector<128x128xf32>
    %5 = arith.addf %2, %4 : vector<128x128xf32>
    %6 = vector.extract_strided_slice %5 {offsets = [0, 0], sizes = [128, 64], strides = [1, 1]} : vector<128x128xf32> to vector<128x64xf32>
    %7 = vector.extract_strided_slice %5 {offsets = [0, 64], sizes = [128, 20], strides = [1, 1]} : vector<128x128xf32> to vector<128x20xf32>
    %8 = arith.truncf %7 : vector<128x20xf32> to vector<128x20xbf16>
    %c0_5 = arith.constant 0 : index
    %c0_6 = arith.constant 0 : index
    %9 = vector.load %arg5[%c0_5, %c0_6] : memref<128x20xbf16, #tpu.memory_space<vmem>>, vector<128x20xbf16>
    tpu.vector_store %arg5[%c0_5, %c0_6], %8 {strides = array<i32>} : memref<128x20xbf16, #tpu.memory_space<vmem>>, vector<128x20xbf16>,
    %c128_i32 = arith.constant 128 : i32
    %10 = arith.muli %arg0, %c128_i32 : i32
    %11 = tpu.iota {dimensions = array<i32: 0>} : vector<128x1xi32>
    %12 = vector.broadcast %10 : i32 to vector<128x1xi32>
    %13 = arith.addi %12, %11 : vector<128x1xi32>
    %c300_i32 = arith.constant 300 : i32
    %14 = vector.broadcast %c300_i32 : i32 to vector<128x1xi32>
    %15 = arith.cmpi slt, %13, %14 : vector<128x1xi32>
    %16 = arith.extui %15 : vector<128x1xi1> to vector<128x1xi32>
    %17 = arith.sitofp %16 : vector<128x1xi32> to vector<128x1xf32>
    %18 = vector.shape_cast %17 : vector<128x1xf32> to vector<1x128x1xf32>
    %cst_7 = arith.constant dense<0.000000e+00> : vector<1xf32>
    %19 = vector.multi_reduction <add>, %18, %cst_7 [1, 2] : vector<1x128x1xf32> to vector<1xf32>
    %20 = vector.shape_cast %19 : vector<1xf32> to vector<1x1x1xf32>
    %21 = vector.extract %20[0, 0, 0] : f32 from vector<1x1x1xf32>
    %22 = vector.broadcast %21 : f32 to vector<1x1xf32>
    %23 = vector.broadcast %17 : vector<128x1xf32> to vector<128x64xf32>
    %24 = arith.mulf %6, %23 : vector<128x64xf32>
    %cst_8 = arith.constant dense<0.000000e+00> : vector<64xf32>
    %25 = vector.multi_reduction <add>, %24, %cst_8 [0] : vector<128x64xf32> to vector<64xf32>
    %26 = vector.shape_cast %25 : vector<64xf32> to vector<1x64xf32>
    %cst_9 = arith.constant 1.000000e+00 : f32
    %27 = vector.broadcast %cst_9 : f32 to vector<1x1xf32>
    %28 = arith.maximumf %22, %27 : vector<1x1xf32>
    %29 = vector.broadcast %28 : vector<1x1xf32> to vector<1x64xf32>
    %30 = arith.divf %26, %29 : vector<1x64xf32>
    %31 = vector.broadcast %30 : vector<1x64xf32> to vector<128x64xf32>
    %32 = arith.subf %6, %31 : vector<128x64xf32>
    %33 = vector.broadcast %17 : vector<128x1xf32> to vector<128x64xf32>
    %34 = arith.mulf %32, %33 : vector<128x64xf32>
    %35 = arith.mulf %34, %34 : vector<128x64xf32>
    %cst_10 = arith.constant dense<0.000000e+00> : vector<64xf32>
    %36 = vector.multi_reduction <add>, %35, %cst_10 [0] : vector<128x64xf32> to vector<64xf32>
    %37 = vector.shape_cast %36 : vector<64xf32> to vector<1x64xf32>
    %c0_11 = arith.constant 0 : index
    %c0_12 = arith.constant 0 : index
    %38 = vector.load %arg2[%c0_11, %c0_12] : memref<128x1xi32, #tpu.memory_space<vmem>>, vector<128x1xi32>
    %cst_13 = arith.constant dense<0xFF800000> : vector<128xf32>
    %39 = vector.multi_reduction <maximumf>, %7, %cst_13 [1] : vector<128x20xf32> to vector<128xf32>
    %40 = vector.shape_cast %39 : vector<128xf32> to vector<128x1xf32>
    %41 = vector.broadcast %40 : vector<128x1xf32> to vector<128x20xf32>
    %42 = arith.subf %7, %41 : vector<128x20xf32>
    %43 = math.exp %42 : vector<128x20xf32>
    %cst_14 = arith.constant dense<0.000000e+00> : vector<128xf32>
    %44 = vector.multi_reduction <add>, %43, %cst_14 [1] : vector<128x20xf32> to vector<128xf32>
    %45 = vector.shape_cast %44 : vector<128xf32> to vector<128x1xf32>
    %46 = math.log %45 : vector<128x1xf32>
    %47 = arith.addf %46, %40 : vector<128x1xf32>
    %48 = tpu.iota {dimensions = array<i32: 1>} : vector<128x20xi32>
    %49 = vector.broadcast %38 : vector<128x1xi32> to vector<128x20xi32>
    %50 = arith.cmpi eq, %48, %49 : vector<128x20xi32>
    %51 = arith.extui %50 : vector<128x20xi1> to vector<128x20xi32>
    %52 = arith.sitofp %51 : vector<128x20xi32> to vector<128x20xf32>
    %53 = arith.mulf %7, %52 : vector<128x20xf32>
    %cst_15 = arith.constant dense<0.000000e+00> : vector<128xf32>
    %54 = vector.multi_reduction <add>, %53, %cst_15 [1] : vector<128x20xf32> to vector<128xf32>
    %55 = vector.shape_cast %54 : vector<128xf32> to vector<128x1xf32>
    %c-1_i32 = arith.constant -1 : i32
    %56 = vector.broadcast %c-1_i32 : i32 to vector<128x1xi32>
    %57 = arith.cmpi ne, %38, %56 : vector<128x1xi32>
    %58 = arith.extui %57 : vector<128x1xi1> to vector<128x1xi32>
    %59 = arith.sitofp %58 : vector<128x1xi32> to vector<128x1xf32>
    %60 = arith.subf %47, %55 : vector<128x1xf32>
    %61 = arith.mulf %60, %59 : vector<128x1xf32>
    %62 = vector.shape_cast %61 : vector<128x1xf32> to vector<1x128x1xf32>
    %cst_16 = arith.constant dense<0.000000e+00> : vector<1xf32>
    %63 = vector.multi_reduction <add>, %62, %cst_16 [1, 2] : vector<1x128x1xf32> to vector<1xf32>
    %64 = vector.shape_cast %63 : vector<1xf32> to vector<1x1x1xf32>
    %65 = vector.extract %64[0, 0, 0] : f32 from vector<1x1x1xf32>
    %66 = vector.broadcast %65 : f32 to vector<1x1xf32>
    %67 = vector.shape_cast %59 : vector<128x1xf32> to vector<1x128x1xf32>
    %cst_17 = arith.constant dense<0.000000e+00> : vector<1xf32>
    %68 = vector.multi_reduction <add>, %67, %cst_17 [1, 2] : vector<1x128x1xf32> to vector<1xf32>
    %69 = vector.shape_cast %68 : vector<1xf32> to vector<1x1x1xf32>
    %70 = vector.extract %69[0, 0, 0] : f32 from vector<1x1x1xf32>
    %71 = vector.broadcast %70 : f32 to vector<1x1xf32>
    %cst_18 = arith.constant 0.000000e+00 : f32
    %72 = vector.broadcast %cst_18 : f32 to vector<1x5xf32>
    %73 = tpu.concatenate %26, %37, %22, %66, %71, %72 in 1 : vector<1x64xf32>, vector<1x64xf32>, vector<1x1xf32>, vector<1x1xf32>, vector<1x1xf32>, vector<1x5xf32> -> vector<1x136xf32>
    %74 = vector.shape_cast %73 : vector<1x136xf32> to vector<1x1x136xf32>
    %c0_19 = arith.constant 0 : index
    %c0_20 = arith.constant 0 : index
    %c0_21 = arith.constant 0 : index
    %75 = vector.load %arg6[%c0_19, %c0_20, %c0_21] : memref<1x1x136xf32, #tpu.memory_space<vmem>>, vector<1x1x136xf32>
    tpu.vector_store %arg6[%c0_19, %c0_20, %c0_21], %74 {strides = array<i32>} : memref<1x1x136xf32, #tpu.memory_space<vmem>>, vector<1x1x136xf32>,
    return
  }
  func.func @transform_0(%arg0: i32) -> (i32, i32) {
    %c0_i32 = arith.constant 0 : i32
    %c0_i32_0 = arith.constant 0 : i32
    return %arg0, %c0_i32 : i32, i32
  }
  func.func @transform_1(%arg0: i32) -> (i32, i32) {
    %c0_i32 = arith.constant 0 : i32
    %c0_i32_0 = arith.constant 0 : i32
    return %arg0, %c0_i32 : i32, i32
  }
  func.func @transform_2(%arg0: i32) -> (i32, i32) {
    %c0_i32 = arith.constant 0 : i32
    %c0_i32_0 = arith.constant 0 : i32
    %c0_i32_1 = arith.constant 0 : i32
    return %c0_i32, %c0_i32_0 : i32, i32
  }
  func.func @transform_3(%arg0: i32) -> (i32, i32) {
    %c0_i32 = arith.constant 0 : i32
    %c0_i32_0 = arith.constant 0 : i32
    %c0_i32_1 = arith.constant 0 : i32
    return %c0_i32, %c0_i32_0 : i32, i32
  }
  func.func @transform_4(%arg0: i32) -> (i32, i32) {
    %c0_i32 = arith.constant 0 : i32
    %c0_i32_0 = arith.constant 0 : i32
    return %arg0, %c0_i32 : i32, i32
  }
  func.func @transform_5(%arg0: i32) -> (i32, i32, i32) {
    %c0_i32 = arith.constant 0 : i32
    %c0_i32_0 = arith.constant 0 : i32
    %c0_i32_1 = arith.constant 0 : i32
    return %arg0, %c0_i32, %c0_i32_0 : i32, i32, i32
  }
}

module attributes {stable_mosaic.version = 11 : i64} {
  func.func @_bias_kernel(%arg0: i32, %arg1: memref<128x64xbf16, #tpu.memory_space<vmem>>, %arg2: memref<128x4xf32, #tpu.memory_space<vmem>>, %arg3: memref<64x64xbf16, #tpu.memory_space<vmem>>, %arg4: memref<1x64xf32, #tpu.memory_space<vmem>>, %arg5: memref<1x64xf32, #tpu.memory_space<vmem>>, %arg6: memref<64x4xbf16, #tpu.memory_space<vmem>>, %arg7: memref<1x4xf32, #tpu.memory_space<vmem>>, %arg8: memref<128x4xbf16, #tpu.memory_space<vmem>>, %arg9: memref<1x1x8xf32, #tpu.memory_space<vmem>>) attributes {dimension_semantics = [#tpu.dimension_semantics<parallel>], iteration_bounds = array<i64: 3>, scalar_prefetch = 0 : i64, scratch_operands = 0 : i64, tpu.core_type = #tpu.core_type<tc>, window_params = [{transform_indices = @transform_0, window_bounds = array<i64: 128, 64>}, {transform_indices = @transform_1, window_bounds = array<i64: 128, 4>}, {pipeline_mode = #tpu.pipeline_mode<synchronous>, transform_indices = @transform_2, window_bounds = array<i64: 64, 64>}, {pipeline_mode = #tpu.pipeline_mode<synchronous>, transform_indices = @transform_3, window_bounds = array<i64: 1, 64>}, {pipeline_mode = #tpu.pipeline_mode<synchronous>, transform_indices = @transform_4, window_bounds = array<i64: 1, 64>}, {pipeline_mode = #tpu.pipeline_mode<synchronous>, transform_indices = @transform_5, window_bounds = array<i64: 64, 4>}, {pipeline_mode = #tpu.pipeline_mode<synchronous>, transform_indices = @transform_6, window_bounds = array<i64: 1, 4>}, {transform_indices = @transform_7, window_bounds = array<i64: 128, 4>}, {transform_indices = @transform_8, window_bounds = array<i64: 1, 1, 8>}]} {
    %c0 = arith.constant 0 : index
    %c0_0 = arith.constant 0 : index
    %0 = vector.load %arg1[%c0, %c0_0] : memref<128x64xbf16, #tpu.memory_space<vmem>>, vector<128x64xbf16>
    %c0_1 = arith.constant 0 : index
    %c0_2 = arith.constant 0 : index
    %1 = vector.load %arg3[%c0_1, %c0_2] : memref<64x64xbf16, #tpu.memory_space<vmem>>, vector<64x64xbf16>
    %cst = arith.constant dense<0.000000e+00> : vector<128x64xf32>
    %2 = tpu.matmul %0, %1, %cst {dimension_numbers = #tpu.dot_dimension_numbers<[1], [0], [0], [1], [0, 0, 1, 1], [], []>} : vector<128x64xbf16>, vector<64x64xbf16>, vector<128x64xf32> -> vector<128x64xf32>
    %c0_3 = arith.constant 0 : index
    %c0_4 = arith.constant 0 : index
    %3 = vector.load %arg4[%c0_3, %c0_4] : memref<1x64xf32, #tpu.memory_space<vmem>>, vector<1x64xf32>
    %4 = vector.broadcast %3 : vector<1x64xf32> to vector<128x64xf32>
    %5 = arith.mulf %2, %4 : vector<128x64xf32>
    %c0_5 = arith.constant 0 : index
    %c0_6 = arith.constant 0 : index
    %6 = vector.load %arg5[%c0_5, %c0_6] : memref<1x64xf32, #tpu.memory_space<vmem>>, vector<1x64xf32>
    %7 = vector.broadcast %6 : vector<1x64xf32> to vector<128x64xf32>
    %8 = arith.addf %5, %7 : vector<128x64xf32>
    %cst_7 = arith.constant 0.000000e+00 : f32
    %9 = vector.broadcast %cst_7 : f32 to vector<128x64xf32>
    %10 = arith.maximumf %8, %9 : vector<128x64xf32>
    %11 = arith.truncf %10 : vector<128x64xf32> to vector<128x64xbf16>
    %c0_8 = arith.constant 0 : index
    %c0_9 = arith.constant 0 : index
    %12 = vector.load %arg6[%c0_8, %c0_9] : memref<64x4xbf16, #tpu.memory_space<vmem>>, vector<64x4xbf16>
    %cst_10 = arith.constant dense<0.000000e+00> : vector<128x4xf32>
    %13 = tpu.matmul %11, %12, %cst_10 {dimension_numbers = #tpu.dot_dimension_numbers<[1], [0], [0], [1], [0, 0, 1, 1], [], []>} : vector<128x64xbf16>, vector<64x4xbf16>, vector<128x4xf32> -> vector<128x4xf32>
    %c0_11 = arith.constant 0 : index
    %c0_12 = arith.constant 0 : index
    %14 = vector.load %arg7[%c0_11, %c0_12] : memref<1x4xf32, #tpu.memory_space<vmem>>, vector<1x4xf32>
    %15 = vector.broadcast %14 : vector<1x4xf32> to vector<128x4xf32>
    %16 = arith.addf %13, %15 : vector<128x4xf32>
    %17 = vector.extract_strided_slice %16 {offsets = [0, 0], sizes = [128, 3], strides = [1, 1]} : vector<128x4xf32> to vector<128x3xf32>
    %18 = arith.truncf %16 : vector<128x4xf32> to vector<128x4xbf16>
    %c0_13 = arith.constant 0 : index
    %c0_14 = arith.constant 0 : index
    %19 = vector.load %arg8[%c0_13, %c0_14] : memref<128x4xbf16, #tpu.memory_space<vmem>>, vector<128x4xbf16>
    tpu.vector_store %arg8[%c0_13, %c0_14], %18 {strides = array<i32>} : memref<128x4xbf16, #tpu.memory_space<vmem>>, vector<128x4xbf16>,
    %c0_15 = arith.constant 0 : index
    %c0_16 = arith.constant 0 : index
    %20 = vector.load %arg2[%c0_15, %c0_16] : memref<128x4xf32, #tpu.memory_space<vmem>>, vector<128x3xf32>
    %c0_17 = arith.constant 0 : index
    %c3 = arith.constant 3 : index
    %21 = vector.load %arg2[%c0_17, %c3] : memref<128x4xf32, #tpu.memory_space<vmem>>, vector<128x1xf32>
    %22 = arith.subf %17, %20 : vector<128x3xf32>
    %23 = math.absf %22 : vector<128x3xf32>
    %cst_18 = arith.constant dense<0.000000e+00> : vector<128xf32>
    %24 = vector.multi_reduction <add>, %23, %cst_18 [1] : vector<128x3xf32> to vector<128xf32>
    %25 = vector.shape_cast %24 : vector<128xf32> to vector<128x1xf32>
    %26 = arith.mulf %25, %21 : vector<128x1xf32>
    %27 = vector.shape_cast %26 : vector<128x1xf32> to vector<1x128x1xf32>
    %cst_19 = arith.constant dense<0.000000e+00> : vector<1xf32>
    %28 = vector.multi_reduction <add>, %27, %cst_19 [1, 2] : vector<1x128x1xf32> to vector<1xf32>
    %29 = vector.shape_cast %28 : vector<1xf32> to vector<1x1x1xf32>
    %30 = vector.extract %29[0, 0, 0] : f32 from vector<1x1x1xf32>
    %31 = vector.broadcast %30 : f32 to vector<1x1xf32>
    %32 = arith.mulf %17, %17 : vector<128x3xf32>
    %cst_20 = arith.constant dense<0.000000e+00> : vector<128xf32>
    %33 = vector.multi_reduction <add>, %32, %cst_20 [1] : vector<128x3xf32> to vector<128xf32>
    %34 = vector.shape_cast %33 : vector<128xf32> to vector<128x1xf32>
    %35 = math.sqrt %34 : vector<128x1xf32>
    %cst_21 = arith.constant 9.99999993E-9 : f32
    %36 = vector.broadcast %cst_21 : f32 to vector<128x1xf32>
    %37 = arith.addf %35, %36 : vector<128x1xf32>
    %38 = vector.broadcast %37 : vector<128x1xf32> to vector<128x3xf32>
    %39 = arith.divf %17, %38 : vector<128x3xf32>
    %40 = arith.mulf %20, %20 : vector<128x3xf32>
    %cst_22 = arith.constant dense<0.000000e+00> : vector<128xf32>
    %41 = vector.multi_reduction <add>, %40, %cst_22 [1] : vector<128x3xf32> to vector<128xf32>
    %42 = vector.shape_cast %41 : vector<128xf32> to vector<128x1xf32>
    %43 = math.sqrt %42 : vector<128x1xf32>
    %cst_23 = arith.constant 9.99999993E-9 : f32
    %44 = vector.broadcast %cst_23 : f32 to vector<128x1xf32>
    %45 = arith.addf %43, %44 : vector<128x1xf32>
    %46 = vector.broadcast %45 : vector<128x1xf32> to vector<128x3xf32>
    %47 = arith.divf %20, %46 : vector<128x3xf32>
    %48 = arith.mulf %39, %47 : vector<128x3xf32>
    %cst_24 = arith.constant dense<0.000000e+00> : vector<128xf32>
    %49 = vector.multi_reduction <add>, %48, %cst_24 [1] : vector<128x3xf32> to vector<128xf32>
    %50 = vector.shape_cast %49 : vector<128xf32> to vector<128x1xf32>
    %cst_25 = arith.constant 0.000000e+00 : f32
    %51 = vector.broadcast %cst_25 : f32 to vector<128x1xf32>
    %52 = arith.subf %51, %50 : vector<128x1xf32>
    %53 = arith.mulf %52, %21 : vector<128x1xf32>
    %54 = vector.shape_cast %53 : vector<128x1xf32> to vector<1x128x1xf32>
    %cst_26 = arith.constant dense<0.000000e+00> : vector<1xf32>
    %55 = vector.multi_reduction <add>, %54, %cst_26 [1, 2] : vector<1x128x1xf32> to vector<1xf32>
    %56 = vector.shape_cast %55 : vector<1xf32> to vector<1x1x1xf32>
    %57 = vector.extract %56[0, 0, 0] : f32 from vector<1x1x1xf32>
    %58 = vector.broadcast %57 : f32 to vector<1x1xf32>
    %59 = vector.shape_cast %21 : vector<128x1xf32> to vector<1x128x1xf32>
    %cst_27 = arith.constant dense<0.000000e+00> : vector<1xf32>
    %60 = vector.multi_reduction <add>, %59, %cst_27 [1, 2] : vector<1x128x1xf32> to vector<1xf32>
    %61 = vector.shape_cast %60 : vector<1xf32> to vector<1x1x1xf32>
    %62 = vector.extract %61[0, 0, 0] : f32 from vector<1x1x1xf32>
    %63 = vector.broadcast %62 : f32 to vector<1x1xf32>
    %cst_28 = arith.constant 0.000000e+00 : f32
    %64 = vector.broadcast %cst_28 : f32 to vector<1x5xf32>
    %65 = tpu.concatenate %31, %58, %63, %64 in 1 : vector<1x1xf32>, vector<1x1xf32>, vector<1x1xf32>, vector<1x5xf32> -> vector<1x8xf32>
    %66 = vector.shape_cast %65 : vector<1x8xf32> to vector<1x1x8xf32>
    %c0_29 = arith.constant 0 : index
    %c0_30 = arith.constant 0 : index
    %c0_31 = arith.constant 0 : index
    %67 = vector.load %arg9[%c0_29, %c0_30, %c0_31] : memref<1x1x8xf32, #tpu.memory_space<vmem>>, vector<1x1x8xf32>
    tpu.vector_store %arg9[%c0_29, %c0_30, %c0_31], %66 {strides = array<i32>} : memref<1x1x8xf32, #tpu.memory_space<vmem>>, vector<1x1x8xf32>,
    return
  }
  func.func @transform_0(%arg0: i32) -> (i32, i32) {
    %c0_i32 = arith.constant 0 : i32
    %c0_i32_0 = arith.constant 0 : i32
    return %arg0, %c0_i32 : i32, i32
  }
  func.func @transform_1(%arg0: i32) -> (i32, i32) {
    %c0_i32 = arith.constant 0 : i32
    %c0_i32_0 = arith.constant 0 : i32
    return %arg0, %c0_i32 : i32, i32
  }
  func.func @transform_2(%arg0: i32) -> (i32, i32) {
    %c0_i32 = arith.constant 0 : i32
    %c0_i32_0 = arith.constant 0 : i32
    %c0_i32_1 = arith.constant 0 : i32
    return %c0_i32, %c0_i32_0 : i32, i32
  }
  func.func @transform_3(%arg0: i32) -> (i32, i32) {
    %c0_i32 = arith.constant 0 : i32
    %c0_i32_0 = arith.constant 0 : i32
    %c0_i32_1 = arith.constant 0 : i32
    return %c0_i32, %c0_i32_0 : i32, i32
  }
  func.func @transform_4(%arg0: i32) -> (i32, i32) {
    %c0_i32 = arith.constant 0 : i32
    %c0_i32_0 = arith.constant 0 : i32
    %c0_i32_1 = arith.constant 0 : i32
    return %c0_i32, %c0_i32_0 : i32, i32
  }
  func.func @transform_5(%arg0: i32) -> (i32, i32) {
    %c0_i32 = arith.constant 0 : i32
    %c0_i32_0 = arith.constant 0 : i32
    %c0_i32_1 = arith.constant 0 : i32
    return %c0_i32, %c0_i32_0 : i32, i32
  }
  func.func @transform_6(%arg0: i32) -> (i32, i32) {
    %c0_i32 = arith.constant 0 : i32
    %c0_i32_0 = arith.constant 0 : i32
    %c0_i32_1 = arith.constant 0 : i32
    return %c0_i32, %c0_i32_0 : i32, i32
  }
  func.func @transform_7(%arg0: i32) -> (i32, i32) {
    %c0_i32 = arith.constant 0 : i32
    %c0_i32_0 = arith.constant 0 : i32
    return %arg0, %c0_i32 : i32, i32
  }
  func.func @transform_8(%arg0: i32) -> (i32, i32, i32) {
    %c0_i32 = arith.constant 0 : i32
    %c0_i32_0 = arith.constant 0 : i32
    %c0_i32_1 = arith.constant 0 : i32
    return %arg0, %c0_i32, %c0_i32_0 : i32, i32, i32
  }
}

</mosaic_0001>

<bundles_post_ra>
// kernel: sub.6
= control target key start
LH: loop header
LB: loop body
LE: loop exit
PB: predicated region body
PF: predicated region fallthrough
CT: control target
= control target key end

     0   :  { %s78_s0 = inlined_call_operand.vmem [shape: f32[300,3], index: 0, kind: input, shape index: {}]   ;;  %s79_s1 = inlined_call_operand.vmem [shape: f32[300,3], index: 1, kind: input, shape index: {}]   ;;  %s80_s2 = inlined_call_operand.vmem [shape: f32[300,3], index: 2, kind: output, shape index: {}]  }
   0x1   :  { %v3_v0 = vld [vmem:[%s78_s0] sm:$0x7]  ;;  %v30_v2 = vld [vmem:[%s78_s0 + $0x4] sm:$0x7]  ;;  %v33_v5 = vld [vmem:[%s78_s0 + $0x8] sm:$0x7] }
   0x2   :  { %v4_v1 = vld [vmem:[%s79_s1] sm:$0x7]  ;;  %v31_v4 = vld [vmem:[%s79_s1 + $0x4] sm:$0x7]  ;;  %v34_v6 = vld [vmem:[%s79_s1 + $0x8] sm:$0x7] }
   0x3   :  { %v7_v3 = vsub.f32 %v3_v0, %v4_v1  ;;  %v16_v7 = vsub.f32 %v30_v2, %v31_v4  ;;  %v26_v8 = vsub.f32 %v33_v5, %v34_v6 }
   0x5   :  { %9 = vst [vmem:[%s80_s2] sm:$0xf] %v7_v3 }
   0x6   :  { %32 = vst [vmem:[%s80_s2 + $0x4] sm:$0xf] %v16_v7 }
   0x7   :  { %35 = vst [vmem:[%s80_s2 + $0x8] sm:$0xf] %v26_v8 }

// kernel: point_group_forward.2
= control target key start
LH: loop header
LB: loop body
LE: loop exit
PB: predicated region body
PF: predicated region fallthrough
CT: control target
= control target key end

     0   :  { %s1974_s18 = smov 0   ;;  %s2936_s0 = inlined_call_operand.vmem [shape: bf16[384,64], index: 0, kind: input, shape index: {}]   ;;  %s2937_s1 = inlined_call_operand.vmem [shape: s32[384,1], index: 1, kind: input, shape index: {}]   ;;  %s2938_s2 = inlined_call_operand.vmem [shape: bf16[64,128], index: 2, kind: input, shape index: {}]   ;;  %s2939_s3 = inlined_call_operand.vmem [shape: f32[1,128], index: 3, kind: input, shape index: {}]   ;;  %s2940_s4 = inlined_call_operand.vmem [shape: bf16[384,20], index: 4, kind: output, shape index: {0}]   ;;  %s2941_s5 = inlined_call_operand.vmem [shape: f32[3,1,136], index: 5, kind: output, shape index: {1}]  }
   0x1 LB: > { %s1980_s19 = sadd.s32 4294967295, %s1939_s18   ;;  %p1654_p0 = scmp.ge.s32.totalorder %s1939_s18, 1  ;;  %s1939_s18 = sphi %s1974_s18, %s16_s18  }
   0x2   : > { %p202_p1 = scmp.lt.s32.totalorder %s1939_s18, 4 }
   0x4   : > { %p203_p2 = pnand %p1654_p0, %p202_p1 }
   0x6   : > { %206 = sbr.rel (%p203_p2) target bundleno = 1129 (0x469), region = 36 }
   0xb   : > { %v1780_v0 = vld [vmem:[%s2938_s2 + $0x18] sm:$0xff]  ;;  %s1655_s22 = sshll.u32 %s1980_s19, 4  ;;  %v2942_v1 = vlaneseq  ;;  %v1779_v2 = vld [vmem:[%s2938_s2 + $0x10] sm:$0xff]  ;;  %s1718_s25 = sshll.u32 %s1980_s19, 7  ;;  %v1778_v4 = vld [vmem:[%s2938_s2 + $0x8] sm:$0xff]  ;;  %vm354_vm0 = vcmask 523264  }
   0xc   : > { %p240_p3 = scmp.lt.s32.totalorder %s1655_s22, 47  ;;  %383 = vmatpush.bf16.msra.mxu0 %v1780_v0  ;;  %1782 = vmatpush.bf16.msra.mxu2 %v1780_v0  ;;  %v2002_v7 = vstv %s1718_s25  ;;  %v1777_v10 = vld [vmem:[%s2938_s2] sm:$0xff]  ;;  %vm608_vm4 = vcmask 7168   ;;  %v2943_v24 = vmov 0.0   ;;  %v1942_v48 = vmov 0   ;;  %s1943_s15 = smov 64  }
   0xd   : > { %v1993_v3 = vshrl.u32 %v2942_v1, 7  ;;  %1783 = vmatpush.bf16.msra.mxu3 %v1780_v0  ;;  %1781 = vmatpush.bf16.msra.mxu1 %v1780_v0  ;;  %p257_p4 = scmp.lt.s32.totalorder %s1980_s19, 2 }
   0xe   : > { %s3017_s22 = smov (!%p240_p3, %s1655_s22), 47  ;;  %1812 = vset.pattern.permute.xlu1 %v1942_v48  ;;  %1811 = vset.pattern.permute.xlu2 %v1942_v48 }
   0xf   : > { %v528_v5 = vadd.s32 8, %v1993_v3  ;;  %v529_v6 = vadd.s32 16, %v1993_v3  ;;  %s1656_s28 = sshll.u32 %s3017_s22, 2  ;;  %v530_v8 = vadd.s32 24, %v1993_v3  ;;  %v544_v9 = vadd.s32 %v2002_v7, %v1993_v3  ;;  %1810 = vset.pattern.permute.xlu0 %v1942_v48  ;;  %s1658_s9 = sshll.u32 %s3017_s22, 3 }
  0x10   : > { %384 = vmatpush.bf16.msra.mxu0 %v1779_v2  ;;  %1785 = vmatpush.bf16.msra.mxu2 %v1779_v2  ;;  %s2016_s8 = scalar_lea.vmem %s2936_s0, %s1656_s28  ;;  %v531_v11 = vadd.s32 32, %v1993_v3  ;;  %v532_v14 = vadd.s32 40, %v1993_v3  ;;  %v533_v20 = vadd.s32 48, %v1993_v3  ;;  %v534_v22 = vadd.s32 56, %v1993_v3  ;;  %s2132_s12 = scalar_lea.vmem %s2937_s1, %s1658_s9 }
  0x11   : > { %1786 = vmatpush.bf16.msra.mxu3 %v1779_v2  ;;  %1784 = vmatpush.bf16.msra.mxu1 %v1779_v2  ;;  %v545_v12 = vadd.s32 %v2002_v7, %v528_v5  ;;  %v546_v13 = vadd.s32 %v2002_v7, %v529_v6  ;;  %v547_v15 = vadd.s32 %v2002_v7, %v530_v8  ;;  %v1769_v16 = vld [vmem:[%s2016_s8] sm:$0xff]  ;;  %vm560_vm1 = vcmp.lt.s32.totalorder %v544_v9, 300  ;;  %v1775_v18 = vld [vmem:[%s2016_s8 + $0x30] sm:$0xff]  ;;  %v1770_v57 = vld [vmem:[%s2016_s8 + $0x8] sm:$0xff]  ;;  %s2338_s20 = scalar_lea.vmem %s2940_s4, %s1656_s28  ;;  %s3019_s19 = smov (!%p257_p4, %s1980_s19), 2 }
  0x12   : > { %v1773_v17 = vld [vmem:[%s2016_s8 + $0x20] sm:$0xff]  ;;  %v1771_v19 = vld [vmem:[%s2016_s8 + $0x10] sm:$0xff]  ;;  %v548_v21 = vadd.s32 %v2002_v7, %v531_v11  ;;  %v549_v23 = vadd.s32 %v2002_v7, %v532_v14  ;;  %v2033_v25 = vsel %vm560_vm1, 1.0, %v2943_v24  ;;  %v535_v28 = vadd.s32 64, %v1993_v3  ;;  %v1774_v60 = vld [vmem:[%s2016_s8 + $0x28] sm:$0xff]  ;;  %s1661_s24 = sshll.u32 %s3019_s19, 1 }
  0x13   : > { %vm561_vm2 = vcmp.lt.s32.totalorder %v545_v12, 300  ;;  %vm562_vm3 = vcmp.lt.s32.totalorder %v546_v13, 300  ;;  %vm563_vm5 = vcmp.lt.s32.totalorder %v547_v15, 300  ;;  %v550_v29 = vadd.s32 %v2002_v7, %v533_v20  ;;  %v1772_v0 = vld [vmem:[%s2016_s8 + $0x18] sm:$0xff]  ;;  %s260_s27 = scalar_lea.vmem %s2941_s5, %s1661_s24 }
  0x14   : > { %385 = vmatpush.bf16.msra.mxu0 %v1778_v4  ;;  %1788 = vmatpush.bf16.msra.mxu2 %v1778_v4  ;;  %v2038_v26 = vsel %vm561_vm2, 1.0, %v2943_v24  ;;  %v2041_v27 = vsel %vm562_vm3, 1.0, %v2943_v24  ;;  %vm564_vm6 = vcmp.lt.s32.totalorder %v548_v21, 300  ;;  %v536_v30 = vadd.s32 72, %v1993_v3  ;;  %v1776_v2 = vld [vmem:[%s2016_s8 + $0x38] sm:$0xff] }
  0x15   : > { %1789 = vmatpush.bf16.msra.mxu3 %v1778_v4  ;;  %1787 = vmatpush.bf16.msra.mxu1 %v1778_v4  ;;  %v2049_v31 = vsel %vm563_vm5, 1.0, %v2943_v24  ;;  %v609_v32 = vsel %vm608_vm4, %v2033_v25, 0.0  ;;  %v551_v33 = vadd.s32 %v2002_v7, %v534_v22  ;;  %vm565_vm7 = vcmp.lt.s32.totalorder %v549_v23, 300 }
  0x16   : > { %v610_v34 = vsel %vm608_vm4, %v2038_v26, 0.0  ;;  %v612_v35 = vsel %vm608_vm4, %v2041_v27, 0.0  ;;  %v2059_v36 = vsel %vm564_vm6, 1.0, %v2943_v24  ;;  %v537_v38 = vadd.s32 80, %v1993_v3 }
  0x17   : > { %v611_v37 = vadd.f32 %v610_v34, %v609_v32  ;;  %v552_v39 = vadd.s32 %v2002_v7, %v535_v28  ;;  %vm566_vm8 = vcmp.lt.s32.totalorder %v550_v29, 300  ;;  %v614_v40 = vsel %vm608_vm4, %v2049_v31, 0.0  ;;  %v805_v29 = vld [vmem:[%s2132_s12 + $0x8] sm:$0xff] }
  0x18   : > { %386 = vmatpush.bf16.msra.mxu0 %v1777_v10  ;;  %1791 = vmatpush.bf16.msra.mxu2 %v1777_v10  ;;  %v538_v41 = vadd.s32 88, %v1993_v3  ;;  %v2067_v42 = vsel %vm565_vm7, 1.0, %v2943_v24  ;;  %v553_v44 = vadd.s32 %v2002_v7, %v536_v30  ;;  %vm567_vm9 = vcmp.lt.s32.totalorder %v551_v33, 300 }
  0x19   : > { %1792 = vmatpush.bf16.msra.mxu3 %v1777_v10  ;;  %1790 = vmatpush.bf16.msra.mxu1 %v1777_v10  ;;  %v613_v43 = vadd.f32 %v612_v35, %v611_v37  ;;  %v616_v45 = vsel %vm608_vm4, %v2059_v36, 0.0  ;;  %v2073_v46 = vsel %vm566_vm8, 1.0, %v2943_v24  ;;  %v539_v49 = vadd.s32 96, %v1993_v3 }
  0x1a   : > { %v554_v50 = vadd.s32 %v2002_v7, %v537_v38  ;;  %vm568_vm10 = vcmp.lt.s32.totalorder %v552_v39, 300  ;;  %v618_v51 = vsel %vm608_vm4, %v2067_v42, 0.0  ;;  %v2080_v52 = vsel %vm567_vm9, 1.0, %v2943_v24  ;;  %1084 = vperm.xlu2 %1811, %v805_v29   ;;  %v806_v39 = vld [vmem:[%s2132_s12 + $0x10] sm:$0xff] }
  0x1b   : > { %1710 = vmatmul.msk.bf16.vlgmr.msra.gmra.mxu0 %vm354_vm0, %v1769_v16  ;;  %1714 = vmatmul.msk.bf16.vlgmr.msra.gmra.mxu2 %vm354_vm0, %v1773_v17  ;;  %v615_v47 = vadd.f32 %v614_v40, %v613_v43  ;;  %v540_v54 = vadd.s32 104, %v1993_v3  ;;  %v555_v55 = vadd.s32 %v2002_v7, %v538_v41  ;;  %vm569_vm11 = vcmp.lt.s32.totalorder %v553_v44, 300  ;;  %v807_v40 = vld [vmem:[%s2132_s12 + $0x18] sm:$0xff]  ;;  %v804_v43 = vld [vmem:[%s2132_s12] sm:$0xff] }
  0x1c   : > { %1716 = vmatmul.msk.bf16.vlgmr.msra.gmra.mxu3 %vm354_vm0, %v1775_v18  ;;  %1712 = vmatmul.msk.bf16.vlgmr.msra.gmra.mxu1 %vm354_vm0, %v1771_v19  ;;  %v620_v56 = vsel %vm608_vm4, %v2073_v46, 0.0  ;;  %v2088_v58 = vsel %vm568_vm10, 1.0, %v2943_v24  ;;  %v541_v61 = vadd.s32 112, %v1993_v3  ;;  %v556_v62 = vadd.s32 %v2002_v7, %v539_v49 }
  0x1d   : > { %v617_v53 = vadd.f32 %v616_v45, %v615_v47  ;;  %vm570_vm12 = vcmp.lt.s32.totalorder %v554_v50, 300  ;;  %v622_v63 = vsel %vm608_vm4, %v2080_v52, 0.0  ;;  %v2098_v4 = vsel %vm569_vm11, 1.0, %v2943_v24  ;;  %1081 = vperm.xlu0 %1810, %v804_v43  }
  0x1e   : > { %v542_v6 = vadd.s32 120, %v1993_v3  ;;  %v557_v8 = vadd.s32 %v2002_v7, %v540_v54  ;;  %vm571_vm13 = vcmp.lt.s32.totalorder %v555_v55, 300  ;;  %v624_v9 = vsel %vm608_vm4, %v2088_v58, 0.0  ;;  %v811_v54 = vld [vmem:[%s2132_s12 + $0x38] sm:$0xff]  ;;  %v812_v55 = vld [vmem:[%s2132_s12 + $0x40] sm:$0xff] }
  0x1f   : > { %v619_v59 = vadd.f32 %v618_v51, %v617_v53  ;;  %v2106_v10 = vsel %vm570_vm12, 1.0, %v2943_v24  ;;  %v558_v12 = vadd.s32 %v2002_v7, %v541_v61  ;;  %vm572_vm14 = vcmp.lt.s32.totalorder %v556_v62, 300  ;;  %v809_v53 = vld [vmem:[%s2132_s12 + $0x28] sm:$0xff]  ;;  %v808_v61 = vld [vmem:[%s2132_s12 + $0x20] sm:$0xff]  ;;  %v810_v62 = vld [vmem:[%s2132_s12 + $0x30] sm:$0xff] }
  0x20   : > { %v626_v3 = vsel %vm608_vm4, %v2098_v4, 0.0  ;;  %v2115_v13 = vsel %vm571_vm13, 1.0, %v2943_v24  ;;  %v559_v15 = vadd.s32 %v2002_v7, %v542_v6  ;;  %vm573_vm15 = vcmp.lt.s32.totalorder %v557_v8, 300 }
  0x21   : > { %v621_v5 = vadd.f32 %v620_v56, %v619_v59  ;;  %v628_v16 = vsel %vm608_vm4, %v2106_v10, 0.0  ;;  %v2122_v17 = vsel %vm572_vm14, 1.0, %v2943_v24  ;;  %vm574_vm1 = vcmp.lt.s32.totalorder %v558_v12, 300  ;;  %v814_v56 = vld [vmem:[%s2132_s12 + $0x50] sm:$0xff]  ;;  %v817_v59 = vld [vmem:[%s2132_s12 + $0x68] sm:$0xff] }
  0x22   : > { %v630_v19 = vsel %vm608_vm4, %v2115_v13, 0.0  ;;  %v2127_v20 = vsel %vm573_vm15, 1.0, %v2943_v24  ;;  %vm575_vm2 = vcmp.lt.s32.totalorder %v559_v15, 300  ;;  %v632_v7 = vsel %vm608_vm4, %v2122_v17, 0.0  ;;  %1090 = vperm.xlu2 %1811, %v807_v40  }
  0x23   : > { %v623_v11 = vadd.f32 %v622_v63, %v621_v5  ;;  %v2137_v22 = vsel %vm574_vm1, 1.0, %v2943_v24  ;;  %v634_v28 = vsel %vm608_vm4, %v2127_v20, 0.0  ;;  %v2143_v30 = vsel %vm575_vm2, 1.0, %v2943_v24  ;;  %v813_v63 = vld [vmem:[%s2132_s12 + $0x48] sm:$0xff] }
  0x24   : > { %2967 = vst [vmem:[#allocation2_spill] sm:$0xff] %v2143_v30  ;;  %v636_v33 = vsel %vm608_vm4, %v2137_v22, 0.0  ;;  %v638_v35 = vsel %vm608_vm4, %v2143_v30, 0.0  ;;  %vm1369_vm3 = vcmp.ne.s32.totalorder %v805_v29, 4294967295  ;;  %vm1370_vm5 = vcmp.ne.s32.totalorder %v806_v39, 4294967295 }
  0x25   : > { %v625_v14 = vadd.f32 %v624_v9, %v623_v11  ;;  %v2152_v41 = vsel %vm1369_vm3, 1.0, %v2943_v24  ;;  %vm1368_vm6 = vcmp.ne.s32.totalorder %v804_v43, 4294967295  ;;  %v2158_v45 = vsel %vm1370_vm5, 1.0, %v2943_v24  ;;  %1102 = vperm.xlu0 %1810, %v811_v54  }
  0x26   : > { %2968 = vst [vmem:[#allocation3_spill] sm:$0xff] %v2152_v41  ;;  %v1490_v44 = vsel %vm608_vm4, %v2152_v41, 0.0  ;;  %v2161_v47 = vsel %vm1368_vm6, 1.0, %v2943_v24  ;;  %v1492_v48 = vsel %vm608_vm4, %v2158_v45, 0.0  ;;  %vm820_vm7 = vcmask 687616  }
  0x27   : > { %v627_v18 = vadd.f32 %v626_v3, %v625_v14  ;;  %2969 = vst [vmem:[#allocation4_spill] sm:$0xff] %v2158_v45  ;;  %v1489_v49 = vsel %vm608_vm4, %v2161_v47, 0.0  ;;  %vm508_vm6 = vcmask 158720  }
  0x28   : > { %2970 = vst [vmem:[#allocation5_spill] sm:$0xff] %v2161_v47  ;;  %v1491_v50 = vadd.f32 %v1490_v44, %v1489_v49 }
  0x29   : > { %v629_v21 = vadd.f32 %v628_v16, %v627_v18 }
  0x2a   : > { %v2167_v51 = vadd.f32 %v1492_v48, %v1491_v50  ;;  %1096 = vperm.xlu2 %1811, %v809_v53  }
  0x2b   : > { %1711 = vmatmul.msk.bf16.gmra.mxu0 %vm354_vm0, %v1770_v57  ;;  %1715 = vmatmul.msk.bf16.gmra.mxu2 %vm354_vm0, %v1774_v60  ;;  %v631_v23 = vadd.f32 %v630_v19, %v629_v21  ;;  %v815_v57 = vld [vmem:[%s2132_s12 + $0x58] sm:$0xff]  ;;  %v818_v60 = vld [vmem:[%s2132_s12 + $0x70] sm:$0xff] }
  0x2c   : > { %1713 = vmatmul.msk.bf16.gmra.mxu1 %vm354_vm0, %v1772_v0  ;;  %1717 = vmatmul.msk.bf16.gmra.mxu3 %vm354_vm0, %v1776_v2  ;;  %2971 = vst [vmem:[#allocation6_spill] sm:$0xff] %v2167_v51  ;;  %v816_v0 = vld [vmem:[%s2132_s12 + $0x60] sm:$0xff] }
  0x2d   : > { %v633_v32 = vadd.f32 %v632_v7, %v631_v23  ;;  %1111 = vperm.xlu0 %1810, %v814_v56   ;;  %v2183_v2 = vld [vmem:[%s2939_s3] ss:$0 sm:$0xff]  ;;  %v2209_v23 = vand.u32 127, %v2942_v1 }
  0x2f   : > { %v635_v34 = vadd.f32 %v634_v28, %v633_v32 }
  0x31   : > { %v637_v37 = vadd.f32 %v636_v33, %v635_v34 }
  0x32   : > { %1105 = vperm.xlu2 %1811, %v812_v55  }
  0x33   : > { %v639_v38 = vadd.f32 %v638_v35, %v637_v37 }
  0x35   : > { %640 = vadd.xlane.f32.xlu1 %v639_v38  ;;  %1120 = vperm.xlu0 %1810, %v817_v59  }
  0x3a   : > { %1114 = vperm.xlu2 %1811, %v815_v57  }
  0x42   : > { %1123 = vperm.xlu2 %1811, %v818_v60  }
  0x4e   : > { %1087 = vperm.xlu1 %1812, %v806_v39  }
  0x56   : > { %1093 = vperm.xlu1 %1812, %v808_v61  }
  0x5e   : > { %1099 = vperm.xlu1 %1812, %v810_v62  }
  0x66   : > { %1108 = vperm.xlu1 %1812, %v813_v63  }
  0x6e   : > { %1117 = vperm.xlu1 %1812, %v816_v0  }
  0x74   : > { %v1085_v28 = vpop.permute.xlu2 %1084 }
  0x75   : > { %vm1129_vm8 = vcmp.eq.s32.totalorder %v2209_v23, %v1085_v28 }
  0x76   : > { %v2213_v33 = vsel %vm1129_vm8, 1.0, %v2943_v24 }
  0x7c   : > { %v1091_v54 = vpop.permute.xlu2 %1090 }
  0x7d   : > { %vm1131_vm10 = vcmp.eq.s32.totalorder %v2209_v23, %v1091_v54 }
  0x7e   : > { %v2243_v62 = vsel %vm1131_vm10, 1.0, %v2943_v24 }
  0x8f   : > { %v1082_v34 = vpop.permute.xlu0 %1081 }
  0x90   : > { %vm1128_vm9 = vcmp.eq.s32.totalorder %v2209_v23, %v1082_v34 }
  0x91   : > { %v2217_v37 = vsel %vm1128_vm9, 1.0, %v2943_v24 }
  0x98   : > { %v388_v5 = vpop.f32.mrf.mxu0 }
  0x99   : > { %v2186_v6 = vadd.f32 %v2183_v2, %v388_v5  ;;  %v398_v8 = vpop.f32.mrf.mxu1  ;;  %v1097_v5 = vpop.permute.xlu2 %1096 }
  0x9a   : > { %v2194_v12 = vadd.f32 %v2183_v2, %v398_v8  ;;  %vm1133_vm12 = vcmp.eq.s32.totalorder %v2209_v23, %v1097_v5 }
  0x9b   : > { %v821_v9 = vsel %vm820_vm7, %v2186_v6, -inf  ;;  %v428_v11 = vpack.c.bf16 %v2186_v6, %v2186_v6 }
  0x9c   : > { %822 = vmax.xlane.f32.xlu2 %v821_v9  ;;  %v833_v16 = vsel %vm820_vm7, %v2194_v12, -inf  ;;  %v432_v43 = vpack.c.bf16 %v2194_v12, %v2194_v12 }
  0x9d   : > { %460 = vrot.lane.b32.xlu0 %v428_v11, %s1943_s15  ;;  %v2256_v11 = vsel %vm1133_vm12, 1.0, %v2943_v24 }
  0x9e   : > { %v408_v3 = vpop.f32.mrf.mxu2 }
  0x9f   : > { %v418_v14 = vpop.f32.mrf.mxu3  ;;  %v2225_v50 = vadd.f32 %v2183_v2, %v408_v3 }
  0xa0   : > { %v2197_v15 = vadd.f32 %v2183_v2, %v418_v14  ;;  %v1103_v14 = vpop.permute.xlu0 %1102 }
  0xa1   : > { %v436_v56 = vpack.c.bf16 %v2225_v50, %v2225_v50  ;;  %v400_v57 = vpop.f32.mrf.mxu1  ;;  %v845_v60 = vsel %vm820_vm7, %v2225_v50, -inf  ;;  %vm1135_vm14 = vcmp.eq.s32.totalorder %v2209_v23, %v1103_v14 }
  0xa2   : > { %v857_v18 = vsel %vm820_vm7, %v2197_v15, -inf  ;;  %v2238_v59 = vadd.f32 %v2183_v2, %v400_v57 }
  0xa3   : > { %858 = vmax.xlane.f32.xlu1 %v857_v18 }
  0xa4   : > { %834 = vmax.xlane.f32.xlu2 %v833_v16  ;;  %v433_v63 = vpack.c.bf16 %v2238_v59, %v2238_v59 }
  0xa6   : > { %v410_v19 = vpop.f32.mrf.mxu2 }
  0xa7   : > { %v2204_v21 = vadd.f32 %v2183_v2, %v410_v19  ;;  %v420_v48 = vpop.f32.mrf.mxu3  ;;  %v2266_v19 = vsel %vm1135_vm14, 1.0, %v2943_v24 }
  0xa8   : > { %v641_v29 = vpop.xlane.xlu1 %640  ;;  %v2228_v53 = vadd.f32 %v2183_v2, %v420_v48  ;;  %v1112_v34 = vpop.permute.xlu0 %1111 }
  0xa9   : > { %v848_v7 = vsel %vm820_vm7, %v2204_v21, -inf  ;;  %v642_v32 = vrot.slane %v641_v29, 4  ;;  %vm1138_vm2 = vcmp.eq.s32.totalorder %v2209_v23, %v1112_v34  ;;  %v437_v1 = vpack.c.bf16 %v2204_v21, %v2204_v21 }
  0xaa   : > { %v441_v55 = vpack.c.bf16 %v2228_v53, %v2228_v53 }
  0xab   : > { %849 = vmax.xlane.f32.xlu1 %v848_v7  ;;  %v643_v35 = vadd.f32 %v642_v32, %v641_v29  ;;  %v440_v7 = vpack.c.bf16 %v2197_v15, %v2197_v15  ;;  %v1106_v29 = vpop.permute.xlu2 %1105 }
  0xac   : > { %vm1136_vm1 = vcmp.eq.s32.totalorder %v2209_v23, %v1106_v29 }
  0xad   : > { %v644_v39 = vrot.slane %v643_v35, 2 }
  0xae   : > { %v413_v14 = vpop.f32.mrf.mxu2 }
  0xaf   : > { %v645_v40 = vadd.f32 %v644_v39, %v643_v35  ;;  %v2279_v39 = vsel %vm1136_vm1, 1.0, %v2943_v24 }
  0xb1   : > { %v646_v44 = vrot.slane %v645_v40, 1 }
  0xb3   : > { %v647_v49 = vadd.f32 %v646_v44, %v645_v40  ;;  %v2289_v44 = vsel %vm1138_vm2, 1.0, %v2943_v24  ;;  %v1115_v48 = vpop.permute.xlu2 %1114 }
  0xb4   : > { %vm1139_vm5 = vcmp.eq.s32.totalorder %v2209_v23, %v1115_v48 }
  0xb5   : > { %1793 = vpush %v647_v49  ;;  %v2293_v49 = vsel %vm1139_vm5, 1.0, %v2943_v24 }
  0xbb   : > { %v2321_v48 = vpop.permute.xlu2 %1123 }
  0xbc   : > { %468 = vrot.lane.b32.xlu2 %v432_v43, %s1943_s15 }
  0xc0   : > { %v1088_v61 = vpop.permute.xlu1 %1087 }
  0xc1   : > { %vm1130_vm11 = vcmp.eq.s32.totalorder %v2209_v23, %v1088_v61  ;;  %v860_v61 = vsel %vm820_vm7, %v2228_v53, -inf }
  0xc2   : > { %v2249_v0 = vsel %vm1130_vm11, 1.0, %v2943_v24  ;;  %vm981_vm11 = vcmask 162816  }
  0xc3   : > { %v1818_v8 = vpack.i.bf16 %v2243_v62, %v2249_v0 }
  0xc4   : > { %486 = vrot.lane.b32.xlu1 %v441_v55, %s1943_s15  ;;  %476 = vrot.lane.b32.xlu2 %v436_v56, %s1943_s15  ;;  %v403_v55 = vpop.f32.mrf.mxu1 }
  0xc5   : > { %v2298_v56 = vadd.f32 %v2183_v2, %v403_v55  ;;  %v2324_v55 = vpop.permute.xlu0 %1120 }
  0xc6   : > { %vm1141_vm9 = vcmp.eq.s32.totalorder %v2209_v23, %v2324_v55 }
  0xc7   : > { %846 = vmax.xlane.f32.xlu0 %v845_v60  ;;  %v839_v57 = vsel %vm820_vm7, %v2298_v56, -inf  ;;  %v390_v60 = vpop.f32.mrf.mxu0  ;;  %v434_v54 = vpack.c.bf16 %v2298_v56, %v2298_v56 }
  0xc8   : > { %v1094_v9 = vpop.permute.xlu1 %1093 }
  0xc9   : > { %vm1132_vm13 = vcmp.eq.s32.totalorder %v2209_v23, %v1094_v9 }
  0xca   : > { %v2260_v3 = vsel %vm1132_vm13, 1.0, %v2943_v24 }
  0xcc   : > { %470 = vrot.lane.b32.xlu2 %v433_v63, %s1943_s15 }
  0xcf   : > { %v393_v63 = vpop.f32.mrf.mxu0 }
  0xd0   : > { %v1100_v18 = vpop.permute.xlu1 %1099  ;;  %v2305_v5 = vadd.f32 %v2183_v2, %v393_v63 }
  0xd1   : > { %vm1134_vm15 = vcmp.eq.s32.totalorder %v2209_v23, %v1100_v18  ;;  %v2310_v18 = vadd.f32 %v2183_v2, %v413_v14 }
  0xd2   : > { %v2272_v28 = vsel %vm1134_vm15, 1.0, %v2943_v24  ;;  %v827_v9 = vsel %vm820_vm7, %v2305_v5, -inf  ;;  %v430_v34 = vpack.c.bf16 %v2305_v5, %v2305_v5 }
  0xd3   : > { %v851_v29 = vsel %vm820_vm7, %v2310_v18, -inf }
  0xd8   : > { %v1109_v35 = vpop.permute.xlu1 %1108 }
  0xd9   : > { %vm1137_vm3 = vcmp.eq.s32.totalorder %v2209_v23, %v1109_v35 }
  0xda   : > { %v2284_v40 = vsel %vm1137_vm3, 1.0, %v2943_v24 }
  0xdb   : > { %484 = vrot.lane.b32.xlu0 %v440_v7, %s1943_s15  ;;  %v2313_v7 = vadd.f32 %v2183_v2, %v390_v60  ;;  %v836_v60 = vsel %vm820_vm7, %v2238_v59, -inf }
  0xdd   : > { %v824_v35 = vsel %vm820_vm7, %v2313_v7, -inf }
  0xe6   : > { %s2620_s21 = spop %1793 }
  0xee   : > { %840 = vmax.xlane.f32.xlu1 %v839_v57  ;;  %v438_v57 = vpack.c.bf16 %v2310_v18, %v2310_v18 }
  0xf5   : > { %861 = vmax.xlane.f32.xlu2 %v860_v61 }
  0xfd   : > { %828 = vmax.xlane.f32.xlu2 %v827_v9  ;;  %v423_v9 = vpop.f32.mrf.mxu3 }
  0xfe   : > { %v2343_v14 = vadd.f32 %v2183_v2, %v423_v9 }
 0x105   : > { %852 = vmax.xlane.f32.xlu2 %v851_v29  ;;  %825 = vmax.xlane.f32.xlu0 %v824_v35  ;;  %v2349_v35 = vpop.permute.xlu1 %1117 }
 0x106   : > { %vm1140_vm8 = vcmp.eq.s32.totalorder %v2209_v23, %v2349_v35 }
 0x107   : > { %464 = vrot.lane.b32.xlu1 %v430_v34, %s1943_s15  ;;  %v442_v34 = vpack.c.bf16 %v2343_v14, %v2343_v14 }
 0x10d   : > { %837 = vmax.xlane.f32.xlu0 %v836_v60  ;;  %v429_v60 = vpack.c.bf16 %v2313_v7, %v2313_v7 }
 0x10f   : > { %480 = vrot.lane.b32.xlu1 %v438_v57, %s1943_s15  ;;  %v2331_v61 = vpop.xlane.xlu2 %822  ;;  %v461_v63 = vpop.permute.xlu0 %460 }
 0x110   : > { %509 = vst.msk [vmem:[%s2338_s20] sm:$0xf] %vm508_vm6, %v461_v63 }
 0x116   : > { %v2357_v63 = vpop.xlane.xlu1 %858 }
 0x117   : > { %v2345_v29 = vpop.xlane.xlu2 %834  ;;  %2973 = vst [vmem:[#allocation8_spill] sm:$0xff] %v2357_v63 }
 0x118   : > { %2972 = vst [vmem:[#allocation7_spill] sm:$0xff] %v2345_v29 }
 0x11d   : > { %488 = vrot.lane.b32.xlu2 %v442_v34, %s1943_s15 }
 0x11e   : > { %v2364_v34 = vpop.xlane.xlu1 %849 }
 0x11f   : > { %v469_v57 = vpop.permute.xlu2 %468  ;;  %2974 = vst [vmem:[#allocation9_spill] sm:$0xff] %v2364_v34 }
 0x120   : > { %513 = vst.msk [vmem:[%s2338_s20 + $0x10] sm:$0xf] %vm508_vm6, %v469_v57  ;;  %v395_v57 = vpop.f32.mrf.mxu0 }
 0x121   : > { %462 = vrot.lane.b32.xlu0 %v429_v60, %s1943_s15  ;;  %v2372_v60 = vadd.f32 %v2183_v2, %v395_v57  ;;  %v415_v57 = vpop.f32.mrf.mxu2 }
 0x122   : > { %v2395_v43 = vadd.f32 %v2183_v2, %v415_v57  ;;  %v2976_v57 = vpack.i.bf16 %v2284_v40, %v2279_v39 }
 0x127   : > { %v477_v9 = vpop.permute.xlu2 %476 }
 0x128   : > { %517 = vst.msk [vmem:[%s2338_s20 + $0x20] sm:$0xf] %vm508_vm6, %v477_v9  ;;  %v405_v9 = vpop.f32.mrf.mxu1 }
 0x129   : > { %478 = vrot.lane.b32.xlu0 %v437_v1, %s1943_s15  ;;  %v830_v1 = vsel %vm820_vm7, %v2372_v60, -inf  ;;  %v2379_v32 = vadd.f32 %v2183_v2, %v405_v9  ;;  %v863_v9 = vsel %vm820_vm7, %v2343_v14, -inf }
 0x12f   : > { %v471_v16 = vpop.permute.xlu2 %470 }
 0x130   : > { %514 = vst.msk [vmem:[%s2338_s20 + $0x14] sm:$0xf] %vm508_vm6, %v471_v16  ;;  %v842_v16 = vsel %vm820_vm7, %v2379_v32, -inf }
 0x131   : > { %472 = vrot.lane.b32.xlu0 %v434_v54, %s1943_s15 }
 0x136   : > { %v487_v24 = vpop.permute.xlu1 %486 }
 0x137   : > { %522 = vst.msk [vmem:[%s2338_s20 + $0x34] sm:$0xf] %vm508_vm6, %v487_v24  ;;  %v431_v24 = vpack.c.bf16 %v2372_v60, %v2372_v60 }
 0x139   : > { %831 = vmax.xlane.f32.xlu1 %v830_v1  ;;  %v435_v1 = vpack.c.bf16 %v2379_v32, %v2379_v32 }
 0x13a   : > { %v2381_v38 = vpop.xlane.xlu0 %846 }
 0x13b   : > { %2975 = vst [vmem:[#allocation10_spill] sm:$0xff] %v2381_v38 }
 0x146   : > { %843 = vmax.xlane.f32.xlu2 %v842_v16  ;;  %v439_v16 = vpack.c.bf16 %v2395_v43, %v2395_v43 }
 0x14d   : > { %v485_v54 = vpop.permute.xlu0 %484 }
 0x14e   : > { %521 = vst.msk [vmem:[%s2338_s20 + $0x30] sm:$0xf] %vm508_vm6, %v485_v54  ;;  %v854_v54 = vsel %vm820_vm7, %v2395_v43, -inf }
 0x152   : > { %466 = vrot.lane.b32.xlu1 %v431_v24, %s1943_s15  ;;  %v425_v24 = vpop.f32.mrf.mxu3 }
 0x15a   : > { %474 = vrot.lane.b32.xlu1 %v435_v1, %s1943_s15  ;;  %v2412_v1 = vadd.f32 %v2183_v2, %v425_v24  ;;  %v2984_v24 = vmov 0.0  }
 0x15b   : > { %864 = vmax.xlane.f32.xlu0 %v863_v9 }
 0x15c   : > { %v866_v40 = vsel %vm820_vm7, %v2412_v1, -inf  ;;  %vm1142_vm7 = vcmp.eq.s32.totalorder %v2209_v23, %v2321_v48 }
 0x15e   : > { %482 = vrot.lane.b32.xlu2 %v439_v16, %s1943_s15  ;;  %v443_v16 = vpack.c.bf16 %v2412_v1, %v2412_v1 }
 0x161   : > { %v2414_v9 = vpop.xlane.xlu1 %840 }
 0x162   : > { %2977 = vst [vmem:[#allocation11_spill] sm:$0xff] %v2414_v9 }
 0x163   : > { %855 = vmax.xlane.f32.xlu0 %v854_v54 }
 0x166   : > { %1819 = vrot.lane.b32.xlu2 %v1818_v8, %s1943_s15  ;;  %v2980_v8 = vpack.i.bf16 %v2213_v33, %v2217_v37  ;;  %v2982_v33 = vpack.i.bf16 %v2266_v19, %v2272_v28  ;;  %v819_v19 = vld [vmem:[%s2132_s12 + $0x78] sm:$0xff] }
 0x168   : > { %v2418_v54 = vpop.xlane.xlu2 %861 }
 0x169   : > { %2978 = vst [vmem:[#allocation12_spill] sm:$0xff] %v2418_v54 }
 0x16e   : > { %1834 = vrot.lane.b32.xlu2 %v2976_v57, %s1943_s15  ;;  %v1747_v57 = vsel %vm1140_vm8, 1.0, %v2984_v24 }
 0x170   : > { %v2423_v0 = vpop.xlane.xlu2 %828 }
 0x171   : > { %2979 = vst [vmem:[#allocation13_spill] sm:$0xff] %v2423_v0 }
 0x177   : > { %490 = vrot.lane.b32.xlu0 %v443_v16, %s1943_s15  ;;  %v1748_v16 = vsel %vm1141_vm9, 1.0, %v2984_v24 }
 0x178   : > { %v2429_v2 = vpop.xlane.xlu0 %825  ;;  %v2443_v37 = vpop.xlane.xlu2 %852 }
 0x179   : > { %v465_v62 = vpop.permute.xlu1 %464  ;;  %2981 = vst [vmem:[#allocation14_spill] sm:$0xff] %v2429_v2 }
 0x17a   : > { %511 = vst.msk [vmem:[%s2338_s20 + $0x8] sm:$0xf] %vm508_vm6, %v465_v62 }
 0x17b   : > { %2983 = vst [vmem:[#allocation15_spill] sm:$0xff] %v2443_v37 }
 0x17f   : > { %1814 = vrot.lane.b32.xlu0 %v2980_v8, %s1943_s15  ;;  %v1843_v8 = vpack.i.bf16 %v1748_v16, %v1747_v57 }
 0x180   : > { %v2447_v62 = vpop.xlane.xlu0 %837  ;;  %v489_v35 = vpop.permute.xlu2 %488 }
 0x181   : > { %v481_v39 = vpop.permute.xlu1 %480  ;;  %2985 = vst [vmem:[#allocation16_spill] sm:$0xff] %v2447_v62 }
 0x182   : > { %519 = vst.msk [vmem:[%s2338_s20 + $0x28] sm:$0xf] %vm508_vm6, %v481_v39 }
 0x183   : > { %523 = vst.msk [vmem:[%s2338_s20 + $0x38] sm:$0xf] %vm508_vm6, %v489_v35 }
 0x184   : > { %867 = vmax.xlane.f32.xlu1 %v866_v40  ;;  %v2986_v40 = vpack.i.bf16 %v2256_v11, %v2260_v3 }
 0x187   : > { %1829 = vrot.lane.b32.xlu0 %v2982_v33, %s1943_s15  ;;  %v2987_v33 = vpack.i.bf16 %v2293_v49, %v2289_v44 }
 0x18f   : > { %1844 = vrot.lane.b32.xlu0 %v1843_v8, %s1943_s15 }
 0x193   : > { %v463_v55 = vpop.permute.xlu0 %462 }
 0x194   : > { %510 = vst.msk [vmem:[%s2338_s20 + $0x4] sm:$0xf] %vm508_vm6, %v463_v55 }
 0x19b   : > { %v479_v28 = vpop.permute.xlu0 %478 }
 0x19c   : > { %518 = vst.msk [vmem:[%s2338_s20 + $0x24] sm:$0xf] %vm508_vm6, %v479_v28 }
 0x19d   : > { %1126 = vperm.xlu1 %1812, %v819_v19  }
 0x1a3   : > { %v473_v39 = vpop.permute.xlu0 %472 }
 0x1a4   : > { %515 = vst.msk [vmem:[%s2338_s20 + $0x18] sm:$0xf] %vm508_vm6, %v473_v39 }
 0x1a5   : > { %1824 = vrot.lane.b32.xlu1 %v2986_v40, %s1943_s15 }
 0x1ac   : > { %v2469_v16 = vpop.xlane.xlu1 %831 }
 0x1ad   : > { %1839 = vrot.lane.b32.xlu1 %v2987_v33, %s1943_s15  ;;  %2989 = vst [vmem:[#allocation18_spill] sm:$0xff] %v2469_v16 }
 0x1b9   : > { %v2467_v57 = vpop.xlane.xlu2 %843 }
 0x1ba   : > { %2988 = vst [vmem:[#allocation17_spill] sm:$0xff] %v2467_v57 }
 0x1c1   : > { %v483_v8 = vpop.permute.xlu2 %482 }
 0x1c2   : > { %520 = vst.msk [vmem:[%s2338_s20 + $0x2c] sm:$0xf] %vm508_vm6, %v483_v8 }
 0x1c4   : > { %v467_v35 = vpop.permute.xlu1 %466 }
 0x1c5   : > { %512 = vst.msk [vmem:[%s2338_s20 + $0xc] sm:$0xf] %vm508_vm6, %v467_v35 }
 0x1c9   : > { %v1820_v33 = vpop.permute.xlu2 %1819 }
 0x1ca   : > { %v1822_v8 = vunpack.i.h.bf16 %v1820_v33 }
 0x1cc   : > { %v475_v55 = vpop.permute.xlu1 %474  ;;  %v1243_v35 = vmul.f32 %v1822_v8, %v2372_v60 }
 0x1cd   : > { %516 = vst.msk [vmem:[%s2338_s20 + $0x1c] sm:$0xf] %vm508_vm6, %v475_v55 }
 0x1ce   : > { %v2477_v11 = vpop.xlane.xlu0 %864 }
 0x1cf   : > { %2990 = vst [vmem:[#allocation19_spill] sm:$0xff] %v2477_v11 }
 0x1d1   : > { %v1835_v41 = vpop.permute.xlu2 %1834 }
 0x1d6   : > { %v2479_v3 = vpop.xlane.xlu0 %855 }
 0x1d7   : > { %2991 = vst [vmem:[#allocation20_spill] sm:$0xff] %v2479_v3 }
 0x1e9   : > { %v491_v19 = vpop.permute.xlu0 %490 }
 0x1ea   : > { %524 = vst.msk [vmem:[%s2338_s20 + $0x3c] sm:$0xf] %vm508_vm6, %v491_v19 }
 0x1f1   : > { %v1815_v44 = vpop.permute.xlu0 %1814 }
 0x1f2   : > { %v1817_v49 = vunpack.i.h.bf16 %v1815_v44  ;;  %v1816_v28 = vunpack.i.l.bf16 %v1815_v44 }
 0x1f4   : > { %v1241_v39 = vmul.f32 %v1817_v49, %v2313_v7  ;;  %v1240_v40 = vmul.f32 %v1816_v28, %v2186_v6  ;;  %v1837_v49 = vunpack.i.h.bf16 %v1835_v41 }
 0x1f6   : > { %1274 = vrot.lane.b32.xlu0 %v1241_v39, %s1943_s15  ;;  %1272 = vrot.lane.b32.xlu1 %v1240_v40, %s1943_s15  ;;  %v1249_v28 = vmul.f32 %v1837_v49, %v2204_v21  ;;  %v1821_v49 = vunpack.i.l.bf16 %v1820_v33 }
 0x1f7   : > { %v2491_v44 = vpop.xlane.xlu1 %867 }
 0x1f8   : > { %2992 = vst [vmem:[#allocation21_spill] sm:$0xff] %v2491_v44 }
 0x1f9   : > { %v1830_v55 = vpop.permute.xlu0 %1829 }
 0x1fa   : > { %v1831_v45 = vunpack.i.l.bf16 %v1830_v55 }
 0x1fc   : > { %v1246_v19 = vmul.f32 %v1831_v45, %v2298_v56  ;;  %v1749_v45 = vsel %vm1142_vm7, 1.0, %v2984_v24 }
 0x1fe   : > { %1278 = vrot.lane.b32.xlu1 %v1243_v35, %s1943_s15 }
 0x201   : > { %v1845_v39 = vpop.permute.xlu0 %1844 }
 0x202   : > { %v1846_v8 = vunpack.i.l.bf16 %v1845_v39 }
 0x204   : > { %v1252_v47 = vmul.f32 %v1846_v8, %v2197_v15 }
 0x206   : > { %1284 = vrot.lane.b32.xlu1 %v1246_v19, %s1943_s15 }
 0x20e   : > { %1290 = vrot.lane.b32.xlu1 %v1249_v28, %s1943_s15  ;;  %v1242_v28 = vmul.f32 %v1821_v49, %v2305_v5 }
 0x20f   : > { %v1127_v40 = vpop.permute.xlu1 %1126 }
 0x210   : > { %vm1143_vm10 = vcmp.eq.s32.totalorder %v2209_v23, %v1127_v40  ;;  %v1832_v23 = vunpack.i.h.bf16 %v1830_v55 }
 0x211   : > { %v1750_v35 = vsel %vm1143_vm10, 1.0, %v2984_v24 }
 0x212   : > { %v1848_v19 = vpack.i.bf16 %v1750_v35, %v1749_v45  ;;  %v1247_v45 = vmul.f32 %v1832_v23, %v2379_v32 }
 0x214   : > { %1849 = vrot.lane.b32.xlu2 %v1848_v19, %s1943_s15 }
 0x216   : > { %1296 = vrot.lane.b32.xlu1 %v1252_v47, %s1943_s15  ;;  %v1836_v47 = vunpack.i.l.bf16 %v1835_v41  ;;  %v870_v41 = vsub.f32 %v2313_v7, %v2429_v2 }
 0x217   : > { %v1825_v51 = vpop.permute.xlu1 %1824 }
 0x218   : > { %v1826_v48 = vunpack.i.l.bf16 %v1825_v51  ;;  %v1827_v40 = vunpack.i.h.bf16 %v1825_v51  ;;  %v1248_v19 = vmul.f32 %v1836_v47, %v2225_v50  ;;  %v1847_v51 = vunpack.i.h.bf16 %v1845_v39 }
 0x219   : > { %v878_v39 = vsub.f32 %v2204_v21, %v2364_v34  ;;  %v875_v47 = vsub.f32 %v2298_v56, %v2414_v9 }
 0x21a   : > { %v1244_v30 = vmul.f32 %v1826_v48, %v2194_v12  ;;  %v1245_v8 = vmul.f32 %v1827_v40, %v2238_v59  ;;  %v887_v40 = vmul.f32 1.442695, %v870_v41  ;;  %v869_v41 = vsub.f32 %v2186_v6, %v2331_v61 }
 0x21c   : > { %1276 = vrot.lane.b32.xlu2 %v1242_v28, %s1943_s15  ;;  %1280 = vrot.lane.b32.xlu0 %v1244_v30, %s1943_s15  ;;  %v881_v30 = vsub.f32 %v2197_v15, %v2357_v63  ;;  %v1253_v28 = vmul.f32 %v1847_v51, %v2228_v53 }
 0x21e   : > { %v909_v48 = vmul.f32 1.442695, %v881_v30 }
 0x21f   : > { %v1840_v35 = vpop.permute.xlu1 %1839 }
 0x220   : > { %v1841_v33 = vunpack.i.l.bf16 %v1840_v35  ;;  %v1842_v55 = vunpack.i.h.bf16 %v1840_v35  ;;  %1854 = vpow2.f32 %v909_v48 }
 0x221   : > { %1856 = vpow2.f32 %v887_v40  ;;  %v877_v40 = vsub.f32 %v2225_v50, %v2381_v38 }
 0x222   : > { %v1250_v49 = vmul.f32 %v1841_v33, %v2310_v18  ;;  %v1251_v23 = vmul.f32 %v1842_v55, %v2395_v43  ;;  %v897_v33 = vmul.f32 1.442695, %v875_v47  ;;  %v884_v55 = vsub.f32 %v2412_v1, %v2491_v44  ;;  %v2993_v44 = vld [vmem:[#allocation2_spill] sm:$0xff] }
 0x223   : > { %v901_v47 = vmul.f32 1.442695, %v877_v40 }
 0x224   : > { %1282 = vrot.lane.b32.xlu2 %v1245_v8, %s1943_s15  ;;  %1286 = vrot.lane.b32.xlu0 %v1247_v45, %s1943_s15  ;;  %v903_v8 = vmul.f32 1.442695, %v878_v39  ;;  %v915_v48 = vmul.f32 1.442695, %v884_v55  ;;  %v885_v39 = vmul.f32 1.442695, %v869_v41  ;;  %v871_v41 = vsub.f32 %v2305_v5, %v2423_v0 }
 0x226   : > { %v1855_v45 = vpop.eup %1854  ;;  %1858 = vpow2.f32 %v903_v8 }
 0x227   : > { %v1857_v35 = vpop.eup %1856  ;;  %1860 = vpow2.f32 %v897_v33 }
 0x22c   : > { %1288 = vrot.lane.b32.xlu2 %v1248_v19, %s1943_s15  ;;  %1292 = vrot.lane.b32.xlu0 %v1250_v49, %s1943_s15  ;;  %v1859_v19 = vpop.eup %1858  ;;  %v872_v49 = vsub.f32 %v2372_v60, %v2469_v16 }
 0x22d   : > { %v1861_v51 = vpop.eup %1860 }
 0x22e   : > { %v891_v30 = vmul.f32 1.442695, %v872_v49  ;;  %v873_v49 = vsub.f32 %v2194_v12, %v2345_v29 }
 0x230   : > { %1862 = vpow2.f32 %v891_v30  ;;  %v874_v30 = vsub.f32 %v2238_v59, %v2447_v62 }
 0x231   : > { %1864 = vpow2.f32 %v915_v48 }
 0x232   : > { %1866 = vpow2.f32 %v885_v39  ;;  %v895_v55 = vmul.f32 1.442695, %v874_v30 }
 0x233   : > { %1868 = vpow2.f32 %v901_v47  ;;  %v651_v47 = vmul.f32 %v2038_v26, %v2313_v7 }
 0x234   : > { %1294 = vrot.lane.b32.xlu2 %v1251_v23, %s1943_s15  ;;  %1298 = vrot.lane.b32.xlu0 %v1253_v28, %s1943_s15 }
 0x235   : > { %v667_v30 = vsel %vm354_vm0, %v651_v47, 0.0 }
 0x236   : > { %v1863_v28 = vpop.eup %1862 }
 0x237   : > { %v1865_v23 = vpop.eup %1864 }
 0x238   : > { %v1867_v48 = vpop.eup %1866 }
 0x23c   : > { %957 = vrot.lane.b32.xlu0 %v1855_v45, %s1943_s15 }
 0x244   : > { %935 = vrot.lane.b32.xlu0 %v1857_v35, %s1943_s15 }
 0x24c   : > { %951 = vrot.lane.b32.xlu0 %v1859_v19, %s1943_s15 }
 0x254   : > { %945 = vrot.lane.b32.xlu0 %v1861_v51, %s1943_s15  ;;  %v893_v51 = vmul.f32 1.442695, %v873_v49 }
 0x256   : > { %1870 = vpow2.f32 %v893_v51  ;;  %v652_v51 = vmul.f32 %v2041_v27, %v2305_v5 }
 0x257   : > { %1872 = vpow2.f32 %v895_v55 }
 0x25c   : > { %939 = vrot.lane.b32.xlu0 %v1863_v28, %s1943_s15  ;;  %v1869_v28 = vpop.eup %1868 }
 0x25d   : > { %v1871_v39 = vpop.eup %1870 }
 0x264   : > { %963 = vrot.lane.b32.xlu0 %v1865_v23, %s1943_s15  ;;  %v882_v23 = vsub.f32 %v2228_v53, %v2418_v54 }
 0x266   : > { %v911_v40 = vmul.f32 1.442695, %v882_v23 }
 0x268   : > { %1874 = vpow2.f32 %v911_v40  ;;  %v669_v40 = vsel %vm354_vm0, %v652_v51, 0.0 }
 0x26e   : > { %v1850_v45 = vpop.permute.xlu2 %1849 }
 0x26f   : > { %v1852_v8 = vunpack.i.h.bf16 %v1850_v45  ;;  %v1851_v35 = vunpack.i.l.bf16 %v1850_v45  ;;  %v889_v45 = vmul.f32 1.442695, %v871_v41 }
 0x271   : > { %v1255_v33 = vmul.f32 %v1852_v8, %v2412_v1  ;;  %v1254_v19 = vmul.f32 %v1851_v35, %v2343_v14  ;;  %v1873_v8 = vpop.eup %1872  ;;  %v650_v35 = vmul.f32 %v2033_v25, %v2186_v6  ;;  %1876 = vpow2.f32 %v889_v45 }
 0x272   : > { %v653_v45 = vmul.f32 %v2049_v31, %v2372_v60 }
 0x273   : > { %1300 = vrot.lane.b32.xlu2 %v1254_v19, %s1943_s15  ;;  %1302 = vrot.lane.b32.xlu1 %v1255_v33, %s1943_s15  ;;  %v879_v33 = vsub.f32 %v2310_v18, %v2443_v37  ;;  %v883_v19 = vsub.f32 %v2343_v14, %v2477_v11  ;;  %v666_v49 = vsel %vm354_vm0, %v650_v35, 0.0  ;;  %v880_v35 = vsub.f32 %v2395_v43, %v2479_v3 }
 0x274   : > { %v668_v23 = vadd.f32 %v667_v30, %v666_v49  ;;  %v671_v49 = vsel %vm354_vm0, %v653_v45, 0.0  ;;  %v656_v45 = vmul.f32 %v2073_v46, %v2298_v56  ;;  %v665_v11 = vmul.f32 %v2993_v44, %v2412_v1 }
 0x275   : > { %v905_v55 = vmul.f32 1.442695, %v879_v33  ;;  %v907_v51 = vmul.f32 1.442695, %v880_v35 }
 0x276   : > { %v670_v47 = vadd.f32 %v669_v40, %v668_v23 }
 0x277   : > { %1878 = vpow2.f32 %v905_v55 }
 0x278   : > { %v672_v54 = vadd.f32 %v671_v49, %v670_v47  ;;  %v677_v47 = vsel %vm354_vm0, %v656_v45, 0.0 }
 0x27b   : > { %933 = vrot.lane.b32.xlu2 %v1867_v48, %s1943_s15  ;;  %949 = vrot.lane.b32.xlu1 %v1869_v28, %s1943_s15  ;;  %v913_v48 = vmul.f32 1.442695, %v883_v19  ;;  %v1875_v28 = vpop.eup %1874  ;;  %v654_v19 = vmul.f32 %v2059_v36, %v2194_v12 }
 0x27c   : > { %v1877_v41 = vpop.eup %1876 }
 0x27d   : > { %1880 = vpow2.f32 %v913_v48  ;;  %v1879_v55 = vpop.eup %1878  ;;  %v655_v48 = vmul.f32 %v2067_v42, %v2238_v59 }
 0x27f   : > { %v675_v40 = vsel %vm354_vm0, %v655_v48, 0.0  ;;  %v660_v48 = vmul.f32 %v2106_v10, %v2310_v18 }
 0x283   : > { %941 = vrot.lane.b32.xlu2 %v1871_v39, %s1943_s15  ;;  %943 = vrot.lane.b32.xlu1 %v1873_v8, %s1943_s15  ;;  %v1275_v39 = vpop.permute.xlu0 %1274  ;;  %v876_v8 = vsub.f32 %v2379_v32, %v2467_v57 }
 0x284   : > { %v1323_v33 = vsel %vm981_vm11, %v1275_v39, 0.0 }
 0x285   : > { %v899_v30 = vmul.f32 1.442695, %v876_v8 }
 0x287   : > { %1882 = vpow2.f32 %v899_v30  ;;  %v658_v30 = vmul.f32 %v2088_v58, %v2225_v50 }
 0x288   : > { %1884 = vpow2.f32 %v907_v51 }
 0x28b   : > { %959 = vrot.lane.b32.xlu2 %v1875_v28, %s1943_s15  ;;  %937 = vrot.lane.b32.xlu1 %v1877_v41, %s1943_s15  ;;  %v1881_v28 = vpop.eup %1880  ;;  %v673_v41 = vsel %vm354_vm0, %v654_v19, 0.0 }
 0x28c   : > { %v674_v23 = vadd.f32 %v673_v41, %v672_v54 }
 0x28d   : > { %v1883_v39 = vpop.eup %1882 }
 0x28e   : > { %1324 = vadd.xlane.f32.xlu0 %v1323_v33  ;;  %v676_v8 = vadd.f32 %v675_v40, %v674_v23  ;;  %v1885_v35 = vpop.eup %1884  ;;  %v657_v33 = vmul.f32 %v2080_v52, %v2379_v32  ;;  %v2595_v49 = vpop.permute.xlu0 %1280 }
 0x28f   : > { %v2605_v23 = vpop.permute.xlu2 %1276 }
 0x290   : > { %v678_v19 = vadd.f32 %v677_v47, %v676_v8  ;;  %v679_v54 = vsel %vm354_vm0, %v657_v33, 0.0  ;;  %v685_v8 = vsel %vm354_vm0, %v660_v48, 0.0  ;;  %v2957_v48 = vstv %s2620_s21 }
 0x292   : > { %v680_v51 = vadd.f32 %v679_v54, %v678_v19  ;;  %v662_v19 = vmul.f32 %v2122_v17, %v2197_v15 }
 0x293   : > { %953 = vrot.lane.b32.xlu2 %v1879_v55, %s1943_s15  ;;  %961 = vrot.lane.b32.xlu1 %v1881_v28, %s1943_s15  ;;  %v681_v55 = vsel %vm354_vm0, %v658_v30, 0.0  ;;  %v659_v28 = vmul.f32 %v2098_v4, %v2204_v21 }
 0x294   : > { %v682_v41 = vadd.f32 %v681_v55, %v680_v51  ;;  %v689_v55 = vsel %vm354_vm0, %v662_v19, 0.0 }
 0x295   : > { %v683_v45 = vsel %vm354_vm0, %v659_v28, 0.0  ;;  %v663_v28 = vmul.f32 %v2127_v20, %v2228_v53 }
 0x296   : > { %v2607_v40 = vpop.permute.xlu0 %1286 }
 0x297   : > { %v2616_v30 = vpop.permute.xlu2 %1282 }
 0x29b   : > { %947 = vrot.lane.b32.xlu2 %v1883_v39, %s1943_s15  ;;  %955 = vrot.lane.b32.xlu1 %v1885_v35, %s1943_s15  ;;  %v684_v39 = vadd.f32 %v683_v45, %v682_v41  ;;  %v661_v35 = vmul.f32 %v2115_v13, %v2395_v43  ;;  %v1273_v45 = vpop.permute.xlu1 %1272 }
 0x29d   : > { %v686_v47 = vadd.f32 %v685_v8, %v684_v39  ;;  %v687_v33 = vsel %vm354_vm0, %v661_v35, 0.0  ;;  %v664_v39 = vmul.f32 %v2137_v22, %v2343_v14  ;;  %v691_v8 = vsel %vm354_vm0, %v663_v28, 0.0 }
 0x29e   : > { %v2618_v51 = vpop.permute.xlu0 %1292  ;;  %v703_v35 = vmax.f32 %v2957_v48, 1.0  ;;  %v1320_v28 = vsel %vm981_vm11, %v1273_v45, 0.0 }
 0x29f   : > { %v688_v54 = vadd.f32 %v687_v33, %v686_v47  ;;  %v693_v33 = vsel %vm354_vm0, %v664_v39, 0.0  ;;  %v2634_v19 = vpop.permute.xlu2 %1288 }
 0x2a0   : > { %1886 = vrcp.f32 %v703_v35  ;;  %vm709_vm12 = vweird.f32 %v703_v35  ;;  %v715_v45 = vand.u32 2147483648, %v703_v35  ;;  %v713_v0 = vand.u32 2147483647, %v703_v35 }
 0x2a1   : > { %v690_v41 = vadd.f32 %v689_v55, %v688_v54  ;;  %v695_v55 = vsel %vm354_vm0, %v665_v11, 0.0 }
 0x2a2   : > { %vm714_vm15 = vcmp.eq.f32.partialorder %v713_v0, 8.507059e+37 }
 0x2a3   : > { %v692_v47 = vadd.f32 %v691_v8, %v690_v41  ;;  %v1279_v63 = vpop.permute.xlu1 %1278 }
 0x2a5   : > { %v694_v54 = vadd.f32 %v693_v33, %v692_v47 }
 0x2a6   : > { %v2636_v37 = vpop.permute.xlu0 %1298  ;;  %v1887_v57 = vpop.eup %1886 }
 0x2a7   : > { %v696_v3 = vadd.f32 %v695_v55, %v694_v54  ;;  %v705_v41 = vmul.f32 %v1887_v57, %v703_v35  ;;  %v2640_v8 = vpop.permute.xlu2 %1294  ;;  %vm710_vm13 = vweird.f32 %v1887_v57 }
 0x2a8   : > { %vm711_vm14 = vmor %vm709_vm12, %vm710_vm13 }
 0x2a9   : > { %v697_v48 = vrot.slane %v696_v3, 4  ;;  %v706_v38 = vsub.f32 1.0, %v705_v41 }
 0x2ab   : > { %v698_v34 = vadd.f32 %v697_v48, %v696_v3  ;;  %v2644_v9 = vpop.permute.xlu1 %1284  ;;  %v707_v47 = vmul.f32 %v1887_v57, %v706_v38  ;;  %v716_v48 = vor.u32 1.1754944e-38, %v715_v45 }
 0x2ad   : > { %v699_v29 = vrot.slane %v698_v34, 2  ;;  %v708_v55 = vadd.f32 %v1887_v57, %v707_v47 }
 0x2ae   : > { %v2642_v39 = vpop.permute.xlu0 %957 }
 0x2af   : > { %v700_v54 = vadd.f32 %v699_v29, %v698_v34 }
 0x2b1   : > { %v701_v16 = vrot.slane %v700_v54, 1 }
 0x2b3   : > { %v2648_v62 = vpop.permute.xlu1 %1290  ;;  %v2651_v2 = vadd.f32 %v701_v16, %v700_v54 }
 0x2b6   : > { %v936_v11 = vpop.permute.xlu0 %935 }
 0x2bb   : > { %v2656_v47 = vpop.permute.xlu1 %1296 }
 0x2be   : > { %v952_v29 = vpop.permute.xlu0 %951 }
 0x2c5   : > { %1321 = vadd.xlane.f32.xlu1 %v1320_v28  ;;  %v712_v28 = vsel %vm711_vm14, %v1887_v57, %v708_v55  ;;  %v1329_v57 = vsel %vm981_vm11, %v1279_v63, 0.0 }
 0x2c6   : > { %v717_v38 = vsel %vm714_vm15, %v716_v48, %v712_v28  ;;  %v946_v54 = vpop.permute.xlu0 %945  ;;  %vm1536_vm15 = vcmask 15360  }
 0x2c7   : > { %v2654_v34 = vmul.f32 %v717_v38, %v2651_v2  ;;  %v1000_v48 = vsel %vm981_vm11, %v946_v54, 0.0 }
 0x2c9   : > { %v719_v0 = vsub.f32 %v2186_v6, %v2654_v34  ;;  %v720_v16 = vsub.f32 %v2313_v7, %v2654_v34  ;;  %v721_v63 = vsub.f32 %v2305_v5, %v2654_v34  ;;  %v723_v5 = vsub.f32 %v2194_v12, %v2654_v34 }
 0x2cb   : > { %v735_v55 = vmul.f32 %v2033_v25, %v719_v0  ;;  %v736_v45 = vmul.f32 %v2038_v26, %v720_v16  ;;  %v722_v25 = vsub.f32 %v2372_v60, %v2654_v34  ;;  %v737_v26 = vmul.f32 %v2041_v27, %v721_v63 }
 0x2cc   : > { %v1326_v16 = vsel %vm981_vm11, %v2605_v23, 0.0  ;;  %v725_v23 = vsub.f32 %v2298_v56, %v2654_v34 }
 0x2cd   : > { %v2646_v33 = vpop.permute.xlu2 %1300  ;;  %v751_v6 = vmul.f32 %v735_v55, %v735_v55  ;;  %v752_v7 = vmul.f32 %v736_v45, %v736_v45  ;;  %v753_v0 = vmul.f32 %v737_v26, %v737_v26  ;;  %v724_v55 = vsub.f32 %v2238_v59, %v2654_v34 }
 0x2ce   : > { %v739_v45 = vmul.f32 %v2059_v36, %v723_v5  ;;  %v1009_v26 = vsel %vm981_vm11, %v952_v29, 0.0  ;;  %v741_v56 = vmul.f32 %v2073_v46, %v725_v23  ;;  %v727_v29 = vsub.f32 %v2225_v50, %v2654_v34 }
 0x2cf   : > { %v768_v38 = vsel %vm354_vm0, %v752_v7, 0.0  ;;  %v1018_v23 = vsel %vm981_vm11, %v2642_v39, 0.0 }
 0x2d0   : > { %v755_v7 = vmul.f32 %v739_v45, %v739_v45  ;;  %v743_v50 = vmul.f32 %v2088_v58, %v727_v29 }
 0x2d5   : > { %v934_v3 = vpop.permute.xlu2 %933 }
 0x2d6   : > { %v982_v41 = vsel %vm981_vm11, %v934_v3, 0.0 }
 0x2d7   : > { %983 = vadd.xlane.f32.xlu2 %v982_v41  ;;  %v767_v41 = vsel %vm354_vm0, %v751_v6, 0.0  ;;  %v740_v6 = vmul.f32 %v2067_v42, %v724_v55  ;;  %v774_v42 = vsel %vm354_vm0, %v755_v7, 0.0  ;;  %v728_v55 = vsub.f32 %v2204_v21, %v2654_v34 }
 0x2d8   : > { %v769_v27 = vadd.f32 %v768_v38, %v767_v41  ;;  %v726_v38 = vsub.f32 %v2379_v32, %v2654_v34  ;;  %v1338_v21 = vsel %vm981_vm11, %v2644_v9, 0.0  ;;  %v731_v9 = vsub.f32 %v2197_v15, %v2654_v34 }
 0x2d9   : > { %v732_v15 = vsub.f32 %v2228_v53, %v2654_v34  ;;  %v1347_v53 = vsel %vm981_vm11, %v2648_v62, 0.0 }
 0x2dd   : > { %v942_v35 = vpop.permute.xlu2 %941 }
 0x2de   : > { %v994_v24 = vsel %vm981_vm11, %v942_v35, 0.0 }
 0x2df   : > { %995 = vadd.xlane.f32.xlu1 %v994_v24  ;;  %1330 = vadd.xlane.f32.xlu2 %v1329_v57  ;;  %v985_v24 = vsel %vm981_vm11, %v936_v11, 0.0  ;;  %v738_v11 = vmul.f32 %v2049_v31, %v722_v25  ;;  %v770_v31 = vsel %vm354_vm0, %v753_v0, 0.0  ;;  %v742_v0 = vmul.f32 %v2080_v52, %v726_v38 }
 0x2e0   : > { %v771_v63 = vadd.f32 %v770_v31, %v769_v27 }
 0x2e1   : > { %v754_v12 = vmul.f32 %v738_v11, %v738_v11  ;;  %v758_v52 = vmul.f32 %v742_v0, %v742_v0 }
 0x2e3   : > { %v772_v25 = vsel %vm354_vm0, %v754_v12, 0.0 }
 0x2e4   : > { %v773_v41 = vadd.f32 %v772_v25, %v771_v63  ;;  %v744_v63 = vmul.f32 %v2098_v4, %v728_v55 }
 0x2e5   : > { %v2666_v28 = vpop.permute.xlu2 %959  ;;  %v2668_v3 = vpop.permute.xlu1 %1302 }
 0x2e6   : > { %v760_v7 = vmul.f32 %v744_v63, %v744_v63 }
 0x2e7   : > { %986 = vadd.xlane.f32.xlu1 %v985_v24  ;;  %1001 = vadd.xlane.f32.xlu2 %v1000_v48  ;;  %v940_v24 = vpop.permute.xlu0 %939 }
 0x2e8   : > { %v991_v59 = vsel %vm981_vm11, %v940_v24, 0.0  ;;  %v759_v24 = vmul.f32 %v743_v50, %v743_v50 }
 0x2ea   : > { %v782_v25 = vsel %vm354_vm0, %v759_v24, 0.0 }
 0x2ed   : > { %v954_v35 = vpop.permute.xlu2 %953  ;;  %v950_v57 = vpop.permute.xlu1 %949 }
 0x2ee   : > { %v1012_v54 = vsel %vm981_vm11, %v954_v35, 0.0  ;;  %v1006_v60 = vsel %vm981_vm11, %v950_v57, 0.0  ;;  %v756_v35 = vmul.f32 %v740_v6, %v740_v6  ;;  %v775_v57 = vadd.f32 %v774_v42, %v773_v41 }
 0x2ef   : > { %1327 = vadd.xlane.f32.xlu1 %v1326_v16  ;;  %1013 = vadd.xlane.f32.xlu2 %v1012_v54  ;;  %v757_v16 = vmul.f32 %v741_v56, %v741_v56  ;;  %v1332_v6 = vsel %vm981_vm11, %v2595_v49, 0.0  ;;  %v784_v41 = vsel %vm354_vm0, %v760_v7, 0.0  ;;  %v1344_v49 = vsel %vm981_vm11, %v2634_v19, 0.0  ;;  %v1920_v7 = vld [vmem:[%s2132_s12 + $0x18] sm:$0xff] }
 0x2f0   : > { %1007 = vadd.xlane.f32.xlu0 %v1006_v60  ;;  %v776_v54 = vsel %vm354_vm0, %v756_v35, 0.0  ;;  %v1335_v60 = vsel %vm981_vm11, %v2616_v30, 0.0  ;;  %v729_v30 = vsub.f32 %v2310_v18, %v2654_v34  ;;  %v730_v18 = vsub.f32 %v2395_v43, %v2654_v34 }
 0x2f1   : > { %v777_v27 = vadd.f32 %v776_v54, %v775_v57  ;;  %v778_v45 = vsel %vm354_vm0, %v757_v16, 0.0  ;;  %v1021_v43 = vsel %vm981_vm11, %v2666_v28, 0.0  ;;  %v964_v57 = vpop.permute.xlu0 %963  ;;  %v733_v19 = vsub.f32 %v2343_v14, %v2654_v34 }
 0x2f2   : > { %v745_v4 = vmul.f32 %v2106_v10, %v729_v30  ;;  %v748_v28 = vmul.f32 %v2127_v20, %v732_v15  ;;  %v1027_v29 = vsel %vm981_vm11, %v964_v57, 0.0  ;;  %v734_v14 = vsub.f32 %v2412_v1, %v2654_v34 }
 0x2f3   : > { %v779_v12 = vadd.f32 %v778_v45, %v777_v27  ;;  %v749_v20 = vmul.f32 %v2137_v22, %v733_v19  ;;  %v1353_v27 = vsel %vm981_vm11, %v2640_v8, 0.0  ;;  %v1365_v8 = vsel %vm981_vm11, %v2668_v3, 0.0 }
 0x2f4   : > { %v764_v16 = vmul.f32 %v748_v28, %v748_v28  ;;  %v1359_v30 = vsel %vm981_vm11, %v2636_v37, 0.0  ;;  %vm1371_vm1 = vcmp.ne.s32.totalorder %v1920_v7, 4294967295 }
 0x2f5   : > { %v944_v48 = vpop.permute.xlu1 %943  ;;  %v948_v5 = vpop.permute.xlu2 %947 }
 0x2f6   : > { %v997_v36 = vsel %vm981_vm11, %v944_v48, 0.0  ;;  %v1003_v32 = vsel %vm981_vm11, %v948_v5, 0.0  ;;  %v780_v48 = vsel %vm354_vm0, %v758_v52, 0.0  ;;  %v792_v62 = vsel %vm354_vm0, %v764_v16, 0.0 }
 0x2f7   : > { %1010 = vadd.xlane.f32.xlu1 %v1009_v26  ;;  %992 = vadd.xlane.f32.xlu2 %v991_v59  ;;  %v781_v58 = vadd.f32 %v780_v48, %v779_v12  ;;  %v746_v59 = vmul.f32 %v2115_v13, %v730_v18  ;;  %v747_v13 = vmul.f32 %v2122_v17, %v731_v9  ;;  %v1341_v17 = vsel %vm981_vm11, %v2607_v40, 0.0 }
 0x2f8   : > { %998 = vadd.xlane.f32.xlu0 %v997_v36  ;;  %v761_v36 = vmul.f32 %v745_v4, %v745_v4  ;;  %v1356_v40 = vsel %vm981_vm11, %v2656_v47, 0.0  ;;  %v1362_v52 = vsel %vm981_vm11, %v2646_v33, 0.0  ;;  %v1350_v47 = vsel %vm981_vm11, %v2618_v51, 0.0 }
 0x2f9   : > { %v783_v26 = vadd.f32 %v782_v25, %v781_v58  ;;  %v762_v56 = vmul.f32 %v746_v59, %v746_v59  ;;  %v763_v5 = vmul.f32 %v747_v13, %v747_v13  ;;  %v1921_v59 = vld [vmem:[%s2132_s12 + $0x20] sm:$0xff] }
 0x2fa   : > { %v786_v35 = vsel %vm354_vm0, %v761_v36, 0.0  ;;  %vm1372_vm2 = vcmp.ne.s32.totalorder %v1921_v59, 4294967295 }
 0x2fb   : > { %v785_v38 = vadd.f32 %v784_v41, %v783_v26  ;;  %v790_v54 = vsel %vm354_vm0, %v763_v5, 0.0  ;;  %v2994_v26 = vmov 0.0   ;;  %v1922_v41 = vld [vmem:[%s2132_s12 + $0x28] sm:$0xff]  ;;  %v2997_v5 = vld [vmem:[#allocation5_spill] sm:$0xff] }
 0x2fc   : > { %vm1373_vm3 = vcmp.ne.s32.totalorder %v1922_v41, 4294967295 }
 0x2fd   : > { %v938_v11 = vpop.permute.xlu1 %937  ;;  %v787_v42 = vadd.f32 %v786_v35, %v785_v38  ;;  %v2791_v35 = vsel %vm1372_vm2, 1.0, %v2994_v26  ;;  %vm1543_vm2 = vcmask 1040384  }
 0x2fe   : > { %v988_v46 = vsel %vm981_vm11, %v938_v11, 0.0  ;;  %v788_v11 = vsel %vm354_vm0, %v762_v56, 0.0  ;;  %v2788_v56 = vsel %vm1373_vm3, 1.0, %v2994_v26  ;;  %v1496_v28 = vsel %vm608_vm4, %v2791_v35, 0.0 }
 0x2ff   : > { %1336 = vadd.xlane.f32.xlu1 %v1335_v60  ;;  %1004 = vadd.xlane.f32.xlu2 %v1003_v32  ;;  %v789_v0 = vadd.f32 %v788_v11, %v787_v42  ;;  %v750_v32 = vmul.f32 %v2993_v44, %v734_v14  ;;  %v2996_v42 = vld [vmem:[#allocation6_spill] sm:$0xff]  ;;  %v1498_v19 = vsel %vm608_vm4, %v2788_v56, 0.0 }
 0x300   : > { %989 = vadd.xlane.f32.xlu0 %v988_v46  ;;  %v765_v46 = vmul.f32 %v749_v20, %v749_v20 }
 0x301   : > { %v791_v60 = vadd.f32 %v790_v54, %v789_v0  ;;  %v766_v1 = vmul.f32 %v750_v32, %v750_v32  ;;  %v1325_v37 = vpop.xlane.xlu0 %1324  ;;  %v1923_v0 = vld [vmem:[%s2132_s12 + $0x30] sm:$0xff] }
 0x302   : > { %v794_v34 = vsel %vm354_vm0, %v765_v46, 0.0  ;;  %vm1374_vm5 = vcmp.ne.s32.totalorder %v1923_v0, 4294967295  ;;  %v1931_v0 = vld [vmem:[%s2132_s12 + $0x70] sm:$0xff] }
 0x303   : > { %v793_v55 = vadd.f32 %v792_v62, %v791_v60  ;;  %v796_v44 = vsel %vm354_vm0, %v766_v1, 0.0  ;;  %v1924_v60 = vld [vmem:[%s2132_s12 + $0x38] sm:$0xff]  ;;  %vm1382_vm13 = vcmp.ne.s32.totalorder %v1931_v0, 4294967295 }
 0x304   : > { %vm1375_vm6 = vcmp.ne.s32.totalorder %v1924_v60, 4294967295 }
 0x305   : > { %v962_v31 = vpop.permute.xlu1 %961  ;;  %v795_v50 = vadd.f32 %v794_v34, %v793_v55  ;;  %v2816_v34 = vsel %vm1375_vm6, 1.0, %v2994_v26 }
 0x306   : > { %v1024_v22 = vsel %vm981_vm11, %v962_v31, 0.0 }
 0x307   : > { %1019 = vadd.xlane.f32.xlu1 %v1018_v23  ;;  %1339 = vadd.xlane.f32.xlu2 %v1338_v21  ;;  %v797_v45 = vadd.f32 %v796_v44, %v795_v50 }
 0x308   : > { %1333 = vadd.xlane.f32.xlu0 %v1332_v6 }
 0x309   : > { %v798_v12 = vrot.slane %v797_v45, 4 }
 0x30b   : > { %v799_v31 = vadd.f32 %v798_v12, %v797_v45 }
 0x30d   : > { %v956_v39 = vpop.permute.xlu1 %955  ;;  %v800_v63 = vrot.slane %v799_v31, 2 }
 0x30e   : > { %v1015_v10 = vsel %vm981_vm11, %v956_v39, 0.0  ;;  %v2776_v39 = vsel %vm1371_vm1, 1.0, %v2994_v26  ;;  %vm1538_vm1 = vcmask 23552  }
 0x30f   : > { %1345 = vadd.xlane.f32.xlu1 %v1344_v49  ;;  %1022 = vadd.xlane.f32.xlu2 %v1021_v43  ;;  %v801_v24 = vadd.f32 %v800_v63, %v799_v31  ;;  %v1494_v36 = vsel %vm608_vm4, %v2776_v39, 0.0 }
 0x310   : > { %1016 = vadd.xlane.f32.xlu0 %v1015_v10  ;;  %v1495_v57 = vadd.f32 %v1494_v36, %v2996_v42  ;;  %v3000_v36 = vld [vmem:[#allocation16_spill] sm:$0xff] }
 0x311   : > { %v802_v33 = vrot.slane %v801_v24, 1 }
 0x313   : > { %v803_v48 = vadd.f32 %v802_v33, %v801_v24 }
 0x317   : > { %1028 = vadd.xlane.f32.xlu1 %v1027_v29  ;;  %1348 = vadd.xlane.f32.xlu2 %v1347_v53  ;;  %v1497_v53 = vadd.f32 %v1496_v28, %v1495_v57 }
 0x318   : > { %1342 = vadd.xlane.f32.xlu0 %v1341_v17  ;;  %v2998_v17 = vld [vmem:[#allocation3_spill] sm:$0xff] }
 0x319   : > { %v1499_v20 = vadd.f32 %v1498_v19, %v1497_v53  ;;  %v1928_v19 = vld [vmem:[%s2132_s12 + $0x50] sm:$0xff] }
 0x31a   : > { %vm1378_vm10 = vcmp.ne.s32.totalorder %v1928_v19, 4294967295 }
 0x31f   : > { %1354 = vadd.xlane.f32.xlu2 %v1353_v27  ;;  %1357 = vadd.xlane.f32.xlu1 %v1356_v40  ;;  %v2805_v27 = vsel %vm1374_vm5, 1.0, %v2994_v26  ;;  %v1925_v40 = vld [vmem:[%s2132_s12 + $0x40] sm:$0xff] }
 0x320   : > { %1025 = vadd.xlane.f32.xlu0 %v1024_v22  ;;  %vm1376_vm8 = vcmp.ne.s32.totalorder %v1925_v40, 4294967295  ;;  %v1500_v22 = vsel %vm608_vm4, %v2805_v27, 0.0 }
 0x321   : > { %v2813_v1 = vsel %vm1376_vm8, 1.0, %v2994_v26  ;;  %v1501_v50 = vadd.f32 %v1500_v22, %v1499_v20 }
 0x322   : > { %v1504_v44 = vsel %vm608_vm4, %v2813_v1, 0.0 }
 0x327   : > { %1363 = vadd.xlane.f32.xlu2 %v1362_v52  ;;  %1366 = vadd.xlane.f32.xlu1 %v1365_v8  ;;  %v1502_v52 = vsel %vm608_vm4, %v2816_v34, 0.0 }
 0x328   : > { %1351 = vadd.xlane.f32.xlu0 %v1350_v47  ;;  %v1503_v8 = vadd.f32 %v1502_v52, %v1501_v50 }
 0x330   : > { %1360 = vadd.xlane.f32.xlu0 %v1359_v30  ;;  %v1505_v30 = vadd.f32 %v1504_v44, %v1503_v8 }
 0x338   : > { %v1322_v3 = vpop.xlane.xlu1 %1321 }
 0x340   : > { %1531 = vrot.lane.b32.xlu1 %v803_v48, %s1943_s15 }
 0x34a   : > { %v984_v23 = vpop.xlane.xlu2 %983 }
 0x34b   : > { %1888 = vlog2.f32 %v984_v23 }
 0x351   : > { %v1889_v58 = vpop.eup %1888 }
 0x352   : > { %v2771_v21 = vpop.xlane.xlu2 %1330  ;;  %v996_v51 = vpop.xlane.xlu1 %995  ;;  %v1031_v4 = vmul.f32 0.6931472, %v1889_v58 }
 0x354   : > { %v1062_v25 = vadd.f32 %v1031_v4, %v2331_v61  ;;  %v2995_v61 = vld [vmem:[#allocation14_spill] sm:$0xff] }
 0x356   : > { %v1416_v10 = vsub.f32 %v1062_v25, %v1322_v3 }
 0x358   : > { %v1432_v11 = vmul.f32 %v2997_v5, %v1416_v10 }
 0x35a   : > { %v1002_v6 = vpop.xlane.xlu2 %1001  ;;  %v987_v18 = vpop.xlane.xlu1 %986  ;;  %v1448_v32 = vsel %vm608_vm4, %v1432_v11, 0.0  ;;  %v1929_v11 = vld [vmem:[%s2132_s12 + $0x60] sm:$0xff] }
 0x35b   : > { %1890 = vlog2.f32 %v987_v18  ;;  %vm1380_vm11 = vcmp.ne.s32.totalorder %v1929_v11, 4294967295 }
 0x361   : > { %v1891_v9 = vpop.eup %1890 }
 0x362   : > { %v2782_v49 = vpop.xlane.xlu2 %1013  ;;  %v2784_v43 = vpop.xlane.xlu1 %1327  ;;  %v1033_v38 = vmul.f32 0.6931472, %v1891_v9  ;;  %v1927_v9 = vld [vmem:[%s2132_s12 + $0x58] sm:$0xff] }
 0x363   : > { %v1008_v15 = vpop.xlane.xlu0 %1007  ;;  %vm1379_vm7 = vcmp.ne.s32.totalorder %v1927_v9, 4294967295 }
 0x364   : > { %v1063_v13 = vadd.f32 %v1033_v38, %v2995_v61  ;;  %v3001_v38 = vld [vmem:[#allocation13_spill] sm:$0xff]  ;;  %v3002_v61 = vld [vmem:[#allocation7_spill] sm:$0xff] }
 0x366   : > { %v1417_v29 = vsub.f32 %v1063_v13, %v1325_v37  ;;  %v1926_v37 = vld [vmem:[%s2132_s12 + $0x48] sm:$0xff] }
 0x367   : > { %vm1377_vm9 = vcmp.ne.s32.totalorder %v1926_v37, 4294967295 }
 0x368   : > { %v1433_v14 = vmul.f32 %v2998_v17, %v1417_v29  ;;  %v2834_v42 = vsel %vm1377_vm9, 1.0, %v2994_v26  ;;  %v1930_v29 = vld [vmem:[%s2132_s12 + $0x68] sm:$0xff] }
 0x369   : > { %v1506_v28 = vsel %vm608_vm4, %v2834_v42, 0.0  ;;  %vm1381_vm12 = vcmp.ne.s32.totalorder %v1930_v29, 4294967295 }
 0x36a   : > { %v993_v16 = vpop.xlane.xlu2 %992  ;;  %v1011_v54 = vpop.xlane.xlu1 %1010  ;;  %v1449_v46 = vsel %vm608_vm4, %v1433_v14, 0.0  ;;  %v3003_v14 = vld [vmem:[#allocation11_spill] sm:$0xff] }
 0x36b   : > { %v999_v62 = vpop.xlane.xlu0 %998  ;;  %v2808_v55 = vadd.f32 %v1449_v46, %v1448_v32  ;;  %1892 = vlog2.f32 %v993_v16  ;;  %v2847_v16 = vsel %vm1379_vm7, 1.0, %v2994_v26  ;;  %v3004_v32 = vld [vmem:[#allocation4_spill] sm:$0xff] }
 0x36c   : > { %1894 = vlog2.f32 %v999_v62  ;;  %v2853_v62 = vsel %vm1378_vm10, 1.0, %v2994_v26  ;;  %v1510_v44 = vsel %vm608_vm4, %v2847_v16, 0.0 }
 0x36d   : > { %1896 = vlog2.f32 %v996_v51  ;;  %v2999_v51 = vld [vmem:[#allocation18_spill] sm:$0xff]  ;;  %v1508_v52 = vsel %vm608_vm4, %v2853_v62, 0.0 }
 0x36e   : > { %1898 = vlog2.f32 %v1002_v6 }
 0x371   : > { %v1893_v45 = vpop.eup %1892 }
 0x372   : > { %v1005_v47 = vpop.xlane.xlu2 %1004  ;;  %v2822_v12 = vpop.xlane.xlu1 %1336  ;;  %v1037_v24 = vmul.f32 0.6931472, %v1893_v45 }
 0x373   : > { %v990_v31 = vpop.xlane.xlu0 %989  ;;  %v1895_v63 = vpop.eup %1894 }
 0x374   : > { %1900 = vlog2.f32 %v990_v31  ;;  %v1897_v33 = vpop.eup %1896  ;;  %v1041_v48 = vmul.f32 0.6931472, %v1895_v63  ;;  %v1065_v58 = vadd.f32 %v1037_v24, %v2999_v51  ;;  %v1932_v51 = vld [vmem:[%s2132_s12 + $0x78] sm:$0xff] }
 0x375   : > { %1902 = vlog2.f32 %v1008_v15  ;;  %v1899_v3 = vpop.eup %1898  ;;  %v1039_v23 = vmul.f32 0.6931472, %v1897_v33  ;;  %v2865_v33 = vsel %vm1380_vm11, 1.0, %v2994_v26  ;;  %vm1383_vm14 = vcmp.ne.s32.totalorder %v1932_v51, 4294967295 }
 0x376   : > { %1904 = vlog2.f32 %v1011_v54  ;;  %v1043_v59 = vmul.f32 0.6931472, %v1899_v3  ;;  %v1067_v41 = vadd.f32 %v1041_v48, %v3000_v36  ;;  %v1419_v10 = vsub.f32 %v1065_v58, %v2771_v21  ;;  %v3006_v36 = vld [vmem:[#allocation9_spill] sm:$0xff] }
 0x377   : > { %1906 = vlog2.f32 %v1005_v47  ;;  %v1066_v13 = vadd.f32 %v1039_v23, %v3002_v61  ;;  %v1512_v3 = vsel %vm608_vm4, %v2865_v33, 0.0 }
 0x378   : > { %v1421_v17 = vsub.f32 %v1067_v41, %v2822_v12  ;;  %v1068_v20 = vadd.f32 %v1043_v59, %v3003_v14  ;;  %v1435_v60 = vmul.f32 %v2776_v39, %v1419_v10  ;;  %1908 = vlog2.f32 %v2782_v49  ;;  %v3007_v49 = vld [vmem:[#allocation17_spill] sm:$0xff] }
 0x37a   : > { %v1901_v18 = vpop.eup %1900  ;;  %v1340_v4 = vpop.xlane.xlu2 %1339  ;;  %v1453_v48 = vsel %vm608_vm4, %v1435_v60, 0.0 }
 0x37b   : > { %v2826_v6 = vpop.xlane.xlu1 %1019  ;;  %v1035_v7 = vmul.f32 0.6931472, %v1901_v18  ;;  %v1334_v25 = vpop.xlane.xlu0 %1333  ;;  %v1422_v39 = vsub.f32 %v1068_v20, %v1340_v4  ;;  %v3005_v4 = vld [vmem:[#allocation10_spill] sm:$0xff] }
 0x37c   : > { %v1903_v57 = vpop.eup %1902  ;;  %v1420_v53 = vsub.f32 %v1066_v13, %v1334_v25  ;;  %v2883_v25 = vsel %vm1382_vm13, 1.0, %v2994_v26  ;;  %v2892_v13 = vsel %vm1383_vm14, 1.0, %v2994_v26 }
 0x37d   : > { %v1064_v15 = vadd.f32 %v1035_v7, %v3001_v38  ;;  %v1905_v5 = vpop.eup %1904  ;;  %v1047_v40 = vmul.f32 0.6931472, %v1903_v57 }
 0x37e   : > { %v1907_v54 = vpop.eup %1906  ;;  %v1049_v22 = vmul.f32 0.6931472, %v1905_v5  ;;  %v1436_v45 = vmul.f32 %v2791_v35, %v1420_v53  ;;  %v2872_v35 = vsel %vm1381_vm12, 1.0, %v2994_v26  ;;  %v1518_v5 = vsel %vm608_vm4, %v2892_v13, 0.0 }
 0x37f   : > { %v1418_v21 = vsub.f32 %v1064_v15, %v2784_v43  ;;  %v1507_v43 = vadd.f32 %v1506_v28, %v1505_v30  ;;  %v1045_v63 = vmul.f32 0.6931472, %v1907_v54  ;;  %v1437_v30 = vmul.f32 %v2788_v56, %v1421_v17  ;;  %v1909_v0 = vpop.eup %1908 }
 0x380   : > { %v1438_v56 = vmul.f32 %v2805_v27, %v1422_v39  ;;  %v1514_v18 = vsel %vm608_vm4, %v2872_v35, 0.0  ;;  %v1070_v7 = vadd.f32 %v1047_v40, %v3005_v4  ;;  %v1071_v41 = vadd.f32 %v1049_v22, %v3006_v36  ;;  %v3011_v4 = vld [vmem:[#allocation19_spill] sm:$0xff] }
 0x381   : > { %v1434_v46 = vmul.f32 %v3004_v32, %v1418_v21  ;;  %v1509_v31 = vadd.f32 %v1508_v52, %v1507_v43  ;;  %v1457_v59 = vsel %vm608_vm4, %v1437_v30, 0.0  ;;  %v1069_v10 = vadd.f32 %v1045_v63, %v3007_v49  ;;  %v3009_v30 = vld [vmem:[#allocation8_spill] sm:$0xff] }
 0x382   : > { %v1023_v50 = vpop.xlane.xlu2 %1022  ;;  %v1516_v27 = vsel %vm608_vm4, %v2883_v25, 0.0  ;;  %v1459_v19 = vsel %vm608_vm4, %v1438_v56, 0.0 }
 0x383   : > { %v1451_v8 = vsel %vm608_vm4, %v1434_v46, 0.0  ;;  %v1017_v47 = vpop.xlane.xlu0 %1016  ;;  %v1346_v12 = vpop.xlane.xlu1 %1345  ;;  %v1511_v23 = vadd.f32 %v1510_v44, %v1509_v31 }
 0x384   : > { %v1452_v24 = vadd.f32 %v1451_v8, %v2808_v55  ;;  %v1455_v55 = vsel %vm608_vm4, %v1436_v45, 0.0  ;;  %v1424_v15 = vsub.f32 %v1070_v7, %v1346_v12  ;;  %1910 = vlog2.f32 %v1017_v47  ;;  %v3008_v45 = vld [vmem:[#allocation20_spill] sm:$0xff] }
 0x385   : > { %v1513_v9 = vadd.f32 %v1512_v3, %v1511_v23  ;;  %1912 = vlog2.f32 %v2826_v6 }
 0x386   : > { %v1454_v58 = vadd.f32 %v1453_v48, %v1452_v24  ;;  %v1440_v14 = vmul.f32 %v2813_v1, %v1424_v15  ;;  %1914 = vlog2.f32 %v1023_v50  ;;  %v3010_v50 = vld [vmem:[#allocation15_spill] sm:$0xff]  ;;  %v3012_v15 = vld [vmem:[#allocation21_spill] sm:$0xff] }
 0x387   : > { %v1515_v57 = vadd.f32 %v1514_v18, %v1513_v9 }
 0x388   : > { %v1456_v37 = vadd.f32 %v1455_v55, %v1454_v58  ;;  %v1463_v43 = vsel %vm608_vm4, %v1440_v14, 0.0 }
 0x389   : > { %v1517_v53 = vadd.f32 %v1516_v27, %v1515_v57  ;;  %v3013_v57 = vld [vmem:[#allocation12_spill] sm:$0xff] }
 0x38a   : > { %v1458_v38 = vadd.f32 %v1457_v59, %v1456_v37  ;;  %v1349_v61 = vpop.xlane.xlu2 %1348  ;;  %v1911_v32 = vpop.eup %1910 }
 0x38b   : > { %v1343_v28 = vpop.xlane.xlu0 %1342  ;;  %v1425_v11 = vsub.f32 %v1071_v41, %v1349_v61  ;;  %v1029_v17 = vpop.xlane.xlu1 %1028  ;;  %v1519_v20 = vadd.f32 %v1518_v5, %v1517_v53  ;;  %v1053_v6 = vmul.f32 0.6931472, %v1911_v32 }
 0x38c   : > { %v1423_v29 = vsub.f32 %v1069_v10, %v1343_v28  ;;  %v1460_v21 = vadd.f32 %v1459_v19, %v1458_v38  ;;  %v1913_v40 = vpop.eup %1912 }
 0x38d   : > { %v1441_v54 = vmul.f32 %v2834_v42, %v1425_v11  ;;  %1520 = vadd.xlane.f32.xlu2 %v1519_v20  ;;  %v1055_v8 = vmul.f32 0.6931472, %v1913_v40  ;;  %v1073_v47 = vadd.f32 %v1053_v6, %v3008_v45  ;;  %v1915_v12 = vpop.eup %1914 }
 0x38e   : > { %v1439_v26 = vmul.f32 %v2816_v34, %v1423_v29  ;;  %v1051_v34 = vmul.f32 0.6931472, %v1909_v0  ;;  %v1057_v55 = vmul.f32 0.6931472, %v1915_v12 }
 0x38f   : > { %v1465_v52 = vsel %vm608_vm4, %v1441_v54, 0.0  ;;  %v1074_v24 = vadd.f32 %v1055_v8, %v3009_v30  ;;  %v3015_v30 = vlaneseq }
 0x390   : > { %v1461_v60 = vsel %vm608_vm4, %v1439_v26, 0.0  ;;  %v1072_v48 = vadd.f32 %v1051_v34, %v3010_v50  ;;  %v1075_v19 = vadd.f32 %v1057_v55, %v3013_v57 }
 0x391   : > { %v1462_v46 = vadd.f32 %v1461_v60, %v1460_v21  ;;  %vm1548_vm3 = vcmp.lt.s32.totalorder %v3015_v30, 136 }
 0x392   : > { %v1355_v42 = vpop.xlane.xlu2 %1354 }
 0x393   : > { %v1464_v22 = vadd.f32 %v1463_v43, %v1462_v46  ;;  %v1026_v44 = vpop.xlane.xlu0 %1025  ;;  %v1358_v39 = vpop.xlane.xlu1 %1357  ;;  %v1427_v63 = vsub.f32 %v1073_v47, %v1355_v42  ;;  %v3014_v42 = vstv %s2620_s21 }
 0x394   : > { %1916 = vlog2.f32 %v1026_v44  ;;  %v1428_v58 = vsub.f32 %v1074_v24, %v1358_v39 }
 0x395   : > { %1918 = vlog2.f32 %v1029_v17  ;;  %v1466_v1 = vadd.f32 %v1465_v52, %v1464_v22  ;;  %v1443_v37 = vmul.f32 %v2847_v16, %v1427_v63 }
 0x396   : > { %v1444_v59 = vmul.f32 %v2865_v33, %v1428_v58 }
 0x397   : > { %v1469_v27 = vsel %vm608_vm4, %v1443_v37, 0.0 }
 0x398   : > { %v1471_v5 = vsel %vm608_vm4, %v1444_v59, 0.0 }
 0x39a   : > { %v1917_v31 = vpop.eup %1916  ;;  %v1364_v41 = vpop.xlane.xlu2 %1363 }
 0x39b   : > { %v1919_v3 = vpop.eup %1918  ;;  %v1059_v23 = vmul.f32 0.6931472, %v1917_v31  ;;  %v1352_v51 = vpop.xlane.xlu0 %1351 }
 0x39c   : > { %v1426_v56 = vsub.f32 %v1072_v48, %v1352_v51  ;;  %v1061_v18 = vmul.f32 0.6931472, %v1919_v3  ;;  %v1367_v10 = vpop.xlane.xlu1 %1366 }
 0x39d   : > { %v1076_v7 = vadd.f32 %v1059_v23, %v3011_v4 }
 0x39e   : > { %v1442_v9 = vmul.f32 %v2853_v62, %v1426_v56  ;;  %v1077_v61 = vadd.f32 %v1061_v18, %v3012_v15 }
 0x39f   : > { %v1430_v38 = vsub.f32 %v1076_v7, %v1364_v41 }
 0x3a0   : > { %v1467_v36 = vsel %vm608_vm4, %v1442_v9, 0.0  ;;  %v1431_v11 = vsub.f32 %v1077_v61, %v1367_v10 }
 0x3a1   : > { %v1468_v49 = vadd.f32 %v1467_v36, %v1466_v1  ;;  %v1446_v33 = vmul.f32 %v2883_v25, %v1430_v38 }
 0x3a2   : > { %v1447_v53 = vmul.f32 %v2892_v13, %v1431_v11 }
 0x3a3   : > { %v1470_v28 = vadd.f32 %v1469_v27, %v1468_v49  ;;  %v1361_v16 = vpop.xlane.xlu0 %1360  ;;  %v1475_v14 = vsel %vm608_vm4, %v1446_v33, 0.0 }
 0x3a4   : > { %v1429_v62 = vsub.f32 %v1075_v19, %v1361_v16  ;;  %v1477_v20 = vsel %vm608_vm4, %v1447_v53, 0.0 }
 0x3a5   : > { %v1472_v29 = vadd.f32 %v1471_v5, %v1470_v28 }
 0x3a6   : > { %v1445_v21 = vmul.f32 %v2872_v35, %v1429_v62 }
 0x3a8   : > { %v1473_v0 = vsel %vm608_vm4, %v1445_v21, 0.0 }
 0x3a9   : > { %v1474_v17 = vadd.f32 %v1473_v0, %v1472_v29 }
 0x3ab   : > { %v1476_v26 = vadd.f32 %v1475_v14, %v1474_v17 }
 0x3ad   : > { %v1478_v54 = vadd.f32 %v1477_v20, %v1476_v26 }
 0x3af   : > { %1479 = vadd.xlane.f32.xlu0 %v1478_v54 }
 0x3b2   : > { %v1532_v47 = vpop.permute.xlu1 %1531 }
 0x3b3   : > { %v1534_v24 = vsel %vm354_vm0, %v2651_v2, %v1532_v47 }
 0x400   : > { %v1521_v60 = vpop.xlane.xlu2 %1520 }
 0x401   : > { %v1522_v32 = vrot.slane %v1521_v60, 4 }
 0x403   : > { %v1523_v46 = vadd.f32 %v1522_v32, %v1521_v60 }
 0x405   : > { %v1524_v25 = vrot.slane %v1523_v46, 2 }
 0x407   : > { %v1525_v13 = vadd.f32 %v1524_v25, %v1523_v46 }
 0x409   : > { %v1526_v6 = vrot.slane %v1525_v13, 1 }
 0x40b   : > { %v1527_v34 = vadd.f32 %v1526_v6, %v1525_v13 }
 0x422   : > { %v1480_v43 = vpop.xlane.xlu0 %1479 }
 0x423   : > { %v1481_v35 = vrot.slane %v1480_v43, 4 }
 0x425   : > { %v1482_v40 = vadd.f32 %v1481_v35, %v1480_v43 }
 0x427   : > { %v1483_v22 = vrot.slane %v1482_v40, 2 }
 0x429   : > { %v1484_v44 = vadd.f32 %v1483_v22, %v1482_v40 }
 0x42b   : > { %v1485_v52 = vrot.slane %v1484_v44, 1 }
 0x42d   : > { %v1486_v1 = vadd.f32 %v1485_v52, %v1484_v44 }
 0x42f   : > { %1795 = vpush %v1486_v1 }
 0x430   : > { %1797 = vpush %v1527_v34 }
 0x460   : > { %s1796_s22 = spop %1795 }
 0x461   : > { %v1488_v8 = vstv %s1796_s22  ;;  %s1798_s23 = spop %1797 }
 0x462   : > { %v1535_v39 = vsel %vm608_vm4, %v3014_v42, %v1488_v8  ;;  %v1529_v45 = vstv %s1798_s23 }
 0x463   : > { %v1537_v12 = vsel %vm1536_vm15, %v1535_v39, %v1529_v45 }
 0x464   : > { %v1539_v31 = vsel %vm1538_vm1, %v1537_v12, 0.0 }
 0x465   : > { %v1542_v63 = vrot.slane %v1539_v31, 7 }
 0x467   : > { %v1544_v50 = vsel %vm1543_vm2, %v1534_v24, %v1542_v63 }
 0x468   : > { %1550 = vst.msk [vmem:[%s260_s27] sm:$0x3] %vm1548_vm3, %v1544_v50 }
 0x469 PF: > { %s16_s18 = sadd.s32 1, %s1939_s18  }
 0x46a   : > { %p13_p5 = scmp.ge.s32.totalorder %s16_s18, 5  }
 0x46c   :  { %15 = sbr.rel (!%p13_p5) target bundleno = 1 (0x1), region = 81 }

// kernel: point_group_forward.3
= control target key start
LH: loop header
LB: loop body
LE: loop exit
PB: predicated region body
PF: predicated region fallthrough
CT: control target
= control target key end

     0   :  { %s2702_s27 = smov 0   ;;  %s4838_s0 = inlined_call_operand.vmem [shape: bf16[384,64], index: 0, kind: input, shape index: {}]   ;;  %s4839_s1 = inlined_call_operand.vmem [shape: f32[384,4], index: 1, kind: input, shape index: {}]   ;;  %s4840_s2 = inlined_call_operand.vmem [shape: bf16[64,64], index: 2, kind: input, shape index: {}]   ;;  %s4841_s3 = inlined_call_operand.vmem [shape: f32[1,64], index: 3, kind: input, shape index: {}]   ;;  %s4842_s4 = inlined_call_operand.vmem [shape: f32[1,64], index: 4, kind: input, shape index: {}]   ;;  %s4843_s5 = inlined_call_operand.vmem [shape: bf16[64,4], index: 5, kind: input, shape index: {}]   ;;  %s4844_s6 = inlined_call_operand.vmem [shape: f32[1,4], index: 6, kind: input, shape index: {}]   ;;  %s4845_s7 = inlined_call_operand.vmem [shape: bf16[384,4], index: 7, kind: output, shape index: {0}]   ;;  %s4846_s8 = inlined_call_operand.vmem [shape: f32[3,1,8], index: 8, kind: output, shape index: {1}]  }
   0x1 LB: > { %s2708_s28 = sadd.s32 4294967295, %s2654_s27   ;;  %p2361_p0 = scmp.ge.s32.totalorder %s2654_s27, 1  ;;  %s2654_s27 = sphi %s2702_s27, %s19_s27  }
   0x2   : > { %p277_p1 = scmp.lt.s32.totalorder %s2654_s27, 4 }
   0x4   : > { %p278_p2 = pnand %p2361_p0, %p277_p1 }
   0x6   : > { %281 = sbr.rel (%p278_p2) target bundleno = 1046 (0x416), region = 48 }
   0xb   : > { %v2461_v0 = vld [vmem:[%s4840_s2 + $0x18] sm:$0xff]  ;;  %s2362_s9 = sshll.u32 %s2708_s28, 4  ;;  %v2460_v1 = vld [vmem:[%s4840_s2 + $0x10] sm:$0xff]  ;;  %v2459_v2 = vld [vmem:[%s4840_s2 + $0x8] sm:$0xff]  ;;  %vm429_vm0 = vcmask 523264   ;;  %vm4869_vm1 = vcmask 23552  }
   0xc   : > { %p320_p3 = scmp.lt.s32.totalorder %s2362_s9, 47  ;;  %458 = vmatpush.bf16.msra.mxu0 %v2461_v0  ;;  %2466 = vmatpush.bf16.msra.mxu2 %v2461_v0  ;;  %v2458_v3 = vld [vmem:[%s4840_s2] sm:$0xff]  ;;  %v2465_v19 = vld [vmem:[%s4843_s5 + $0x18] sm:$0xff]  ;;  %v2464_v22 = vld [vmem:[%s4843_s5 + $0x10] sm:$0xff]  ;;  %s2656_s18 = smov 125   ;;  %vm692_vm2 = vcmask 27648  }
   0xd   : > { %631 = vmatpush.bf16.msra.mxu1 %v2465_v19  ;;  %2470 = vmatpush.bf16.msra.mxu3 %v2465_v19  ;;  %v2463_v24 = vld [vmem:[%s4843_s5 + $0x8] sm:$0xff]  ;;  %v2462_v27 = vld [vmem:[%s4843_s5] sm:$0xff]  ;;  %vm4866_vm3 = vcmask 7168   ;;  %p337_p4 = scmp.lt.s32.totalorder %s2708_s28, 2 }
   0xe   : > { %s5086_s9 = smov (!%p320_p3, %s2362_s9), 47  ;;  %v2827_v49 = vld [vmem:[%s4841_s3] ss:$0 sm:$0xff] }
   0xf   : > { %s2363_s14 = sshll.u32 %s5086_s9, 2  ;;  %s2365_s20 = sshll.u32 %s5086_s9, 3  ;;  %v2840_v55 = vld [vmem:[%s4842_s4] ss:$0 sm:$0xff] }
  0x10   : > { %459 = vmatpush.bf16.msra.mxu0 %v2460_v1  ;;  %2467 = vmatpush.bf16.msra.mxu2 %v2460_v1  ;;  %s323_s19 = scalar_lea.vmem %s4838_s0, %s2363_s14  ;;  %s2739_s23 = scalar_lea.vmem %s4839_s1, %s2365_s20 }
  0x11   : > { %v2450_v4 = vld [vmem:[%s323_s19] sm:$0xff]  ;;  %v2451_v6 = vld [vmem:[%s323_s19 + $0x8] sm:$0xff]  ;;  %v2749_v10 = vld [vmem:[%s2739_s23 + $0x10] sm:$0xff]  ;;  %632 = vmatpush.bf16.msra.mxu1 %v2464_v22  ;;  %2471 = vmatpush.bf16.msra.mxu3 %v2464_v22  ;;  %s2972_s24 = scalar_lea.vmem %s4845_s7, %s2363_s14  ;;  %s5088_s28 = smov (!%p337_p4, %s2708_s28), 2 }
  0x12   : > { %v2454_v5 = vld [vmem:[%s323_s19 + $0x20] sm:$0xff]  ;;  %v2455_v7 = vld [vmem:[%s323_s19 + $0x28] sm:$0xff]  ;;  %v1442_v12 = vmul.f32 %v2749_v10, %v2749_v10  ;;  %v2452_v14 = vld [vmem:[%s323_s19 + $0x10] sm:$0xff]  ;;  %s339_s29 = scalar_lea.vmem %s4846_s8, %s5088_s28 }
  0x13   : > { %v2744_v8 = vld [vmem:[%s2739_s23] sm:$0xff]  ;;  %v2456_v15 = vld [vmem:[%s323_s19 + $0x30] sm:$0xff]  ;;  %v2457_v16 = vld [vmem:[%s323_s19 + $0x38] sm:$0xff] }
  0x14   : > { %460 = vmatpush.bf16.msra.mxu0 %v2459_v2  ;;  %2468 = vmatpush.bf16.msra.mxu2 %v2459_v2  ;;  %v1440_v9 = vmul.f32 %v2744_v8, %v2744_v8  ;;  %v1462_v13 = vsel %vm4869_vm1, %v1442_v12, 0.0  ;;  %v2453_v17 = vld [vmem:[%s323_s19 + $0x18] sm:$0xff]  ;;  %v2760_v18 = vld [vmem:[%s2739_s23 + $0x28] sm:$0xff]  ;;  %v2772_v23 = vld [vmem:[%s2739_s23 + $0x40] sm:$0xff] }
  0x15   : > { %v1445_v20 = vmul.f32 %v2760_v18, %v2760_v18  ;;  %v1448_v25 = vmul.f32 %v2772_v23, %v2772_v23  ;;  %633 = vmatpush.bf16.msra.mxu1 %v2463_v24  ;;  %2472 = vmatpush.bf16.msra.mxu3 %v2463_v24  ;;  %v2784_v28 = vld [vmem:[%s2739_s23 + $0x8] sm:$0xff]  ;;  %v2787_v29 = vld [vmem:[%s2739_s23 + $0x58] sm:$0xff]  ;;  %v2802_v37 = vld [vmem:[%s2739_s23 + $0x20] sm:$0xff] }
  0x16   : > { %v1456_v11 = vsel %vm4869_vm1, %v1440_v9, 0.0  ;;  %v1441_v30 = vmul.f32 %v2784_v28, %v2784_v28  ;;  %v1451_v31 = vmul.f32 %v2787_v29, %v2787_v29  ;;  %v2794_v32 = vld [vmem:[%s2739_s23 + $0x18] sm:$0xff]  ;;  %v2805_v38 = vld [vmem:[%s2739_s23 + $0x70] sm:$0xff]  ;;  %v1444_v39 = vmul.f32 %v2802_v37, %v2802_v37  ;;  %v2830_v50 = vld [vmem:[%s2739_s23 + $0x48] sm:$0xff] }
  0x17   : > { %1457 = vadd.xlane.f32.xlu1 %v1456_v11  ;;  %v1471_v21 = vsel %vm4869_vm1, %v1445_v20, 0.0  ;;  %v1480_v26 = vsel %vm4869_vm1, %v1448_v25, 0.0  ;;  %v1443_v35 = vmul.f32 %v2794_v32, %v2794_v32  ;;  %v1454_v40 = vmul.f32 %v2805_v38, %v2805_v38  ;;  %v2812_v41 = vld [vmem:[%s2739_s23 + $0x30] sm:$0xff]  ;;  %v2820_v46 = vld [vmem:[%s2739_s23 + $0x38] sm:$0xff]  ;;  %v2850_v62 = vld [vmem:[%s2739_s23 + $0x60] sm:$0xff] }
  0x18   : > { %461 = vmatpush.bf16.msra.mxu0 %v2458_v3  ;;  %2469 = vmatpush.bf16.msra.mxu2 %v2458_v3  ;;  %v1459_v33 = vsel %vm4869_vm1, %v1441_v30, 0.0  ;;  %v1489_v34 = vsel %vm4869_vm1, %v1451_v31, 0.0  ;;  %v1468_v42 = vsel %vm4869_vm1, %v1444_v39, 0.0  ;;  %v1446_v44 = vmul.f32 %v2812_v41, %v2812_v41  ;;  %v2843_v57 = vld [vmem:[%s2739_s23 + $0x50] sm:$0xff]  ;;  %v2861_v12 = vld [vmem:[%s2739_s23 + $0x68] sm:$0xff] }
  0x19   : > { %634 = vmatpush.bf16.msra.mxu1 %v2462_v27  ;;  %2473 = vmatpush.bf16.msra.mxu3 %v2462_v27  ;;  %v1465_v36 = vsel %vm4869_vm1, %v1443_v35, 0.0  ;;  %v1498_v43 = vsel %vm4869_vm1, %v1454_v40, 0.0  ;;  %v1447_v48 = vmul.f32 %v2820_v46, %v2820_v46  ;;  %v1449_v52 = vmul.f32 %v2830_v50, %v2830_v50 }
  0x1a   : > { %1460 = vadd.xlane.f32.xlu0 %v1459_v33  ;;  %1466 = vadd.xlane.f32.xlu2 %v1465_v36  ;;  %v1474_v45 = vsel %vm4869_vm1, %v1446_v44, 0.0  ;;  %v1450_v59 = vmul.f32 %v2843_v57, %v2843_v57  ;;  %v1452_v0 = vmul.f32 %v2850_v62, %v2850_v62 }
  0x1b   : > { %2416 = vmatmul.msk.bf16.vlgmr.msra.gmra.mxu0 %vm429_vm0, %v2450_v4  ;;  %2420 = vmatmul.msk.bf16.vlgmr.msra.gmra.mxu2 %vm429_vm0, %v2454_v5  ;;  %v1477_v51 = vsel %vm4869_vm1, %v1447_v48, 0.0  ;;  %v1483_v53 = vsel %vm4869_vm1, %v1449_v52, 0.0 }
  0x1c   : > { %v1486_v63 = vsel %vm4869_vm1, %v1450_v59, 0.0  ;;  %v1492_v3 = vsel %vm4869_vm1, %v1452_v0, 0.0 }
  0x1f   : > { %1463 = vadd.xlane.f32.xlu1 %v1462_v13 }
  0x22   : > { %1469 = vadd.xlane.f32.xlu0 %v1468_v42  ;;  %1475 = vadd.xlane.f32.xlu2 %v1474_v45 }
  0x27   : > { %1472 = vadd.xlane.f32.xlu1 %v1471_v21 }
  0x2a   : > { %1478 = vadd.xlane.f32.xlu0 %v1477_v51  ;;  %1484 = vadd.xlane.f32.xlu2 %v1483_v53 }
  0x2b   : > { %2417 = vmatmul.msk.bf16.gmra.mxu0 %vm429_vm0, %v2451_v6  ;;  %2421 = vmatmul.msk.bf16.gmra.mxu2 %vm429_vm0, %v2455_v7 }
  0x2f   : > { %1481 = vadd.xlane.f32.xlu1 %v1480_v26 }
  0x32   : > { %1487 = vadd.xlane.f32.xlu0 %v1486_v63  ;;  %1493 = vadd.xlane.f32.xlu2 %v1492_v3 }
  0x37   : > { %1490 = vadd.xlane.f32.xlu1 %v1489_v34 }
  0x3b   : > { %2418 = vmatmul.msk.bf16.gmra.mxu0 %vm429_vm0, %v2452_v14  ;;  %2422 = vmatmul.msk.bf16.gmra.mxu2 %vm429_vm0, %v2456_v15  ;;  %v1453_v14 = vmul.f32 %v2861_v12, %v2861_v12 }
  0x3f   : > { %1499 = vadd.xlane.f32.xlu1 %v1498_v43 }
  0x4b   : > { %2423 = vmatmul.msk.bf16.gmra.mxu2 %vm429_vm0, %v2457_v16  ;;  %2419 = vmatmul.msk.bf16.gmra.mxu0 %vm429_vm0, %v2453_v17  ;;  %v2868_v16 = vld [vmem:[%s2739_s23 + $0x78] sm:$0xff]  ;;  %v1495_v17 = vsel %vm4869_vm1, %v1453_v14, 0.0 }
  0x4c   : > { %v1455_v19 = vmul.f32 %v2868_v16, %v2868_v16  ;;  %1496 = vadd.xlane.f32.xlu0 %v1495_v17 }
  0x4e   : > { %v1501_v22 = vsel %vm4869_vm1, %v1455_v19, 0.0 }
  0x4f   : > { %1502 = vadd.xlane.f32.xlu2 %v1501_v22 }
  0x58   : > { %2169 = vrot.lane.b32.xlu1 %v2744_v8, %s2656_s18 }
  0x60   : > { %2177 = vrot.lane.b32.xlu1 %v2802_v37, %s2656_s18  ;;  %2171 = vrot.lane.b32.xlu0 %v2784_v28, %s2656_s18 }
  0x67   : > { %2175 = vrot.lane.b32.xlu2 %v2794_v32, %s2656_s18 }
  0x68   : > { %2183 = vrot.lane.b32.xlu1 %v2820_v46, %s2656_s18  ;;  %2173 = vrot.lane.b32.xlu0 %v2749_v10, %s2656_s18 }
  0x6f   : > { %2181 = vrot.lane.b32.xlu2 %v2812_v41, %s2656_s18 }
  0x70   : > { %2189 = vrot.lane.b32.xlu1 %v2843_v57, %s2656_s18  ;;  %2179 = vrot.lane.b32.xlu0 %v2760_v18, %s2656_s18 }
  0x77   : > { %2187 = vrot.lane.b32.xlu2 %v2830_v50, %s2656_s18 }
  0x78   : > { %2191 = vrot.lane.b32.xlu1 %v2787_v29, %s2656_s18  ;;  %2185 = vrot.lane.b32.xlu0 %v2772_v23, %s2656_s18 }
  0x80   : > { %2193 = vrot.lane.b32.xlu1 %v2850_v62, %s2656_s18 }
  0x98   : > { %v463_v47 = vpop.f32.mrf.mxu0 }
  0x99   : > { %v507_v54 = vmul.f32 %v2827_v49, %v463_v47 }
  0x9b   : > { %v527_v60 = vadd.f32 %v2840_v55, %v507_v54 }
  0x9d   : > { %v543_v4 = vmax.f32 %v527_v60, 0.0 }
  0x9e   : > { %v483_v56 = vpop.f32.mrf.mxu2 }
  0x9f   : > { %v515_v1 = vmul.f32 %v2827_v49, %v483_v56 }
  0xa0   : > { %v465_v58 = vpop.f32.mrf.mxu0 }
  0xa1   : > { %v508_v61 = vmul.f32 %v2827_v49, %v465_v58  ;;  %v535_v7 = vadd.f32 %v2840_v55, %v515_v1 }
  0xa3   : > { %v528_v2 = vadd.f32 %v2840_v55, %v508_v61  ;;  %v551_v20 = vmax.f32 %v535_v7, 0.0 }
  0xa5   : > { %v544_v5 = vmax.f32 %v528_v2, 0.0 }
  0xa6   : > { %v485_v6 = vpop.f32.mrf.mxu2 }
  0xa7   : > { %v516_v9 = vmul.f32 %v2827_v49, %v485_v6  ;;  %v559_v11 = vpack.c.bf16 %v544_v5, %v543_v4 }
  0xa8   : > { %v468_v13 = vpop.f32.mrf.mxu0 }
  0xa9   : > { %v536_v15 = vadd.f32 %v2840_v55, %v516_v9  ;;  %2440 = vmatmul.msk.bf16.vlgmr.msra.gmra.mxu1 %vm429_vm0, %v559_v11  ;;  %v509_v24 = vmul.f32 %v2827_v49, %v468_v13 }
  0xab   : > { %v552_v21 = vmax.f32 %v536_v15, 0.0  ;;  %v529_v30 = vadd.f32 %v2840_v55, %v509_v24 }
  0xad   : > { %v563_v25 = vpack.c.bf16 %v552_v21, %v551_v20  ;;  %v545_v35 = vmax.f32 %v529_v30, 0.0 }
  0xae   : > { %v488_v26 = vpop.f32.mrf.mxu2 }
  0xaf   : > { %2444 = vmatmul.msk.bf16.vlgmr.msra.gmra.mxu3 %vm429_vm0, %v563_v25  ;;  %v517_v33 = vmul.f32 %v2827_v49, %v488_v26 }
  0xb0   : > { %v470_v27 = vpop.f32.mrf.mxu0 }
  0xb1   : > { %v510_v31 = vmul.f32 %v2827_v49, %v470_v27  ;;  %v537_v40 = vadd.f32 %v2840_v55, %v517_v33 }
  0xb3   : > { %v530_v34 = vadd.f32 %v2840_v55, %v510_v31  ;;  %v553_v47 = vmax.f32 %v537_v40, 0.0  ;;  %v2939_v40 = vpop.xlane.xlu2 %1466 }
  0xb5   : > { %v546_v36 = vmax.f32 %v530_v34, 0.0 }
  0xb6   : > { %v490_v39 = vpop.f32.mrf.mxu2 }
  0xb7   : > { %v518_v42 = vmul.f32 %v2827_v49, %v490_v39  ;;  %v560_v43 = vpack.c.bf16 %v546_v36, %v545_v35  ;;  %v2931_v35 = vpop.xlane.xlu1 %1457  ;;  %v2935_v39 = vpop.xlane.xlu0 %1460 }
  0xb8   : > { %v473_v44 = vpop.f32.mrf.mxu0  ;;  %2492 = vrsqrt.f32 %v2931_v35  ;;  %vm1511_vm4 = vcmp.eq.f32.partialorder %v2931_v35, inf  ;;  %vm1513_vm5 = vcmp.eq.f32.partialorder %v2931_v35, 0.0  ;;  %vm1523_vm12 = vcmp.eq.f32.partialorder %v2935_v39, inf }
  0xb9   : > { %v538_v45 = vadd.f32 %v2840_v55, %v518_v42  ;;  %2441 = vmatmul.msk.bf16.gmra.mxu1 %vm429_vm0, %v560_v43  ;;  %v511_v51 = vmul.f32 %v2827_v49, %v473_v44  ;;  %vm1525_vm13 = vcmp.eq.f32.partialorder %v2935_v39, 0.0 }
  0xbb   : > { %v554_v48 = vmax.f32 %v538_v45, 0.0  ;;  %v531_v54 = vadd.f32 %v2840_v55, %v511_v51  ;;  %v2945_v43 = vpop.xlane.xlu2 %1475 }
  0xbd   : > { %v564_v52 = vpack.c.bf16 %v554_v48, %v553_v47  ;;  %v547_v60 = vmax.f32 %v531_v54, 0.0 }
  0xbe   : > { %v493_v53 = vpop.f32.mrf.mxu2 }
  0xbf   : > { %2445 = vmatmul.msk.bf16.gmra.mxu3 %vm429_vm0, %v564_v52  ;;  %v519_v59 = vmul.f32 %v2827_v49, %v493_v53  ;;  %v2933_v36 = vpop.xlane.xlu1 %1463  ;;  %v2941_v42 = vpop.xlane.xlu0 %1469  ;;  %v2960_v52 = vld [vmem:[%s4844_s6] ss:$0 sm:$0xff] }
  0xc0   : > { %v475_v56 = vpop.f32.mrf.mxu0  ;;  %2494 = vrsqrt.f32 %v2933_v36  ;;  %vm1535_vm6 = vcmp.eq.f32.partialorder %v2933_v36, inf  ;;  %vm1537_vm7 = vcmp.eq.f32.partialorder %v2933_v36, 0.0 }
  0xc1   : > { %v512_v58 = vmul.f32 %v2827_v49, %v475_v56  ;;  %v539_v0 = vadd.f32 %v2840_v55, %v519_v59 }
  0xc3   : > { %v532_v61 = vadd.f32 %v2840_v55, %v512_v58  ;;  %v555_v5 = vmax.f32 %v539_v0, 0.0  ;;  %v2951_v47 = vpop.xlane.xlu2 %1484 }
  0xc5   : > { %v548_v63 = vmax.f32 %v532_v61, 0.0 }
  0xc6   : > { %v495_v1 = vpop.f32.mrf.mxu2 }
  0xc7   : > { %v561_v2 = vpack.c.bf16 %v548_v63, %v547_v60  ;;  %v520_v3 = vmul.f32 %v2827_v49, %v495_v1  ;;  %v2947_v44 = vpop.xlane.xlu0 %1478 }
  0xc8   : > { %v478_v4 = vpop.f32.mrf.mxu0 }
  0xc9   : > { %2442 = vmatmul.msk.bf16.gmra.mxu1 %vm429_vm0, %v561_v2  ;;  %v540_v6 = vadd.f32 %v2840_v55, %v520_v3  ;;  %v513_v9 = vmul.f32 %v2827_v49, %v478_v4 }
  0xcb   : > { %v556_v7 = vmax.f32 %v540_v6, 0.0  ;;  %v533_v14 = vadd.f32 %v2840_v55, %v513_v9  ;;  %v2962_v53 = vpop.xlane.xlu2 %1493 }
  0xcd   : > { %v565_v11 = vpack.c.bf16 %v556_v7, %v555_v5  ;;  %v549_v20 = vmax.f32 %v533_v14, 0.0 }
  0xce   : > { %v498_v13 = vpop.f32.mrf.mxu2 }
  0xcf   : > { %2446 = vmatmul.msk.bf16.gmra.mxu3 %vm429_vm0, %v565_v11  ;;  %v521_v17 = vmul.f32 %v2827_v49, %v498_v13  ;;  %v2953_v48 = vpop.xlane.xlu0 %1487 }
  0xd0   : > { %v480_v15 = vpop.f32.mrf.mxu0 }
  0xd1   : > { %v514_v19 = vmul.f32 %v2827_v49, %v480_v15  ;;  %v541_v22 = vadd.f32 %v2840_v55, %v521_v17 }
  0xd3   : > { %v534_v21 = vadd.f32 %v2840_v55, %v514_v19  ;;  %v557_v30 = vmax.f32 %v541_v22, 0.0  ;;  %v2988_v4 = vpop.xlane.xlu2 %1502  ;;  %v3008_v22 = vpop.eup %2492 }
  0xd4   : > { %4870 = vst [vmem:[#allocation2_spill] sm:$0xff] %v2988_v4 }
  0xd5   : > { %v550_v24 = vmax.f32 %v534_v21, 0.0 }
  0xd6   : > { %v500_v25 = vpop.f32.mrf.mxu2 }
  0xd7   : > { %v522_v26 = vmul.f32 %v2827_v49, %v500_v25  ;;  %v562_v27 = vpack.c.bf16 %v550_v24, %v549_v20  ;;  %v2937_v49 = vpop.xlane.xlu1 %1472  ;;  %v2980_v61 = vpop.xlane.xlu0 %1496 }
  0xd8   : > { %2496 = vrsqrt.f32 %v2937_v49  ;;  %vm1571_vm8 = vcmp.eq.f32.partialorder %v2937_v49, inf  ;;  %vm1573_vm9 = vcmp.eq.f32.partialorder %v2937_v49, 0.0 }
  0xd9   : > { %v542_v31 = vadd.f32 %v2840_v55, %v522_v26  ;;  %2443 = vmatmul.msk.bf16.gmra.mxu1 %vm429_vm0, %v562_v27 }
  0xdb   : > { %v558_v33 = vmax.f32 %v542_v31, 0.0  ;;  %v2176_v27 = vpop.permute.xlu2 %2175 }
  0xdd   : > { %v566_v34 = vpack.c.bf16 %v558_v33, %v557_v30  ;;  %v1505_v30 = vmul.f32 %v3008_v22, %v2931_v35 }
  0xdf   : > { %2447 = vmatmul.msk.bf16.gmra.mxu3 %vm429_vm0, %v566_v34  ;;  %v2943_v55 = vpop.xlane.xlu1 %1481  ;;  %v2172_v11 = vpop.permute.xlu0 %2171 }
  0xe0   : > { %v2218_v17 = vsel %vm4866_vm3, %v2172_v11, 0.0  ;;  %2498 = vrsqrt.f32 %v2943_v55  ;;  %vm1607_vm10 = vcmp.eq.f32.partialorder %v2943_v55, inf  ;;  %vm1609_vm11 = vcmp.eq.f32.partialorder %v2943_v55, 0.0 }
  0xe1   : > { %2500 = vrsqrt.f32 %v2935_v39 }
  0xe7   : > { %v2949_v45 = vpop.xlane.xlu1 %1490 }
  0xe8   : > { %2502 = vrsqrt.f32 %v2949_v45  ;;  %vm1643_vm15 = vcmp.eq.f32.partialorder %v2949_v45, inf  ;;  %vm1645_vm0 = vcmp.eq.f32.partialorder %v2949_v45, 0.0 }
  0xe9   : > { %2504 = vrsqrt.f32 %v2939_v40 }
  0xef   : > { %v2955_v51 = vpop.xlane.xlu1 %1499 }
  0xf7   : > { %v2170_v63 = vpop.permute.xlu1 %2169 }
  0xf8   : > { %v2217_v9 = vsel %vm4866_vm3, %v2170_v63, 0.0 }
  0xf9   : > { %v2219_v21 = vadd.f32 %v2218_v17, %v2217_v9 }
  0xff   : > { %v2178_v19 = vpop.permute.xlu1 %2177 }
 0x100   : > { %v2224_v17 = vsel %vm4866_vm3, %v2178_v19, 0.0 }
 0x126   : > { %v636_v54 = vpop.f32.mrf.mxu1 }
 0x127   : > { %v2965_v56 = vadd.f32 %v2960_v52, %v636_v54 }
 0x129   : > { %v676_v58 = vpack.c.bf16 %v2965_v56, %v2965_v56  ;;  %v928_v59 = vmul.f32 %v2965_v56, %v2965_v56  ;;  %v725_v60 = vsub.f32 %v2965_v56, %v2744_v8 }
 0x12b   : > { %693 = vst.msk [vmem:[%s2972_s24] sm:$0xf] %vm692_vm2, %v676_v58  ;;  %v944_v0 = vsel %vm4869_vm1, %v928_v59, 0.0  ;;  %v741_v2 = vand.u32 2147483647, %v725_v60  ;;  %v2174_v58 = vpop.permute.xlu0 %2173 }
 0x12c   : > { %945 = vadd.xlane.f32.xlu0 %v944_v0 }
 0x12d   : > { %v758_v7 = vsel %vm4869_vm1, %v741_v2, 0.0  ;;  %v3034_v2 = vpop.eup %2494 }
 0x12e   : > { %v638_v1 = vpop.f32.mrf.mxu1 }
 0x12f   : > { %v2986_v3 = vadd.f32 %v2960_v52, %v638_v1  ;;  %v2184_v1 = vpop.permute.xlu1 %2183 }
 0x131   : > { %v677_v8 = vpack.c.bf16 %v2986_v3, %v2986_v3  ;;  %v929_v5 = vmul.f32 %v2986_v3, %v2986_v3  ;;  %v726_v15 = vsub.f32 %v2986_v3, %v2784_v28 }
 0x132   : > { %v656_v6 = vpop.f32.mrf.mxu3 }
 0x133   : > { %694 = vst.msk [vmem:[%s2972_s24 + $0x4] sm:$0xf] %vm692_vm2, %v677_v8  ;;  %v3000_v13 = vadd.f32 %v2960_v52, %v656_v6  ;;  %v947_v14 = vsel %vm4869_vm1, %v929_v5, 0.0  ;;  %v742_v26 = vand.u32 2147483647, %v726_v15  ;;  %v2222_v6 = vsel %vm4866_vm3, %v2176_v27, 0.0 }
 0x134   : > { %948 = vadd.xlane.f32.xlu2 %v947_v14  ;;  %759 = vadd.xlane.f32.xlu0 %v758_v7 }
 0x135   : > { %v684_v20 = vpack.c.bf16 %v3000_v13, %v3000_v13  ;;  %v936_v28 = vmul.f32 %v3000_v13, %v3000_v13  ;;  %v733_v54 = vsub.f32 %v3000_v13, %v2772_v23  ;;  %v761_v63 = vsel %vm4869_vm1, %v742_v26, 0.0 }
 0x136   : > { %v641_v24 = vpop.f32.mrf.mxu1  ;;  %v1506_v23 = vmul.f32 %v3008_v22, %v1505_v30 }
 0x137   : > { %701 = vst.msk [vmem:[%s2972_s24 + $0x20] sm:$0xf] %vm692_vm2, %v684_v20  ;;  %v3014_v25 = vadd.f32 %v2960_v52, %v641_v24  ;;  %v968_v60 = vsel %vm4869_vm1, %v936_v28, 0.0  ;;  %v749_v9 = vand.u32 2147483647, %v733_v54  ;;  %v2182_v20 = vpop.permute.xlu2 %2181  ;;  %v1529_v24 = vmul.f32 %v3034_v2, %v2933_v36 }
 0x138   : > { %v1507_v26 = vmul.f32 0.5, %v1506_v23  ;;  %v2190_v23 = vpop.permute.xlu1 %2189 }
 0x139   : > { %v678_v31 = vpack.c.bf16 %v3014_v25, %v3014_v25  ;;  %v727_v33 = vsub.f32 %v3014_v25, %v2749_v10  ;;  %v2220_v10 = vsel %vm4866_vm3, %v2174_v58, 0.0 }
 0x13a   : > { %v658_v34 = vpop.f32.mrf.mxu3  ;;  %v2221_v14 = vadd.f32 %v2220_v10, %v2219_v21 }
 0x13b   : > { %695 = vst.msk [vmem:[%s2972_s24 + $0x8] sm:$0xf] %vm692_vm2, %v678_v31  ;;  %v3029_v59 = vadd.f32 %v2960_v52, %v658_v34  ;;  %v743_v0 = vand.u32 2147483647, %v727_v33  ;;  %v782_v31 = vsel %vm4869_vm1, %v749_v9, 0.0  ;;  %v2180_v34 = vpop.permute.xlu0 %2179 }
 0x13c   : > { %969 = vadd.xlane.f32.xlu2 %v968_v60  ;;  %762 = vadd.xlane.f32.xlu0 %v761_v63  ;;  %v2223_v28 = vadd.f32 %v2222_v6, %v2221_v14  ;;  %v2226_v63 = vsel %vm4866_vm3, %v2180_v34, 0.0  ;;  %v2230_v6 = vsel %vm4866_vm3, %v2184_v1, 0.0 }
 0x13d   : > { %v685_v8 = vpack.c.bf16 %v3029_v59, %v3029_v59  ;;  %v764_v5 = vsel %vm4869_vm1, %v743_v0, 0.0  ;;  %v937_v11 = vmul.f32 %v3029_v59, %v3029_v59  ;;  %v734_v19 = vsub.f32 %v3029_v59, %v2830_v50  ;;  %v3068_v50 = vpop.eup %2496 }
 0x13e   : > { %v643_v7 = vpop.f32.mrf.mxu1  ;;  %765 = vadd.xlane.f32.xlu1 %v764_v5  ;;  %v2225_v54 = vadd.f32 %v2224_v17, %v2223_v28  ;;  %v1530_v0 = vmul.f32 %v3034_v2, %v1529_v24  ;;  %v1565_v28 = vmul.f32 %v3068_v50, %v2937_v49 }
 0x13f   : > { %702 = vst.msk [vmem:[%s2972_s24 + $0x24] sm:$0xf] %vm692_vm2, %v685_v8  ;;  %v3047_v15 = vadd.f32 %v2960_v52, %v643_v7  ;;  %v971_v33 = vsel %vm4869_vm1, %v937_v11, 0.0  ;;  %v1508_v7 = vsub.f32 1.5, %v1507_v26  ;;  %v930_v11 = vmul.f32 %v3014_v25, %v3014_v25  ;;  %v2188_v1 = vpop.permute.xlu2 %2187 }
 0x140   : > { %v2227_v10 = vadd.f32 %v2226_v63, %v2225_v54  ;;  %v1531_v24 = vmul.f32 0.5, %v1530_v0  ;;  %v2236_v0 = vsel %vm4866_vm3, %v2190_v23, 0.0 }
 0x141   : > { %4871 = vst [vmem:[#allocation3_spill] sm:$0xff] %v3047_v15  ;;  %v679_v27 = vpack.c.bf16 %v3047_v15, %v3047_v15  ;;  %v728_v21 = vsub.f32 %v3047_v15, %v2794_v32  ;;  %v2228_v32 = vsel %vm4866_vm3, %v2182_v20, 0.0  ;;  %v750_v20 = vand.u32 2147483647, %v734_v19 }
 0x142   : > { %v661_v30 = vpop.f32.mrf.mxu3  ;;  %v2229_v14 = vadd.f32 %v2228_v32, %v2227_v10  ;;  %v950_v19 = vsel %vm4869_vm1, %v930_v11, 0.0  ;;  %v1532_v32 = vsub.f32 1.5, %v1531_v24  ;;  %v2192_v11 = vpop.permute.xlu1 %2191  ;;  %v931_v23 = vmul.f32 %v3047_v15, %v3047_v15 }
 0x143   : > { %696 = vst.msk [vmem:[%s2972_s24 + $0xc] sm:$0xf] %vm692_vm2, %v679_v27  ;;  %v3063_v58 = vadd.f32 %v2960_v52, %v661_v30  ;;  %v744_v60 = vand.u32 2147483647, %v728_v21  ;;  %v2186_v34 = vpop.permute.xlu0 %2185  ;;  %v2238_v24 = vsel %vm4866_vm3, %v2192_v11, 0.0 }
 0x144   : > { %783 = vadd.xlane.f32.xlu2 %v782_v31  ;;  %972 = vadd.xlane.f32.xlu0 %v971_v33  ;;  %v2231_v27 = vadd.f32 %v2230_v6, %v2229_v14  ;;  %v1509_v31 = vmul.f32 %v3008_v22, %v1508_v7  ;;  %v2232_v63 = vsel %vm4866_vm3, %v2186_v34, 0.0  ;;  %v1566_v22 = vmul.f32 %v3068_v50, %v1565_v28  ;;  %v3115_v28 = vpop.eup %2498 }
 0x145   : > { %v686_v8 = vpack.c.bf16 %v3063_v58, %v3063_v58  ;;  %v767_v5 = vsel %vm4869_vm1, %v744_v60, 0.0  ;;  %v938_v21 = vmul.f32 %v3063_v58, %v3063_v58  ;;  %v785_v60 = vsel %vm4869_vm1, %v750_v20, 0.0 }
 0x146   : > { %768 = vadd.xlane.f32.xlu1 %v767_v5  ;;  %v646_v9 = vpop.f32.mrf.mxu1  ;;  %v2233_v10 = vadd.f32 %v2232_v63, %v2231_v27  ;;  %v735_v7 = vsub.f32 %v3063_v58, %v2843_v57  ;;  %v1510_v27 = vmul.f32 %v1509_v31, %v2931_v35  ;;  %v1533_v57 = vmul.f32 %v3034_v2, %v1532_v32 }
 0x147   : > { %703 = vst.msk [vmem:[%s2972_s24 + $0x28] sm:$0xf] %vm692_vm2, %v686_v8  ;;  %v3079_v17 = vadd.f32 %v2960_v52, %v646_v9  ;;  %v974_v5 = vsel %vm4869_vm1, %v938_v21, 0.0  ;;  %v953_v2 = vsel %vm4869_vm1, %v931_v23, 0.0 }
 0x148   : > { %v1512_v63 = vsel %vm1511_vm4, %v2931_v35, %v1510_v27 }
 0x149   : > { %v680_v26 = vpack.c.bf16 %v3079_v17, %v3079_v17  ;;  %v729_v30 = vsub.f32 %v3079_v17, %v2802_v37  ;;  %v2234_v37 = vsel %vm4866_vm3, %v2188_v1, 0.0  ;;  %v1567_v1 = vmul.f32 0.5, %v1566_v22 }
 0x14a   : > { %v663_v33 = vpop.f32.mrf.mxu3  ;;  %v2235_v14 = vadd.f32 %v2234_v37, %v2233_v10  ;;  %v1534_v37 = vmul.f32 %v1533_v57, %v2933_v36  ;;  %v1601_v22 = vmul.f32 %v3115_v28, %v2943_v55  ;;  %v932_v27 = vmul.f32 %v3079_v17, %v3079_v17 }
 0x14b   : > { %697 = vst.msk [vmem:[%s2972_s24 + $0x10] sm:$0xf] %vm692_vm2, %v680_v26  ;;  %v3095_v54 = vadd.f32 %v2960_v52, %v663_v33  ;;  %v745_v6 = vand.u32 2147483647, %v729_v30  ;;  %v751_v33 = vand.u32 2147483647, %v735_v7 }
 0x14c   : > { %786 = vadd.xlane.f32.xlu0 %v785_v60  ;;  %951 = vadd.xlane.f32.xlu2 %v950_v19  ;;  %v2237_v26 = vadd.f32 %v2236_v0, %v2235_v14  ;;  %v1514_v60 = vand.u32 2147483648, %v2931_v35  ;;  %v1568_v32 = vsub.f32 1.5, %v1567_v1  ;;  %v1538_v7 = vand.u32 2147483648, %v2933_v36 }
 0x14d   : > { %v687_v8 = vpack.c.bf16 %v3095_v54, %v3095_v54  ;;  %v770_v30 = vsel %vm4869_vm1, %v745_v6, 0.0  ;;  %v788_v10 = vsel %vm4869_vm1, %v751_v33, 0.0  ;;  %v1536_v14 = vsel %vm1535_vm6, %v2933_v36, %v1534_v37 }
 0x14e   : > { %975 = vadd.xlane.f32.xlu1 %v974_v5  ;;  %v648_v9 = vpop.f32.mrf.mxu1  ;;  %v3124_v34 = vadd.f32 %v2238_v24, %v2237_v26  ;;  %v1515_v6 = vsel %vm1513_vm5, %v1514_v60, %v1512_v63  ;;  %v1569_v23 = vmul.f32 %v3068_v50, %v1568_v32  ;;  %v1602_v35 = vmul.f32 %v3115_v28, %v1601_v22 }
 0x14f   : > { %704 = vst.msk [vmem:[%s2972_s24 + $0x2c] sm:$0xf] %vm692_vm2, %v687_v8  ;;  %v3110_v20 = vadd.f32 %v2960_v52, %v648_v9  ;;  %v939_v9 = vmul.f32 %v3095_v54, %v3095_v54  ;;  %v3168_v26 = vadd.f32 1e-08, %v1515_v6  ;;  %v1539_v50 = vsel %vm1537_vm7, %v1538_v7, %v1536_v14 }
 0x150   : > { %4872 = vst [vmem:[#allocation4_spill] sm:$0xff] %v3124_v34  ;;  %v736_v60 = vsub.f32 %v3095_v54, %v2787_v29  ;;  %v956_v36 = vsel %vm4869_vm1, %v932_v27, 0.0  ;;  %v3191_v29 = vadd.f32 1e-08, %v1539_v50  ;;  %v1574_v7 = vand.u32 2147483648, %v2937_v49 }
 0x151   : > { %v681_v21 = vpack.c.bf16 %v3110_v20, %v3110_v20  ;;  %v977_v33 = vsel %vm4869_vm1, %v939_v9, 0.0  ;;  %2506 = vrcp.f32 %v3168_v26  ;;  %vm1717_vm14 = vweird.f32 %v3168_v26 }
 0x152   : > { %v666_v19 = vpop.f32.mrf.mxu3  ;;  %2508 = vrsqrt.f32 %v2955_v51  ;;  %vm1549_vm5 = vcmp.eq.f32.partialorder %v2939_v40, 0.0  ;;  %vm1559_vm6 = vcmp.eq.f32.partialorder %v2941_v42, inf  ;;  %vm1679_vm7 = vcmp.eq.f32.partialorder %v2955_v51, inf }
 0x153   : > { %698 = vst.msk [vmem:[%s2972_s24 + $0x14] sm:$0xf] %vm692_vm2, %v681_v21  ;;  %v3132_v31 = vadd.f32 %v2960_v52, %v666_v19  ;;  %2510 = vrsqrt.f32 %v2941_v42 }
 0x154   : > { %954 = vadd.xlane.f32.xlu0 %v953_v2  ;;  %771 = vadd.xlane.f32.xlu2 %v770_v30  ;;  %v3170_v30 = vpop.eup %2500  ;;  %v1603_v2 = vmul.f32 0.5, %v1602_v35  ;;  %2512 = vrsqrt.f32 %v2953_v48 }
 0x155   : > { %4873 = vst [vmem:[#allocation5_spill] sm:$0xff] %v3132_v31  ;;  %v688_v0 = vpack.c.bf16 %v3132_v31, %v3132_v31  ;;  %v940_v8 = vmul.f32 %v3132_v31, %v3132_v31  ;;  %v737_v57 = vsub.f32 %v3132_v31, %v2850_v62  ;;  %v1570_v62 = vmul.f32 %v1569_v23, %v2937_v49  ;;  %v3188_v32 = vpop.eup %2502 }
 0x156   : > { %789 = vadd.xlane.f32.xlu1 %v788_v10  ;;  %v651_v5 = vpop.f32.mrf.mxu1  ;;  %v1517_v22 = vmul.f32 %v3170_v30, %v2935_v39  ;;  %v752_v10 = vand.u32 2147483647, %v736_v60  ;;  %v1604_v9 = vsub.f32 1.5, %v1603_v2  ;;  %v1637_v14 = vmul.f32 %v3188_v32, %v2949_v45 }
 0x157   : > { %705 = vst.msk [vmem:[%s2972_s24 + $0x30] sm:$0xf] %vm692_vm2, %v688_v0  ;;  %v3153_v11 = vadd.f32 %v2960_v52, %v651_v5  ;;  %v980_v24 = vsel %vm4869_vm1, %v940_v8, 0.0  ;;  %v753_v37 = vand.u32 2147483647, %v737_v57  ;;  %v1572_v6 = vsel %vm1571_vm8, %v2937_v49, %v1570_v62  ;;  %v3216_v57 = vpop.eup %2504 }
 0x158   : > { %v3227_v60 = vpop.eup %2506  ;;  %2514 = vrcp.f32 %v3191_v29  ;;  %v1575_v62 = vsel %vm1573_vm9, %v1574_v7, %v1572_v6  ;;  %v1605_v2 = vmul.f32 %v3115_v28, %v1604_v9  ;;  %v1610_v49 = vand.u32 2147483648, %v2943_v55 }
 0x159   : > { %4874 = vst [vmem:[#allocation6_spill] sm:$0xff] %v3153_v11  ;;  %v682_v1 = vpack.c.bf16 %v3153_v11, %v3153_v11  ;;  %v794_v23 = vsel %vm4869_vm1, %v753_v37, 0.0  ;;  %v3239_v37 = vpop.eup %2508  ;;  %2516 = vrsqrt.f32 %v2945_v43  ;;  %v3256_v9 = vadd.f32 1e-08, %v1575_v62 }
 0x15a   : > { %v668_v21 = vpop.f32.mrf.mxu3  ;;  %v3246_v28 = vpop.eup %2510  ;;  %2518 = vrsqrt.f32 %v2951_v47  ;;  %vm1718_vm4 = vweird.f32 %v3227_v60  ;;  %vm1561_vm8 = vcmp.eq.f32.partialorder %v2941_v42, 0.0 }
 0x15b   : > { %v3176_v19 = vadd.f32 %v2960_v52, %v668_v21  ;;  %699 = vst.msk [vmem:[%s2972_s24 + $0x18] sm:$0xf] %vm692_vm2, %v682_v1  ;;  %v791_v1 = vsel %vm4869_vm1, %v752_v10, 0.0  ;;  %v3254_v7 = vpop.eup %2512  ;;  %v1553_v10 = vmul.f32 %v3246_v28, %v2941_v42  ;;  %2520 = vrsqrt.f32 %v2947_v44  ;;  %vm3378_vm9 = vmor %vm1717_vm14, %vm1718_vm4 }
 0x15c   : > { %981 = vadd.xlane.f32.xlu0 %v980_v24  ;;  %978 = vadd.xlane.f32.xlu2 %v977_v33  ;;  %v1518_v24 = vmul.f32 %v3170_v30, %v1517_v22  ;;  %v1541_v22 = vmul.f32 %v3216_v57, %v2939_v40  ;;  %2522 = vrsqrt.f32 %v2962_v53  ;;  %vm1631_vm14 = vcmp.eq.f32.partialorder %v2953_v48, inf }
 0x15d   : > { %4875 = vst [vmem:[#allocation7_spill] sm:$0xff] %v3176_v19  ;;  %v689_v63 = vpack.c.bf16 %v3176_v19, %v3176_v19  ;;  %v941_v8 = vmul.f32 %v3176_v19, %v3176_v19  ;;  %v738_v33 = vsub.f32 %v3176_v19, %v2861_v12  ;;  %v934_v12 = vmul.f32 %v3153_v11, %v3153_v11 }
 0x15e   : > { %957 = vadd.xlane.f32.xlu1 %v956_v36  ;;  %v653_v0 = vpop.f32.mrf.mxu1  ;;  %v1638_v36 = vmul.f32 %v3188_v32, %v1637_v14  ;;  %v1542_v62 = vmul.f32 %v3216_v57, %v1541_v22  ;;  %v1673_v14 = vmul.f32 %v3239_v37, %v2955_v51  ;;  %v1625_v22 = vmul.f32 %v3254_v7, %v2953_v48 }
 0x15f   : > { %706 = vst.msk [vmem:[%s2972_s24 + $0x34] sm:$0xf] %vm692_vm2, %v689_v63  ;;  %v3201_v5 = vadd.f32 %v2960_v52, %v653_v0  ;;  %v983_v21 = vsel %vm4869_vm1, %v941_v8, 0.0  ;;  %v1519_v0 = vmul.f32 0.5, %v1518_v24  ;;  %v933_v8 = vmul.f32 %v3110_v20, %v3110_v20 }
 0x160   : > { %v754_v6 = vand.u32 2147483647, %v738_v33  ;;  %v1606_v24 = vmul.f32 %v1605_v2, %v2943_v55  ;;  %v3266_v33 = vpop.eup %2514  ;;  %v1543_v31 = vmul.f32 0.5, %v1542_v62  ;;  %2524 = vrcp.f32 %v3256_v9 }
 0x161   : > { %4876 = vst [vmem:[#allocation8_spill] sm:$0xff] %v3201_v5  ;;  %v683_v35 = vpack.c.bf16 %v3201_v5, %v3201_v5  ;;  %v959_v2 = vsel %vm4869_vm1, %v933_v8, 0.0  ;;  %v3280_v34 = vpop.eup %2516  ;;  %2526 = vrsqrt.f32 %v2980_v61  ;;  %vm1595_vm4 = vcmp.eq.f32.partialorder %v2947_v44, inf }
 0x162   : > { %v671_v27 = vpop.f32.mrf.mxu3 }
 0x163   : > { %v3221_v50 = vadd.f32 %v2960_v52, %v671_v27  ;;  %700 = vst.msk [vmem:[%s2972_s24 + $0x1c] sm:$0xf] %vm692_vm2, %v683_v35  ;;  %v1713_v35 = vmul.f32 %v3227_v60, %v3168_v26  ;;  %v1639_v27 = vmul.f32 0.5, %v1638_v36  ;;  %v797_v36 = vsel %vm4869_vm1, %v754_v6, 0.0  ;;  %v3287_v6 = vpop.eup %2518 }
 0x164   : > { %795 = vadd.xlane.f32.xlu0 %v794_v23  ;;  %792 = vadd.xlane.f32.xlu2 %v791_v1  ;;  %v962_v1 = vsel %vm4869_vm1, %v934_v12, 0.0  ;;  %v730_v12 = vsub.f32 %v3110_v20, %v2760_v18  ;;  %v1608_v18 = vsel %vm1607_vm10, %v2943_v55, %v1606_v24  ;;  %v935_v24 = vmul.f32 %v3201_v5, %v3201_v5 }
 0x165   : > { %4877 = vst [vmem:[#allocation9_spill] sm:$0xff] %v3221_v50  ;;  %v690_v63 = vpack.c.bf16 %v3221_v50, %v3221_v50  ;;  %vm1681_vm10 = vcmp.eq.f32.partialorder %v2955_v51, 0.0 }
 0x166   : > { %984 = vadd.xlane.f32.xlu1 %v983_v21  ;;  %v731_v21 = vsub.f32 %v3153_v11, %v2812_v41  ;;  %v1640_v11 = vsub.f32 1.5, %v1639_v27  ;;  %v746_v8 = vand.u32 2147483647, %v730_v12  ;;  %v1577_v27 = vmul.f32 %v3280_v34, %v2945_v43 }
 0x167   : > { %707 = vst.msk [vmem:[%s2972_s24 + $0x38] sm:$0xf] %vm692_vm2, %v690_v63  ;;  %v1520_v63 = vsub.f32 1.5, %v1519_v0  ;;  %v1714_v0 = vsub.f32 1.0, %v1713_v35  ;;  %v1674_v35 = vmul.f32 %v3239_v37, %v1673_v14  ;;  %v1626_v14 = vmul.f32 %v3254_v7, %v1625_v22 }
 0x168   : > { %v1641_v12 = vmul.f32 %v3188_v32, %v1640_v11  ;;  %v1578_v11 = vmul.f32 %v3280_v34, %v1577_v27 }
 0x169   : > { %v1675_v19 = vmul.f32 0.5, %v1674_v35  ;;  %v1627_v32 = vmul.f32 0.5, %v1626_v14 }
 0x16a   : > { %v673_v23 = vpop.f32.mrf.mxu3 }
 0x16b   : > { %v3278_v41 = vadd.f32 %v2960_v52, %v673_v23  ;;  %v747_v52 = vand.u32 2147483647, %v731_v21  ;;  %v1579_v21 = vmul.f32 0.5, %v1578_v11 }
 0x16c   : > { %960 = vadd.xlane.f32.xlu2 %v959_v2  ;;  %963 = vadd.xlane.f32.xlu0 %v962_v1  ;;  %v1521_v1 = vmul.f32 %v3170_v30, %v1520_v63  ;;  %v1554_v2 = vmul.f32 %v3246_v28, %v1553_v10  ;;  %v1613_v30 = vmul.f32 %v3287_v6, %v2951_v47 }
 0x16d   : > { %4878 = vst [vmem:[#allocation10_spill] sm:$0xff] %v3278_v41  ;;  %v691_v23 = vpack.c.bf16 %v3278_v41, %v3278_v41  ;;  %v1611_v10 = vsel %vm1609_vm11, %v1610_v49, %v1608_v18  ;;  %v776_v62 = vsel %vm4869_vm1, %v747_v52, 0.0  ;;  %v1715_v63 = vmul.f32 %v3227_v60, %v1714_v0 }
 0x16e   : > { %798 = vadd.xlane.f32.xlu1 %v797_v36  ;;  %v3316_v36 = vpop.eup %2520  ;;  %v1522_v22 = vmul.f32 %v1521_v1, %v2935_v39  ;;  %v1555_v55 = vmul.f32 0.5, %v1554_v2  ;;  %v773_v49 = vsel %vm4869_vm1, %v746_v8, 0.0  ;;  %v965_v18 = vsel %vm4869_vm1, %v935_v24, 0.0 }
 0x16f   : > { %708 = vst.msk [vmem:[%s2972_s24 + $0x3c] sm:$0xf] %vm692_vm2, %v691_v23  ;;  %v1544_v23 = vsub.f32 1.5, %v1543_v31  ;;  %v3320_v15 = vpop.eup %2522  ;;  %v732_v52 = vsub.f32 %v3201_v5, %v2820_v46  ;;  %vm1547_vm2 = vcmp.eq.f32.partialorder %v2939_v40, inf  ;;  %v1614_v31 = vmul.f32 %v3287_v6, %v1613_v30 }
 0x170   : > { %v3331_v0 = vpop.eup %2524  ;;  %v1589_v8 = vmul.f32 %v3316_v36, %v2947_v44  ;;  %v942_v46 = vmul.f32 %v3221_v50, %v3221_v50  ;;  %v943_v1 = vmul.f32 %v3278_v41, %v3278_v41  ;;  %v3340_v35 = vadd.f32 1e-08, %v1611_v10 }
 0x171   : > { %v1642_v2 = vmul.f32 %v1641_v12, %v2949_v45  ;;  %v1649_v27 = vmul.f32 %v3320_v15, %v2962_v53  ;;  %v1545_v30 = vmul.f32 %v3216_v57, %v1544_v23  ;;  %v1524_v14 = vsel %vm1523_vm12, %v2935_v39, %v1522_v22  ;;  %v3357_v22 = vpop.eup %2526 }
 0x172   : > { %v1676_v10 = vsub.f32 1.5, %v1675_v19  ;;  %v1615_v12 = vmul.f32 0.5, %v1614_v31  ;;  %v1628_v24 = vsub.f32 1.5, %v1627_v32  ;;  %v1590_v5 = vmul.f32 %v3316_v36, %v1589_v8 }
 0x173   : > { %v989_v57 = vsel %vm4869_vm1, %v943_v1, 0.0  ;;  %v739_v23 = vsub.f32 %v3221_v50, %v2805_v38  ;;  %2528 = vrcp.f32 %v3340_v35  ;;  %v1562_v19 = vand.u32 2147483648, %v2941_v42 }
 0x174   : > { %774 = vadd.xlane.f32.xlu2 %v773_v49  ;;  %777 = vadd.xlane.f32.xlu0 %v776_v62  ;;  %v1556_v62 = vsub.f32 1.5, %v1555_v55  ;;  %v748_v49 = vand.u32 2147483647, %v732_v52  ;;  %v1650_v55 = vmul.f32 %v3320_v15, %v1649_v27  ;;  %v3364_v52 = vadd.f32 %v3227_v60, %v1715_v63 }
 0x175   : > { %v1546_v11 = vmul.f32 %v1545_v30, %v2939_v40  ;;  %v4879_v31 = vand.u32 2147483648, %v2935_v39  ;;  %v1677_v39 = vmul.f32 %v3239_v37, %v1676_v10  ;;  %v1580_v1 = vsub.f32 1.5, %v1579_v21 }
 0x176   : > { %966 = vadd.xlane.f32.xlu1 %v965_v18  ;;  %v986_v18 = vsel %vm4869_vm1, %v942_v46, 0.0  ;;  %v1557_v32 = vmul.f32 %v3246_v28, %v1556_v62  ;;  %v779_v8 = vsel %vm4869_vm1, %v748_v49, 0.0  ;;  %v1644_v46 = vsel %vm1643_vm15, %v2949_v45, %v1642_v2 }
 0x177   : > { %v1527_v38 = vsel %vm1525_vm13, %v4879_v31, %v1524_v14  ;;  %v1629_v28 = vmul.f32 %v3254_v7, %v1628_v24  ;;  %vm1583_vm11 = vcmp.eq.f32.partialorder %v2945_v43, inf  ;;  %v1616_v27 = vsub.f32 1.5, %v1615_v12 }
 0x178   : > { %v1591_v30 = vmul.f32 0.5, %v1590_v5  ;;  %v1661_v14 = vmul.f32 %v3357_v22, %v2980_v61  ;;  %v755_v62 = vand.u32 2147483647, %v739_v23  ;;  %v3391_v49 = vadd.f32 1e-08, %v1527_v38 }
 0x179   : > { %v1651_v2 = vmul.f32 0.5, %v1650_v55  ;;  %v1720_v37 = vsel %vm3378_vm9, %v3227_v60, %v3364_v52  ;;  %v1721_v7 = vand.u32 2147483647, %v3168_v26  ;;  %v4882_v21 = vand.u32 2147483648, %v2949_v45  ;;  %v3407_v12 = vpop.eup %2528  ;;  %v3528_v60 = vld [vmem:[%s2739_s23] sm:$0xff] }
 0x17a   : > { %v1548_v24 = vsel %vm1547_vm2, %v2939_v40, %v1546_v11  ;;  %v1558_v10 = vmul.f32 %v1557_v32, %v2941_v42  ;;  %vm1619_vm12 = vcmp.eq.f32.partialorder %v2951_v47, inf  ;;  %vm1585_vm13 = vcmp.eq.f32.partialorder %v2945_v43, 0.0 }
 0x17b   : > { %v1647_v5 = vsel %vm1645_vm0, %v4882_v21, %v1644_v46  ;;  %v1630_v23 = vmul.f32 %v1629_v28, %v2953_v48  ;;  %v1617_v45 = vmul.f32 %v3287_v6, %v1616_v27  ;;  %vm1621_vm15 = vcmp.eq.f32.partialorder %v2951_v47, 0.0 }
 0x17c   : > { %987 = vadd.xlane.f32.xlu2 %v986_v18  ;;  %990 = vadd.xlane.f32.xlu0 %v989_v57  ;;  %v1678_v18 = vmul.f32 %v1677_v39, %v2955_v51  ;;  %v1581_v57 = vmul.f32 %v3280_v34, %v1580_v1  ;;  %v1592_v55 = vsub.f32 1.5, %v1591_v30  ;;  %v1662_v11 = vmul.f32 %v3357_v22, %v1661_v14 }
 0x17d   : > { %v800_v31 = vsel %vm4869_vm1, %v755_v62, 0.0  ;;  %v3418_v38 = vadd.f32 1e-08, %v1647_v5  ;;  %2530 = vrcp.f32 %v3391_v49  ;;  %v1652_v34 = vsub.f32 1.5, %v1651_v2 }
 0x17e   : > { %780 = vadd.xlane.f32.xlu1 %v779_v8  ;;  %v740_v32 = vsub.f32 %v3278_v41, %v2868_v16  ;;  %v4883_v8 = vand.u32 2147483648, %v2939_v40  ;;  %v1560_v46 = vsel %vm1559_vm6, %v2941_v42, %v1558_v10  ;;  %v1634_v39 = vand.u32 2147483648, %v2953_v48 }
 0x17f   : > { %2532 = vrsqrt.f32 %v2988_v4  ;;  %v1582_v1 = vmul.f32 %v1581_v57, %v2945_v43  ;;  %v1632_v28 = vsel %vm1631_vm14, %v2953_v48, %v1630_v23  ;;  %vm1633_vm0 = vcmp.eq.f32.partialorder %v2953_v48, 0.0 }
 0x180   : > { %v1551_v6 = vsel %vm1549_vm5, %v4883_v8, %v1548_v24  ;;  %v756_v16 = vand.u32 2147483647, %v740_v32  ;;  %vm3435_vm2 = vcmp.eq.f32.partialorder %v1721_v7, 8.507059e+37  ;;  %v1680_v40 = vsel %vm1679_vm7, %v2955_v51, %v1678_v18 }
 0x181   : > { %v1618_v30 = vmul.f32 %v1617_v45, %v2951_v47  ;;  %v1593_v14 = vmul.f32 %v3316_v36, %v1592_v55  ;;  %v1663_v62 = vmul.f32 0.5, %v1662_v11  ;;  %2534 = vrcp.f32 %v3418_v38 }
 0x182   : > { %v1563_v48 = vsel %vm1561_vm8, %v1562_v19, %v1560_v46  ;;  %v1653_v2 = vmul.f32 %v3320_v15, %v1652_v34  ;;  %v803_v7 = vsel %vm4869_vm1, %v756_v16, 0.0  ;;  %v3449_v21 = vadd.f32 1e-08, %v1551_v6 }
 0x183   : > { %v1622_v5 = vand.u32 2147483648, %v2951_v47  ;;  %v1635_v24 = vsel %vm1633_vm0, %v1634_v39, %v1632_v28  ;;  %v3453_v10 = vpop.eup %2530  ;;  %v4886_v36 = vand.u32 2147483648, %v2955_v51  ;;  %v1584_v15 = vsel %vm1583_vm11, %v2945_v43, %v1582_v1 }
 0x184   : > { %801 = vadd.xlane.f32.xlu2 %v800_v31  ;;  %804 = vadd.xlane.f32.xlu0 %v803_v7  ;;  %vm1597_vm5 = vcmp.eq.f32.partialorder %v2947_v44, 0.0  ;;  %v1833_v19 = vmul.f32 %v3407_v12, %v3340_v35  ;;  %v3467_v57 = vadd.f32 1e-08, %v1563_v48  ;;  %v1620_v23 = vsel %vm1619_vm12, %v2951_v47, %v1618_v30 }
 0x185   : > { %v1683_v42 = vsel %vm1681_vm10, %v4886_v36, %v1680_v40  ;;  %v3465_v18 = vpop.eup %2532  ;;  %v1594_v51 = vmul.f32 %v1593_v14, %v2947_v44  ;;  %v1664_v45 = vsub.f32 1.5, %v1663_v62  ;;  %v1598_v55 = vand.u32 2147483648, %v2947_v44 }
 0x186   : > { %v1654_v11 = vmul.f32 %v1653_v2, %v2962_v53  ;;  %v3475_v31 = vadd.f32 1e-08, %v1635_v24  ;;  %v4887_v34 = vand.u32 2147483648, %v3168_v26  ;;  %v3479_v8 = vadd.f32 1e-08, %v1683_v42 }
 0x187   : > { %v4889_v6 = vand.u32 2147483648, %v2945_v43  ;;  %vm1655_vm6 = vcmp.eq.f32.partialorder %v2962_v53, inf  ;;  %vm1657_vm7 = vcmp.eq.f32.partialorder %v2962_v53, 0.0  ;;  %v3487_v39 = vpop.eup %2534  ;;  %v1623_v1 = vsel %vm1621_vm15, %v1622_v5, %v1620_v23 }
 0x188   : > { %v1724_v32 = vor.u32 1.1754944e-38, %v4887_v34  ;;  %4888 = vst [vmem:[#allocation11_spill] sm:$0xff] %v3479_v8  ;;  %v1685_v26 = vmul.f32 %v3465_v18, %v2988_v4  ;;  %v1834_v28 = vsub.f32 1.0, %v1833_v19  ;;  %v1728_v16 = vmul.f32 %v3453_v10, %v3391_v49 }
 0x189   : > { %v1587_v46 = vsel %vm1585_vm13, %v4889_v6, %v1584_v15  ;;  %2536 = vrcp.f32 %v3467_v57  ;;  %v1596_v43 = vsel %vm1595_vm4, %v2947_v44, %v1594_v51  ;;  %v1658_v40 = vand.u32 2147483648, %v2962_v53 }
 0x18a   : > { %v1665_v30 = vmul.f32 %v3357_v22, %v1664_v45  ;;  %v3501_v14 = vadd.f32 1e-08, %v1587_v46  ;;  %v1656_v47 = vsel %vm1655_vm6, %v2962_v53, %v1654_v11  ;;  %2538 = vrcp.f32 %v3475_v31 }
 0x18b   : > { %v1743_v62 = vmul.f32 %v3266_v33, %v3191_v29  ;;  %2540 = vrcp.f32 %v3449_v21  ;;  %v3508_v48 = vadd.f32 1e-08, %v1623_v1  ;;  %v1725_v22 = vsel %vm3435_vm2, %v1724_v32, %v1720_v37 }
 0x18c   : > { %v1599_v2 = vsel %vm1597_vm5, %v1598_v55, %v1596_v43  ;;  %v1686_v7 = vmul.f32 %v3465_v18, %v1685_v26  ;;  %v1835_v5 = vmul.f32 %v3407_v12, %v1834_v28  ;;  %v1729_v24 = vsub.f32 1.0, %v1728_v16 }
 0x18d   : > { %2542 = vrcp.f32 %v3479_v8  ;;  %v1659_v36 = vsel %vm1657_vm7, %v1658_v40, %v1656_v47  ;;  %v1666_v63 = vmul.f32 %v1665_v30, %v2980_v61  ;;  %vm1667_vm8 = vcmp.eq.f32.partialorder %v2980_v61, inf }
 0x18e   : > { %2544 = vrcp.f32 %v3501_v14  ;;  %v3531_v44 = vmul.f32 %v3528_v60, %v1725_v22  ;;  %v1744_v52 = vsub.f32 1.0, %v1743_v62  ;;  %v3536_v27 = vadd.f32 1e-08, %v1599_v2 }
 0x18f   : > { %v3533_v37 = vpop.eup %2536  ;;  %2546 = vrcp.f32 %v3508_v48  ;;  %vm1669_vm9 = vcmp.eq.f32.partialorder %v2980_v61, 0.0  ;;  %v1670_v53 = vand.u32 2147483648, %v2980_v61  ;;  %v3542_v15 = vadd.f32 1e-08, %v1659_v36 }
 0x190   : > { %v3540_v42 = vpop.eup %2538  ;;  %v3544_v19 = vmul.f32 0.5, %v1686_v7  ;;  %v3547_v23 = vadd.f32 %v3407_v12, %v1835_v5  ;;  %v1730_v51 = vmul.f32 %v3453_v10, %v1729_v24  ;;  %v1668_v55 = vsel %vm1667_vm8, %v2980_v61, %v1666_v63 }
 0x191   : > { %v3550_v45 = vpop.eup %2540  ;;  %vm1837_vm10 = vweird.f32 %v3340_v35  ;;  %vm1838_vm11 = vweird.f32 %v3407_v12  ;;  %v1878_v11 = vmul.f32 %v3487_v39, %v3418_v38  ;;  %vm1732_vm12 = vweird.f32 %v3391_v49 }
 0x192   : > { %vm1733_vm13 = vweird.f32 %v3453_v10  ;;  %v1745_v34 = vmul.f32 %v3266_v33, %v1744_v52  ;;  %v1773_v32 = vmul.f32 %v3533_v37, %v3467_v57  ;;  %2548 = vrcp.f32 %v3536_v27  ;;  %vm3573_vm14 = vmor %vm1837_vm10, %vm1838_vm11 }
 0x193   : > { %v3562_v6 = vpop.eup %2542  ;;  %v1841_v46 = vand.u32 2147483647, %v3340_v35  ;;  %v1843_v1 = vand.u32 2147483648, %v3340_v35  ;;  %v1863_v26 = vmul.f32 %v3540_v42, %v3475_v31  ;;  %v1671_v16 = vsel %vm1669_vm9, %v1670_v53, %v1668_v55  ;;  %vm3586_vm2 = vmor %vm1732_vm12, %vm1733_vm13 }
 0x194   : > { %4890 = vst [vmem:[#allocation12_spill] sm:$0xff] %v3562_v6  ;;  %v3569_v28 = vpop.eup %2544  ;;  %v1731_v40 = vadd.f32 %v3453_v10, %v1730_v51  ;;  %vm1747_vm15 = vweird.f32 %v3191_v29  ;;  %vm1748_vm0 = vweird.f32 %v3266_v33  ;;  %v1736_v61 = vand.u32 2147483647, %v3391_v49 }
 0x195   : > { %4891 = vst [vmem:[#allocation13_spill] sm:$0xff] %v3569_v28  ;;  %v3580_v30 = vpop.eup %2546  ;;  %v1738_v47 = vand.u32 2147483648, %v3391_v49  ;;  %v1879_v62 = vsub.f32 1.0, %v1878_v11  ;;  %v1788_v22 = vmul.f32 %v3331_v0, %v3256_v9  ;;  %v1746_v2 = vadd.f32 %v3266_v33, %v1745_v34  ;;  %vm3605_vm4 = vmor %vm1747_vm15, %vm1748_vm0 }
 0x196   : > { %v1751_v7 = vand.u32 2147483647, %v3191_v29  ;;  %v1753_v5 = vand.u32 2147483648, %v3191_v29  ;;  %v1774_v24 = vsub.f32 1.0, %v1773_v32  ;;  %2550 = vrcp.f32 %v3542_v15 }
 0x197   : > { %v1688_v36 = vsub.f32 1.5, %v3544_v19  ;;  %v1840_v49 = vsel %vm3573_vm14, %v3407_v12, %v3547_v23  ;;  %v1864_v52 = vsub.f32 1.0, %v1863_v26  ;;  %v3609_v53 = vadd.f32 1e-08, %v1671_v16 }
 0x198   : > { %vm3611_vm5 = vcmp.eq.f32.partialorder %v1841_v46, 8.507059e+37  ;;  %v1844_v55 = vor.u32 1.1754944e-38, %v1843_v1  ;;  %v1735_v11 = vsel %vm3586_vm2, %v3453_v10, %v1731_v40  ;;  %v3618_v34 = vpop.eup %2548  ;;  %vm3620_vm6 = vcmp.eq.f32.partialorder %v1736_v61, 8.507059e+37  ;;  %v3774_v1 = vld [vmem:[%s2739_s23 + $0x50] sm:$0xff] }
 0x199   : > { %4900 = vst [vmem:[#allocation14_spill] sm:$0xff] %v3618_v34  ;;  %v1739_v12 = vor.u32 1.1754944e-38, %v1738_v47  ;;  %v1880_v23 = vmul.f32 %v3487_v39, %v1879_v62  ;;  %v1789_v32 = vsub.f32 1.0, %v1788_v22  ;;  %v1750_v46 = vsel %vm3605_vm4, %v3266_v33, %v1746_v2 }
 0x19a   : > { %vm3628_vm7 = vcmp.eq.f32.partialorder %v1751_v7, 8.507059e+37  ;;  %v1754_v26 = vor.u32 1.1754944e-38, %v1753_v5  ;;  %v1775_v10 = vmul.f32 %v3533_v37, %v1774_v24  ;;  %v1865_v43 = vmul.f32 %v3540_v42, %v1864_v52 }
 0x19b   : > { %vm1882_vm8 = vweird.f32 %v3418_v38  ;;  %vm1883_vm9 = vweird.f32 %v3487_v39  ;;  %v1886_v40 = vand.u32 2147483647, %v3418_v38  ;;  %v1888_v33 = vand.u32 2147483648, %v3418_v38 }
 0x19c   : > { %vm1777_vm10 = vweird.f32 %v3467_v57  ;;  %vm1778_vm11 = vweird.f32 %v3533_v37  ;;  %v3643_v35 = vpop.eup %2550  ;;  %vm1867_vm12 = vweird.f32 %v3475_v31  ;;  %vm1868_vm13 = vweird.f32 %v3540_v42  ;;  %vm3649_vm14 = vmor %vm1882_vm8, %vm1883_vm9 }
 0x19d   : > { %v1881_v61 = vadd.f32 %v3487_v39, %v1880_v23  ;;  %v1790_v47 = vmul.f32 %v3331_v0, %v1789_v32  ;;  %v1776_v38 = vadd.f32 %v3533_v37, %v1775_v10  ;;  %v1781_v22 = vand.u32 2147483647, %v3467_v57  ;;  %vm3659_vm0 = vmor %vm1777_vm10, %vm1778_vm11 }
 0x19e   : > { %v1783_v2 = vand.u32 2147483648, %v3467_v57  ;;  %vm1792_vm15 = vweird.f32 %v3256_v9  ;;  %v1866_v7 = vadd.f32 %v3540_v42, %v1865_v43  ;;  %v1873_v5 = vand.u32 2147483648, %v3475_v31  ;;  %vm3673_vm4 = vmor %vm1867_vm12, %vm1868_vm13 }
 0x19f   : > { %v3633_v16 = vpop.xlane.xlu0 %945  ;;  %vm1793_vm2 = vweird.f32 %v3331_v0  ;;  %v1796_v63 = vand.u32 2147483647, %v3256_v9  ;;  %v1845_v52 = vsel %vm3611_vm5, %v1844_v55, %v1840_v49  ;;  %v1740_v57 = vsel %vm3620_vm6, %v1739_v12, %v1735_v11 }
 0x1a0   : > { %2552 = vrsqrt.f32 %v3633_v16  ;;  %v1871_v32 = vand.u32 2147483647, %v3475_v31  ;;  %v1798_v10 = vand.u32 2147483648, %v3256_v9  ;;  %v1755_v43 = vsel %vm3628_vm7, %v1754_v26, %v1750_v46  ;;  %vm3700_vm6 = vmor %vm1792_vm15, %vm1793_vm2 }
 0x1a1   : > { %vm3681_vm8 = vcmp.eq.f32.partialorder %v1886_v40, 8.507059e+37  ;;  %v1889_v51 = vor.u32 1.1754944e-38, %v1888_v33  ;;  %v1791_v55 = vadd.f32 %v3331_v0, %v1790_v47  ;;  %v1885_v29 = vsel %vm3649_vm14, %v3487_v39, %v1881_v61 }
 0x1a2   : > { %v1780_v31 = vsel %vm3659_vm0, %v3533_v37, %v1776_v38  ;;  %vm3692_vm5 = vcmp.eq.f32.partialorder %v1781_v22, 8.507059e+37  ;;  %v1784_v46 = vor.u32 1.1754944e-38, %v1783_v2  ;;  %v1870_v37 = vsel %vm3673_vm4, %v3540_v42, %v1866_v7  ;;  %v3721_v38 = vpop.permute.xlu1 %2193 }
 0x1a3   : > { %v1874_v33 = vor.u32 1.1754944e-38, %v1873_v5  ;;  %vm3710_vm7 = vcmp.eq.f32.partialorder %v1796_v63, 8.507059e+37  ;;  %vm3715_vm9 = vcmp.eq.f32.partialorder %v1871_v32, 8.507059e+37  ;;  %v1799_v47 = vor.u32 1.1754944e-38, %v1798_v10  ;;  %4921 = vst [vmem:[#allocation15_spill] sm:$0xff] %v3721_v38  ;;  %v3752_v32 = vld [vmem:[%s2739_s23 + $0x10] sm:$0xff] }
 0x1a4   : > { %v1923_v62 = vmul.f32 %v3562_v6, %v3479_v8  ;;  %v1795_v2 = vsel %vm3700_vm6, %v3331_v0, %v1791_v55  ;;  %v1758_v7 = vmul.f32 %v3550_v45, %v3449_v21  ;;  %v3732_v5 = vmul.f32 %v3465_v18, %v1688_v36  ;;  %v3741_v0 = vld [vmem:[%s2739_s23 + $0x40] sm:$0xff]  ;;  %v2622_v18 = vld [vmem:[%s2739_s23 + $0x8] sm:$0xff] }
 0x1a5   : > { %v1890_v24 = vsel %vm3681_vm8, %v1889_v51, %v1885_v29  ;;  %v3744_v19 = vmul.f32 %v3741_v0, %v1845_v52  ;;  %v3747_v36 = vmul.f32 %v2622_v18, %v1740_v57  ;;  %v1875_v23 = vsel %vm3715_vm9, %v1874_v33, %v1870_v37  ;;  %v3762_v29 = vld [vmem:[%s2739_s23 + $0x58] sm:$0xff] }
 0x1a6   : > { %v2553_v11 = vpop.eup %2552  ;;  %4922 = vst [vmem:[#allocation16_spill] sm:$0xff] %v3732_v5  ;;  %v3755_v10 = vmul.f32 %v3752_v32, %v1755_v43  ;;  %v1800_v49 = vsel %vm3710_vm7, %v1799_v47, %v1795_v2  ;;  %v1924_v51 = vsub.f32 1.0, %v1923_v62  ;;  %v1818_v52 = vmul.f32 %v3618_v34, %v3536_v27  ;;  %v3786_v47 = vld [vmem:[%s2739_s23 + $0x28] sm:$0xff] }
 0x1a7   : > { %v993_v26 = vmul.f32 %v2553_v11, %v3633_v16  ;;  %v3705_v39 = vpop.xlane.xlu2 %948  ;;  %v760_v40 = vpop.xlane.xlu0 %759  ;;  %v3765_v57 = vmul.f32 %v3762_v29, %v1890_v24  ;;  %v1759_v43 = vsub.f32 1.0, %v1758_v7  ;;  %vm1927_vm10 = vweird.f32 %v3479_v8 }
 0x1a8   : > { %2554 = vrsqrt.f32 %v3705_v39  ;;  %v806_v22 = vmul.f32 %v3528_v60, %v760_v40  ;;  %v1785_v60 = vsel %vm3692_vm5, %v1784_v46, %v1780_v31  ;;  %v3768_v31 = vld [vmem:[%s2739_s23 + $0x20] sm:$0xff]  ;;  %vm1928_vm11 = vweird.f32 %v3562_v6 }
 0x1a9   : > { %v994_v42 = vmul.f32 %v2553_v11, %v993_v26  ;;  %2556 = vrcp.f32 %v3609_v53  ;;  %v3771_v12 = vmul.f32 %v3768_v31, %v1785_v60  ;;  %v3777_v26 = vmul.f32 %v3774_v1, %v1875_v23  ;;  %vm3851_vm5 = vmor %vm1927_vm10, %vm1928_vm11 }
 0x1aa   : > { %838 = vrot.lane.b32.xlu1 %v806_v22, %s2656_s18  ;;  %v3789_v62 = vmul.f32 %v3786_v47, %v1800_v49  ;;  %v1925_v2 = vmul.f32 %v3562_v6, %v1924_v51  ;;  %v1819_v7 = vsub.f32 1.0, %v1818_v52  ;;  %vm1762_vm12 = vweird.f32 %v3449_v21 }
 0x1ab   : > { %v995_v63 = vmul.f32 0.5, %v994_v42  ;;  %v1933_v42 = vand.u32 2147483648, %v3479_v8  ;;  %v1760_v23 = vmul.f32 %v3550_v45, %v1759_v43  ;;  %vm999_vm13 = vcmp.eq.f32.partialorder %v3633_v16, inf }
 0x1ac   : > { %4923 = vst [vmem:[#allocation17_spill] sm:$0xff] %v3789_v62  ;;  %v1002_v49 = vand.u32 2147483648, %v3633_v16  ;;  %vm1763_vm14 = vweird.f32 %v3550_v45  ;;  %v1803_v51 = vmul.f32 %v3569_v28, %v3501_v14  ;;  %vm1001_vm15 = vcmp.eq.f32.partialorder %v3633_v16, 0.0 }
 0x1ad   : > { %v996_v55 = vsub.f32 1.5, %v995_v63  ;;  %vm1822_vm0 = vweird.f32 %v3536_v27  ;;  %vm1823_vm2 = vweird.f32 %v3618_v34  ;;  %vm3827_vm4 = vmor %vm1762_vm12, %vm1763_vm14  ;;  %vm1011_vm6 = vcmp.eq.f32.partialorder %v3705_v39, inf }
 0x1ae   : > { %v2555_v46 = vpop.eup %2554  ;;  %vm3865_vm7 = vmor %vm1822_vm0, %vm1823_vm2  ;;  %vm1013_vm9 = vcmp.eq.f32.partialorder %v3705_v39, 0.0  ;;  %vm1807_vm10 = vweird.f32 %v3501_v14  ;;  %vm1808_vm11 = vweird.f32 %v3569_v28  ;;  %vm1912_vm12 = vweird.f32 %v3609_v53 }
 0x1af   : > { %v997_v37 = vmul.f32 %v2553_v11, %v996_v55  ;;  %v1005_v33 = vmul.f32 %v2555_v46, %v3705_v39  ;;  %v3783_v61 = vpop.xlane.xlu2 %969  ;;  %v763_v9 = vpop.xlane.xlu0 %762 }
 0x1b0   : > { %v3792_v22 = vpop.eup %2556  ;;  %2558 = vrsqrt.f32 %v3783_v61  ;;  %v807_v60 = vmul.f32 %v2622_v18, %v763_v9  ;;  %vm1095_vm14 = vcmp.eq.f32.partialorder %v3783_v61, inf }
 0x1b1   : > { %v998_v11 = vmul.f32 %v997_v37, %v3633_v16  ;;  %v1006_v24 = vmul.f32 %v2555_v46, %v1005_v33  ;;  %v3798_v63 = vpop.xlane.xlu1 %765  ;;  %v1908_v18 = vmul.f32 %v3792_v22, %v3609_v53  ;;  %v1820_v37 = vmul.f32 %v3618_v34, %v1819_v7 }
 0x1b2   : > { %840 = vrot.lane.b32.xlu2 %v807_v60, %s2656_s18  ;;  %v1766_v33 = vand.u32 2147483647, %v3449_v21  ;;  %v3819_v60 = vadd.f32 %v3562_v6, %v1925_v2  ;;  %v1858_v6 = vand.u32 2147483648, %v3508_v48 }
 0x1b3   : > { %v1000_v52 = vsel %vm999_vm13, %v3633_v16, %v998_v11  ;;  %v1007_v55 = vmul.f32 0.5, %v1006_v24  ;;  %v1761_v11 = vadd.f32 %v3550_v45, %v1760_v23  ;;  %v1768_v16 = vand.u32 2147483648, %v3449_v21 }
 0x1b4   : > { %v1003_v43 = vsel %vm1001_vm15, %v1002_v49, %v1000_v52  ;;  %4924 = vst [vmem:[#allocation18_spill] sm:$0xff] %v3819_v60  ;;  %v1828_v49 = vand.u32 2147483648, %v3536_v27  ;;  %v1804_v52 = vsub.f32 1.0, %v1803_v51  ;;  %v1909_v38 = vsub.f32 1.0, %v1908_v18 }
 0x1b5   : > { %v3814_v9 = vadd.f32 1e-08, %v1003_v43  ;;  %v1008_v40 = vsub.f32 1.5, %v1007_v55  ;;  %v3838_v21 = vadd.f32 %v3618_v34, %v1820_v37  ;;  %vm3840_vm8 = vcmp.eq.f32.partialorder %v1766_v33, 8.507059e+37  ;;  %v2629_v34 = vld [vmem:[%s2739_s23 + $0x18] sm:$0xff] }
 0x1b6   : > { %v2559_v24 = vpop.eup %2558  ;;  %v1765_v18 = vsel %vm3827_vm4, %v3550_v45, %v1761_v11  ;;  %v1769_v37 = vor.u32 1.1754944e-38, %v1768_v16  ;;  %v1014_v33 = vand.u32 2147483648, %v3705_v39  ;;  %v1805_v45 = vmul.f32 %v3569_v28, %v1804_v52 }
 0x1b7   : > { %2560 = vrcp.f32 %v3814_v9  ;;  %v1009_v23 = vmul.f32 %v2555_v46, %v1008_v40  ;;  %v1089_v55 = vmul.f32 %v2559_v24, %v3783_v61  ;;  %v784_v2 = vpop.xlane.xlu2 %783  ;;  %v3833_v43 = vpop.xlane.xlu0 %972  ;;  %4927 = vst [vmem:[#allocation19_spill] sm:$0xff] %v3838_v21  ;;  %v3878_v50 = vor.u32 1.1754944e-38, %v1828_v49 }
 0x1b8   : > { %v814_v41 = vmul.f32 %v3741_v0, %v784_v2  ;;  %2562 = vrsqrt.f32 %v3833_v43  ;;  %v4930_v0 = vmov 0  ;;  %v3875_v2 = vor.u32 1.1754944e-38, %v1933_v42 }
 0x1b9   : > { %v1010_v51 = vmul.f32 %v1009_v23, %v3705_v39  ;;  %v1090_v46 = vmul.f32 %v2559_v24, %v1089_v55  ;;  %v3845_v40 = vpop.xlane.xlu1 %768  ;;  %v4931_v0 = vsel %vm3851_vm5, 4294967295, %v4930_v0  ;;  %v4933_v23 = vmov 0  ;;  %4937 = vst [vmem:[#allocation23_spill] sm:$0xff] %v3878_v50 }
 0x1ba   : > { %4932 = vst [vmem:[#allocation20_spill] sm:$0xff] %v4931_v0  ;;  %854 = vrot.lane.b32.xlu0 %v814_v41, %s2656_s18  ;;  %v4934_v23 = vsel %vm3865_vm7, 4294967295, %v4933_v23  ;;  %v1848_v55 = vmul.f32 %v3580_v30, %v3508_v48  ;;  %v1910_v41 = vmul.f32 %v3792_v22, %v1909_v38  ;;  %v1918_v38 = vand.u32 2147483648, %v3609_v53 }
 0x1bb   : > { %4935 = vst [vmem:[#allocation21_spill] sm:$0xff] %v4934_v23  ;;  %v1012_v11 = vsel %vm1011_vm6, %v3705_v39, %v1010_v51  ;;  %v1091_v16 = vmul.f32 0.5, %v1090_v46  ;;  %v3897_v46 = vsel %vm3840_vm8, %v1769_v37, %v1765_v18  ;;  %v3915_v18 = vld [vmem:[%s2739_s23 + $0x48] sm:$0xff]  ;;  %vm1913_vm13 = vweird.f32 %v3792_v22 }
 0x1bc   : > { %v1015_v7 = vsel %vm1013_vm9, %v1014_v33, %v1012_v11  ;;  %4936 = vst [vmem:[#allocation22_spill] sm:$0xff] %v3875_v2  ;;  %v1849_v51 = vsub.f32 1.0, %v1848_v55  ;;  %v3900_v33 = vadd.f32 %v3569_v28, %v1805_v45  ;;  %v3907_v4 = vadd.f32 %v3792_v22, %v1910_v41  ;;  %vm3940_vm2 = vmor %vm1912_vm12, %vm1913_vm13 }
 0x1bd   : > { %v3880_v62 = vpop.eup %2560  ;;  %v1092_v8 = vsub.f32 1.5, %v1091_v16  ;;  %v3902_v11 = vadd.f32 1e-08, %v1015_v7  ;;  %v808_v55 = vmul.f32 %v3752_v32, %v3798_v63  ;;  %vm1097_vm15 = vcmp.eq.f32.partialorder %v3783_v61, 0.0 }
 0x1be   : > { %v3891_v42 = vpop.eup %2562  ;;  %v1201_v49 = vmul.f32 %v3880_v62, %v3814_v9  ;;  %4938 = vst [vmem:[#allocation24_spill] sm:$0xff] %v3900_v33  ;;  %v1098_v32 = vand.u32 2147483648, %v3783_v61  ;;  %vm1206_vm0 = vweird.f32 %v3880_v62  ;;  %vm1205_vm4 = vweird.f32 %v3814_v9 }
 0x1bf   : > { %v1093_v16 = vmul.f32 %v2559_v24, %v1092_v8  ;;  %v787_v52 = vpop.xlane.xlu0 %786  ;;  %v3904_v39 = vpop.xlane.xlu2 %951  ;;  %v1101_v5 = vmul.f32 %v3891_v42, %v3833_v43  ;;  %vm3950_vm8 = vmor %vm1205_vm4, %vm1206_vm0  ;;  %vm1852_vm6 = vweird.f32 %v3508_v48  ;;  %vm1853_vm9 = vweird.f32 %v3580_v30 }
 0x1c0   : > { %v815_v37 = vmul.f32 %v3915_v18, %v787_v52  ;;  %2564 = vrsqrt.f32 %v3904_v39  ;;  %v1202_v45 = vsub.f32 1.0, %v1201_v49  ;;  %v1211_v49 = vand.u32 2147483648, %v3814_v9 }
 0x1c1   : > { %v1094_v8 = vmul.f32 %v1093_v16, %v3783_v61  ;;  %v3922_v24 = vpop.xlane.xlu1 %975  ;;  %v1102_v52 = vmul.f32 %v3891_v42, %v1101_v5  ;;  %v809_v23 = vmul.f32 %v2629_v34, %v3845_v40  ;;  %vm1109_vm0 = vcmp.eq.f32.partialorder %v3833_v43, 0.0 }
 0x1c2   : > { %2566 = vrsqrt.f32 %v3922_v24  ;;  %856 = vrot.lane.b32.xlu2 %v815_v37, %s2656_s18  ;;  %842 = vrot.lane.b32.xlu0 %v808_v55, %s2656_s18  ;;  %v1203_v41 = vmul.f32 %v3880_v62, %v1202_v45  ;;  %v1916_v55 = vand.u32 2147483647, %v3609_v53  ;;  %v1893_v53 = vmul.f32 %v3643_v35, %v3542_v15 }
 0x1c3   : > { %2568 = vrcp.f32 %v3902_v11  ;;  %v1096_v63 = vsel %vm1095_vm14, %v3783_v61, %v1094_v8  ;;  %v1209_v8 = vand.u32 2147483647, %v3814_v9  ;;  %v1103_v21 = vmul.f32 0.5, %v1102_v52  ;;  %vm3990_vm14 = vmor %vm1807_vm10, %vm1808_vm11 }
 0x1c4   : > { %v1099_v7 = vsel %vm1097_vm15, %v1098_v32, %v1096_v63  ;;  %v1204_v61 = vadd.f32 %v3880_v62, %v1203_v41  ;;  %v1919_v32 = vor.u32 1.1754944e-38, %v1918_v38  ;;  %v1850_v63 = vmul.f32 %v3580_v30, %v1849_v51  ;;  %vm4002_vm15 = vmor %vm1852_vm6, %vm1853_vm9 }
 0x1c5   : > { %v3945_v37 = vadd.f32 1e-08, %v1099_v7  ;;  %v1915_v38 = vsel %vm3940_vm2, %v3792_v22, %v3907_v4  ;;  %v1212_v2 = vor.u32 1.1754944e-38, %v1211_v49  ;;  %vm1210_vm12 = vcmp.eq.f32.partialorder %v1209_v8, 8.507059e+37 }
 0x1c6   : > { %v2565_v5 = vpop.eup %2564  ;;  %v1208_v9 = vsel %vm3950_vm8, %v3880_v62, %v1204_v61  ;;  %vm1917_vm13 = vcmp.eq.f32.partialorder %v1916_v55, 8.507059e+37  ;;  %v3981_v52 = vadd.f32 %v3580_v30, %v1850_v63  ;;  %v1894_v16 = vsub.f32 1.0, %v1893_v53 }
 0x1c7   : > { %v1017_v41 = vmul.f32 %v2565_v5, %v3904_v39  ;;  %v3959_v7 = vpop.xlane.xlu0 %954  ;;  %v772_v50 = vpop.xlane.xlu2 %771  ;;  %2570 = vrcp.f32 %v3945_v37  ;;  %v1213_v22 = vsel %vm1210_vm12, %v1212_v2, %v1208_v9  ;;  %vm1107_vm10 = vcmp.eq.f32.partialorder %v3833_v43, inf }
 0x1c8   : > { %v3969_v51 = vpop.eup %2566  ;;  %2572 = vrsqrt.f32 %v3959_v7  ;;  %vm1023_vm11 = vcmp.eq.f32.partialorder %v3904_v39, inf  ;;  %vm1220_vm2 = vweird.f32 %v3902_v11  ;;  %vm1897_vm4 = vweird.f32 %v3542_v15 }
 0x1c9   : > { %v3974_v60 = vpop.eup %2568  ;;  %v1018_v45 = vmul.f32 %v2565_v5, %v1017_v41  ;;  %v1113_v62 = vmul.f32 %v3969_v51, %v3922_v24  ;;  %v790_v61 = vpop.xlane.xlu1 %789  ;;  %v1214_v41 = vmul.f32 %v1213_v22, %v2965_v56  ;;  %v1920_v56 = vsel %vm1917_vm13, %v1919_v32, %v1915_v38 }
 0x1ca   : > { %v816_v4 = vmul.f32 %v3774_v1, %v790_v61  ;;  %844 = vrot.lane.b32.xlu2 %v809_v23, %s2656_s18  ;;  %v4943_v1 = vmov 0  ;;  %v1104_v23 = vsub.f32 1.5, %v1103_v21  ;;  %v1216_v2 = vmul.f32 %v3974_v60, %v3902_v11 }
 0x1cb   : > { %v1019_v40 = vmul.f32 0.5, %v1018_v45  ;;  %v1114_v49 = vmul.f32 %v3969_v51, %v1113_v62  ;;  %v4944_v1 = vsel %vm3990_vm14, 4294967295, %v4943_v1  ;;  %v4007_v21 = vmul.f32 %v3531_v44, %v1214_v41 }
 0x1cc   : > { %4945 = vst [vmem:[#allocation25_spill] sm:$0xff] %v4944_v1  ;;  %858 = vrot.lane.b32.xlu1 %v816_v4, %s2656_s18  ;;  %v4013_v45 = vmul.f32 %v2629_v34, %v3897_v46  ;;  %v1895_v32 = vmul.f32 %v3643_v35, %v1894_v16  ;;  %v4949_v62 = vand.u32 2147483648, %v3501_v14  ;;  %v1105_v16 = vmul.f32 %v3891_v42, %v1104_v23 }
 0x1cd   : > { %v1020_v8 = vsub.f32 1.5, %v1019_v40  ;;  %v1115_v63 = vmul.f32 0.5, %v1114_v49  ;;  %v4010_v9 = vpop.eup %2570  ;;  %v2630_v40 = vld [vmem:[%s2739_s23 + $0x68] sm:$0xff]  ;;  %v1217_v41 = vsub.f32 1.0, %v1216_v2  ;;  %v810_v34 = vmul.f32 %v3768_v31, %v772_v50 }
 0x1ce   : > { %4948 = vst [vmem:[#allocation26_spill] sm:$0xff] %v4013_v45  ;;  %v4022_v61 = vor.u32 1.1754944e-38, %v4949_v62  ;;  %v4029_v49 = vmul.f32 %v2630_v40, %v1920_v56  ;;  %v4037_v62 = vor.u32 1.1754944e-38, %v1858_v6  ;;  %v1321_v40 = vmul.f32 %v4010_v9, %v3945_v37  ;;  %v4046_v53 = vpop.eup %2572 }
 0x1cf   : > { %v1021_v44 = vmul.f32 %v2565_v5, %v1020_v8  ;;  %v4024_v4 = vpop.xlane.xlu0 %981  ;;  %v4026_v22 = vpop.xlane.xlu2 %978  ;;  %v1116_v38 = vsub.f32 1.5, %v1115_v63  ;;  %v4051_v6 = vadd.f32 %v3643_v35, %v1895_v32  ;;  %v1110_v23 = vand.u32 2147483648, %v3833_v43 }
 0x1d0   : > { %4950 = vst [vmem:[#allocation27_spill] sm:$0xff] %v4022_v61  ;;  %2574 = vrsqrt.f32 %v4026_v22  ;;  %v1224_v2 = vand.u32 2147483647, %v3902_v11  ;;  %v1026_v50 = vand.u32 2147483648, %v3904_v39  ;;  %v1218_v31 = vmul.f32 %v3974_v60, %v1217_v41 }
 0x1d1   : > { %4951 = vst [vmem:[#allocation28_spill] sm:$0xff] %v4029_v49  ;;  %v1022_v8 = vmul.f32 %v1021_v44, %v3904_v39  ;;  %v4042_v56 = vpop.xlane.xlu1 %957  ;;  %v1106_v32 = vmul.f32 %v1105_v16, %v3833_v43  ;;  %v1117_v44 = vmul.f32 %v3969_v51, %v1116_v38  ;;  %v1029_v42 = vmul.f32 %v4046_v53, %v3959_v7 }
 0x1d2   : > { %2576 = vrsqrt.f32 %v4042_v56  ;;  %v1322_v46 = vsub.f32 1.0, %v1321_v40  ;;  %vm1898_vm8 = vweird.f32 %v3643_v35  ;;  %vm1025_vm6 = vcmp.eq.f32.partialorder %v3904_v39, 0.0 }
 0x1d3   : > { %v1024_v63 = vsel %vm1023_vm11, %v3904_v39, %v1022_v8  ;;  %vm1119_vm9 = vcmp.eq.f32.partialorder %v3922_v24, inf  ;;  %2578 = vrsqrt.f32 %v4024_v4  ;;  %vm1121_vm12 = vcmp.eq.f32.partialorder %v3922_v24, 0.0 }
 0x1d4   : > { %846 = vrot.lane.b32.xlu1 %v810_v34, %s2656_s18  ;;  %v1122_v34 = vand.u32 2147483648, %v3922_v24  ;;  %v1027_v16 = vsel %vm1025_vm6, %v1026_v50, %v1024_v63  ;;  %vm1221_vm13 = vweird.f32 %v3974_v60  ;;  %vm4076_vm11 = vcmp.eq.f32.partialorder %v1224_v2, 8.507059e+37 }
 0x1d5   : > { %v1226_v39 = vand.u32 2147483648, %v3902_v11  ;;  %v1323_v63 = vmul.f32 %v4010_v9, %v1322_v46  ;;  %v1219_v50 = vadd.f32 %v3974_v60, %v1218_v31  ;;  %v1108_v33 = vsel %vm1107_vm10, %v3833_v43, %v1106_v32  ;;  %vm4108_vm10 = vmor %vm1220_vm2, %vm1221_vm13 }
 0x1d6   : > { %v2575_v41 = vpop.eup %2574  ;;  %v1118_v2 = vmul.f32 %v1117_v44, %v3922_v24  ;;  %v1030_v28 = vmul.f32 %v4046_v53, %v1029_v42  ;;  %v4096_v49 = vadd.f32 1e-08, %v1027_v16  ;;  %vm1326_vm6 = vweird.f32 %v4010_v9 }
 0x1d7   : > { %v796_v51 = vpop.xlane.xlu0 %795  ;;  %v793_v38 = vpop.xlane.xlu2 %792  ;;  %v1125_v5 = vmul.f32 %v2575_v41, %v4026_v22  ;;  %v1329_v31 = vand.u32 2147483647, %v3945_v37  ;;  %v1331_v42 = vand.u32 2147483648, %v3945_v37  ;;  %v1324_v16 = vadd.f32 %v4010_v9, %v1323_v63  ;;  %v4132_v63 = vld [vmem:[%s2739_s23 + $0x60] sm:$0xff] }
 0x1d8   : > { %v4081_v40 = vpop.eup %2576  ;;  %v817_v61 = vmul.f32 %v3762_v29, %v793_v38  ;;  %vm1325_vm3 = vweird.f32 %v3945_v37  ;;  %v1111_v38 = vsel %vm1109_vm0, %v1110_v23, %v1108_v33  ;;  %v1120_v11 = vsel %vm1119_vm9, %v3922_v24, %v1118_v2  ;;  %vm4155_vm0 = vmor %vm1897_vm4, %vm1898_vm8 }
 0x1d9   : > { %v1041_v1 = vmul.f32 %v4081_v40, %v4042_v56  ;;  %v4094_v0 = vpop.xlane.xlu1 %984  ;;  %v1126_v29 = vmul.f32 %v2575_v41, %v1125_v5  ;;  %v1227_v5 = vor.u32 1.1754944e-38, %v1226_v39  ;;  %v4112_v44 = vpop.eup %2578  ;;  %v1031_v45 = vmul.f32 0.5, %v1030_v28  ;;  %vm4126_vm2 = vmor %vm1325_vm3, %vm1326_vm6 }
 0x1da   : > { %2580 = vrsqrt.f32 %v4094_v0  ;;  %860 = vrot.lane.b32.xlu2 %v817_v61, %s2656_s18  ;;  %v1328_v43 = vsel %vm4126_vm2, %v4010_v9, %v1324_v16  ;;  %v1137_v28 = vmul.f32 %v4112_v44, %v4024_v4  ;;  %vm1330_vm3 = vcmp.eq.f32.partialorder %v1329_v31, 8.507059e+37 }
 0x1db   : > { %v1042_v46 = vmul.f32 %v4081_v40, %v1041_v1  ;;  %v1127_v61 = vmul.f32 0.5, %v1126_v29  ;;  %v1223_v1 = vsel %vm4108_vm10, %v3974_v60, %v1219_v50  ;;  %2582 = vrcp.f32 %v4096_v49 }
 0x1dc   : > { %v818_v60 = vmul.f32 %v4132_v63, %v796_v51  ;;  %v1332_v50 = vor.u32 1.1754944e-38, %v1331_v42  ;;  %v1228_v2 = vsel %vm4076_vm11, %v1227_v5, %v1223_v1  ;;  %v1123_v51 = vsel %vm1121_vm12, %v1122_v34, %v1120_v11 }
 0x1dd   : > { %v1043_v39 = vmul.f32 0.5, %v1042_v46  ;;  %v1128_v37 = vsub.f32 1.5, %v1127_v61  ;;  %v4159_v31 = vadd.f32 1e-08, %v1111_v38  ;;  %v1032_v8 = vsub.f32 1.5, %v1031_v45 }
 0x1de   : > { %v1333_v34 = vsel %vm1330_vm3, %v1332_v50, %v1328_v43  ;;  %v1229_v5 = vmul.f32 %v1228_v2, %v2986_v3  ;;  %v4961_v16 = vand.u32 2147483648, %v3542_v15  ;;  %v4173_v38 = vadd.f32 1e-08, %v1123_v51 }
 0x1df   : > { %v4140_v33 = vpop.xlane.xlu2 %960  ;;  %v4142_v23 = vpop.xlane.xlu0 %963  ;;  %v1129_v32 = vmul.f32 %v2575_v41, %v1128_v37  ;;  %v1044_v61 = vsub.f32 1.5, %v1043_v39  ;;  %v1138_v45 = vmul.f32 %v4112_v44, %v1137_v28  ;;  %vm1035_vm4 = vcmp.eq.f32.partialorder %v3959_v7, inf }
 0x1e0   : > { %v4146_v46 = vpop.eup %2580  ;;  %2584 = vrsqrt.f32 %v4140_v33  ;;  %v4171_v1 = vor.u32 1.1754944e-38, %v4961_v16  ;;  %vm1131_vm8 = vcmp.eq.f32.partialorder %v4026_v22, inf  ;;  %v1334_v37 = vmul.f32 %v1333_v34, %v3000_v13 }
 0x1e1   : > { %v1149_v42 = vmul.f32 %v4146_v46, %v4094_v0  ;;  %v4163_v24 = vpop.xlane.xlu1 %798  ;;  %v1130_v41 = vmul.f32 %v1129_v32, %v4026_v22  ;;  %2586 = vrsqrt.f32 %v4142_v23  ;;  %v4181_v29 = vpop.eup %2582  ;;  %v1045_v3 = vmul.f32 %v4081_v40, %v1044_v61 }
 0x1e2   : > { %4960 = vst [vmem:[#allocation29_spill] sm:$0xff] %v4163_v24  ;;  %862 = vrot.lane.b32.xlu2 %v818_v60, %s2656_s18  ;;  %2588 = vrcp.f32 %v4159_v31  ;;  %v1033_v60 = vmul.f32 %v4046_v53, %v1032_v8  ;;  %vm1133_vm9 = vcmp.eq.f32.partialorder %v4026_v22, 0.0  ;;  %v1134_v2 = vand.u32 2147483648, %v4026_v22 }
 0x1e3   : > { %v1150_v11 = vmul.f32 %v4146_v46, %v1149_v42  ;;  %v1132_v43 = vsel %vm1131_vm8, %v4026_v22, %v1130_v41  ;;  %v4193_v51 = vmul.f32 %v3744_v19, %v1334_v37  ;;  %v4196_v40 = vmul.f32 %v3747_v36, %v1229_v5  ;;  %v4207_v41 = vld [vmem:[%s2739_s23 + $0x30] sm:$0xff] }
 0x1e4   : > { %2590 = vrcp.f32 %v4173_v38  ;;  %v1139_v13 = vmul.f32 0.5, %v1138_v45  ;;  %v1231_v8 = vmul.f32 %v4181_v29, %v4096_v49  ;;  %v1135_v34 = vsel %vm1133_vm9, %v1134_v2, %v1132_v43  ;;  %4962 = vst [vmem:[#allocation30_spill] sm:$0xff] %v4207_v41 }
 0x1e5   : > { %v1151_v28 = vmul.f32 0.5, %v1150_v11  ;;  %v1046_v22 = vmul.f32 %v1045_v3, %v4042_v56  ;;  %v1034_v5 = vmul.f32 %v1033_v60, %v3959_v7  ;;  %vm1037_vm12 = vcmp.eq.f32.partialorder %v3959_v7, 0.0 }
 0x1e6   : > { %v2585_v50 = vpop.eup %2584  ;;  %v1038_v43 = vand.u32 2147483648, %v3959_v7  ;;  %v1140_v60 = vsub.f32 1.5, %v1139_v13  ;;  %vm1047_vm13 = vcmp.eq.f32.partialorder %v4042_v56, inf  ;;  %vm1049_vm11 = vcmp.eq.f32.partialorder %v4042_v56, 0.0 }
 0x1e7   : > { %v1053_v53 = vmul.f32 %v2585_v50, %v4140_v33  ;;  %v775_v32 = vpop.xlane.xlu2 %774  ;;  %v778_v61 = vpop.xlane.xlu0 %777  ;;  %v1152_v16 = vsub.f32 1.5, %v1151_v28  ;;  %v4223_v28 = vadd.f32 1e-08, %v1135_v34  ;;  %vm1155_vm6 = vcmp.eq.f32.partialorder %v4094_v0, inf }
 0x1e8   : > { %v4202_v42 = vpop.eup %2586  ;;  %v811_v19 = vmul.f32 %v3786_v47, %v775_v32  ;;  %v812_v36 = vmul.f32 %v4207_v41, %v778_v61  ;;  %v1050_v32 = vand.u32 2147483648, %v4042_v56  ;;  %v1232_v61 = vsub.f32 1.0, %v1231_v8 }
 0x1e9   : > { %v1054_v45 = vmul.f32 %v2585_v50, %v1053_v53  ;;  %v1065_v11 = vmul.f32 %v4202_v42, %v4142_v23  ;;  %v4213_v37 = vpop.xlane.xlu1 %966  ;;  %v4221_v47 = vpop.eup %2588  ;;  %v1048_v53 = vsel %vm1047_vm13, %v4042_v56, %v1046_v22  ;;  %v1153_v13 = vmul.f32 %v4146_v46, %v1152_v16 }
 0x1ea   : > { %2592 = vrsqrt.f32 %v4213_v37  ;;  %848 = vrot.lane.b32.xlu0 %v811_v19, %s2656_s18  ;;  %850 = vrot.lane.b32.xlu2 %v812_v36, %s2656_s18  ;;  %v4229_v39 = vpop.eup %2590  ;;  %v1036_v19 = vsel %vm1035_vm4, %v3959_v7, %v1034_v5  ;;  %vm1157_vm10 = vcmp.eq.f32.partialorder %v4094_v0, 0.0  ;;  %v1158_v22 = vand.u32 2147483648, %v4094_v0 }
 0x1eb   : > { %v1055_v2 = vmul.f32 0.5, %v1054_v45  ;;  %v1066_v36 = vmul.f32 %v4202_v42, %v1065_v11  ;;  %v4241_v56 = vsel %vm4869_vm1, %v4007_v21, 0.0  ;;  %v1141_v8 = vmul.f32 %v4112_v44, %v1140_v60 }
 0x1ec   : > { %2594 = vrcp.f32 %v4223_v28  ;;  %v1051_v5 = vsel %vm1049_vm11, %v1050_v32, %v1048_v53  ;;  %v4249_v11 = vsel %vm1037_vm12, %v1038_v43, %v1036_v19  ;;  %v1351_v21 = vmul.f32 %v4229_v39, %v4173_v38 }
 0x1ed   : > { %v1056_v34 = vsub.f32 1.5, %v1055_v2  ;;  %v1233_v2 = vmul.f32 %v4181_v29, %v1232_v61  ;;  %v1154_v44 = vmul.f32 %v1153_v13, %v4094_v0  ;;  %v1067_v53 = vmul.f32 0.5, %v1066_v36 }
 0x1ee   : > { %v4258_v32 = vadd.f32 1e-08, %v1051_v5  ;;  %vm1059_vm2 = vcmp.eq.f32.partialorder %v4140_v33, inf  ;;  %vm1236_vm3 = vweird.f32 %v4181_v29  ;;  %v1241_v7 = vand.u32 2147483648, %v4096_v49 }
 0x1ef   : > { %v1057_v45 = vmul.f32 %v2585_v50, %v1056_v34  ;;  %v4245_v46 = vpop.xlane.xlu2 %987  ;;  %v4264_v43 = vmul.f32 %v1141_v8, %v4024_v4  ;;  %vm1061_vm4 = vcmp.eq.f32.partialorder %v4140_v33, 0.0  ;;  %v1239_v19 = vand.u32 2147483647, %v4096_v49 }
 0x1f0   : > { %v2593_v16 = vpop.eup %2592  ;;  %2596 = vrsqrt.f32 %v4245_v46  ;;  %v1062_v13 = vand.u32 2147483648, %v4140_v33  ;;  %v1234_v34 = vadd.f32 %v4181_v29, %v1233_v2  ;;  %vm1235_vm8 = vweird.f32 %v4096_v49 }
 0x1f1   : > { %v1058_v60 = vmul.f32 %v1057_v45, %v4140_v33  ;;  %v1077_v50 = vmul.f32 %v2593_v16, %v4213_v37  ;;  %v1352_v36 = vsub.f32 1.0, %v1351_v21  ;;  %v1156_v45 = vsel %vm1155_vm6, %v4094_v0, %v1154_v44  ;;  %vm4279_vm9 = vmor %vm1235_vm8, %vm1236_vm3 }
 0x1f2   : > { %v4271_v5 = vpop.eup %2594  ;;  %v1068_v3 = vsub.f32 1.5, %v1067_v53  ;;  %2598 = vrcp.f32 %v4258_v32  ;;  %v1238_v49 = vsel %vm4279_vm9, %v4181_v29, %v1234_v34  ;;  %v1242_v21 = vor.u32 1.1754944e-38, %v1241_v7  ;;  %v4297_v29 = vpop.xlane.xlu0 %990 }
 0x1f3   : > { %v1078_v61 = vmul.f32 %v2593_v16, %v1077_v50  ;;  %v1060_v8 = vsel %vm1059_vm2, %v4140_v33, %v1058_v60  ;;  %v1353_v44 = vmul.f32 %v4229_v39, %v1352_v36  ;;  %vm1083_vm12 = vcmp.eq.f32.partialorder %v4213_v37, inf }
 0x1f4   : > { %vm1240_vm13 = vcmp.eq.f32.partialorder %v1239_v19, 8.507059e+37  ;;  %vm1356_vm11 = vweird.f32 %v4229_v39  ;;  %vm1143_vm6 = vcmp.eq.f32.partialorder %v4024_v4, inf  ;;  %v1159_v53 = vsel %vm1157_vm10, %v1158_v22, %v1156_v45 }
 0x1f5   : > { %v1079_v24 = vmul.f32 0.5, %v1078_v61  ;;  %v1063_v61 = vsel %vm1061_vm4, %v1062_v13, %v1060_v8  ;;  %vm1071_vm2 = vcmp.eq.f32.partialorder %v4142_v23, inf  ;;  %v1354_v7 = vadd.f32 %v4229_v39, %v1353_v44 }
 0x1f6   : > { %v2597_v2 = vpop.eup %2596  ;;  %v1069_v34 = vmul.f32 %v4202_v42, %v1068_v3  ;;  %vm1355_vm3 = vweird.f32 %v4173_v38  ;;  %v1359_v36 = vand.u32 2147483647, %v4173_v38  ;;  %vm1085_vm10 = vcmp.eq.f32.partialorder %v4213_v37, 0.0 }
 0x1f7   : > { %v1080_v41 = vsub.f32 1.5, %v1079_v24  ;;  %v1161_v60 = vmul.f32 %v2597_v2, %v4245_v46  ;;  %v1243_v24 = vsel %vm1240_vm13, %v1242_v21, %v1238_v49  ;;  %vm4307_vm4 = vmor %vm1355_vm3, %vm1356_vm11  ;;  %v1361_v22 = vand.u32 2147483648, %v4173_v38 }
 0x1f8   : > { %v1244_v0 = vmul.f32 %v1243_v24, %v3014_v25  ;;  %v1366_v42 = vmul.f32 %v4271_v5, %v4223_v28  ;;  %vm1145_vm8 = vcmp.eq.f32.partialorder %v4024_v4, 0.0  ;;  %v4315_v3 = vadd.f32 1e-08, %v1063_v61 }
 0x1f9   : > { %v1162_v19 = vmul.f32 %v2597_v2, %v1161_v60  ;;  %v1081_v50 = vmul.f32 %v2593_v16, %v1080_v41  ;;  %2600 = vrsqrt.f32 %v4297_v29  ;;  %v1358_v25 = vsel %vm4307_vm4, %v4229_v39, %v1354_v7  ;;  %v4321_v16 = vpop.eup %2598 }
 0x1fa   : > { %v1086_v13 = vand.u32 2147483648, %v4213_v37  ;;  %v4325_v38 = vmul.f32 %v3755_v10, %v1244_v0  ;;  %v1362_v45 = vor.u32 1.1754944e-38, %v1361_v22  ;;  %v1367_v8 = vsub.f32 1.0, %v1366_v42 }
 0x1fb   : > { %v1163_v41 = vmul.f32 0.5, %v1162_v19  ;;  %v4327_v49 = vadd.f32 1e-08, %v1159_v53  ;;  %vm1167_vm13 = vcmp.eq.f32.partialorder %v4245_v46, inf  ;;  %vm1360_vm11 = vcmp.eq.f32.partialorder %v1359_v36, 8.507059e+37 }
 0x1fc   : > { %v4967_v44 = vand.u32 2147483647, %v3508_v48  ;;  %v1082_v60 = vmul.f32 %v1081_v50, %v4213_v37  ;;  %vm1169_vm4 = vcmp.eq.f32.partialorder %v4245_v46, 0.0  ;;  %v1363_v10 = vsel %vm1360_vm11, %v1362_v45, %v1358_v25 }
 0x1fd   : > { %v1164_v21 = vsub.f32 1.5, %v1163_v41  ;;  %v1368_v53 = vmul.f32 %v4271_v5, %v1367_v8  ;;  %2602 = vrcp.f32 %v4315_v3  ;;  %v1070_v61 = vmul.f32 %v1069_v34, %v4142_v23 }
 0x1fe   : > { %vm4333_vm3 = vcmp.eq.f32.partialorder %v4967_v44, 8.507059e+37  ;;  %1969 = vadd.xlane.f32.xlu1 %v4241_v56  ;;  %v1364_v48 = vmul.f32 %v1363_v10, %v3063_v58  ;;  %v4970_v7 = vand.u32 2147483647, %v3542_v15  ;;  %v1170_v36 = vand.u32 2147483648, %v4245_v46 }
 0x1ff   : > { %v1165_v24 = vmul.f32 %v2597_v2, %v1164_v21  ;;  %v1369_v56 = vadd.f32 %v4271_v5, %v1368_v53  ;;  %vm1371_vm11 = vweird.f32 %v4271_v5  ;;  %v1261_v50 = vmul.f32 %v4321_v16, %v4258_v32  ;;  %v4355_v0 = vpop.eup %2600 }
 0x200   : > { %vm4346_vm1 = vcmp.eq.f32.partialorder %v4970_v7, 8.507059e+37  ;;  %2604 = vrcp.f32 %v4327_v49  ;;  %v4360_v15 = vmul.f32 %v3777_v26, %v1364_v48  ;;  %v1376_v2 = vand.u32 2147483648, %v4223_v28 }
 0x201   : > { %v1166_v58 = vmul.f32 %v1165_v24, %v4245_v46  ;;  %v1084_v34 = vsel %vm1083_vm12, %v4213_v37, %v1082_v60  ;;  %vm1370_vm9 = vweird.f32 %v4223_v28  ;;  %v1374_v33 = vand.u32 2147483647, %v4223_v28 }
 0x202   : > { %v1262_v22 = vsub.f32 1.0, %v1261_v50  ;;  %v1144_v42 = vsel %vm1143_vm6, %v4024_v4, %v4264_v43  ;;  %v1072_v26 = vsel %vm1071_vm2, %v4142_v23, %v1070_v61  ;;  %v1074_v41 = vand.u32 2147483648, %v4142_v23  ;;  %vm4381_vm12 = vmor %vm1370_vm9, %vm1371_vm11 }
 0x203   : > { %v1168_v25 = vsel %vm1167_vm13, %v4245_v46, %v1166_v58  ;;  %v1173_v43 = vmul.f32 %v4355_v0, %v4297_v29  ;;  %v1373_v8 = vsel %vm4381_vm12, %v4271_v5, %v1369_v56  ;;  %v4393_v44 = vpop.eup %2602  ;;  %v1087_v60 = vsel %vm1085_vm10, %v1086_v13, %v1084_v34  ;;  %v4438_v34 = vpop.xlane.xlu2 %801 }
 0x204   : > { %v1171_v45 = vsel %vm1169_vm4, %v1170_v36, %v1168_v25  ;;  %v1263_v21 = vmul.f32 %v4321_v16, %v1262_v22  ;;  %v1377_v53 = vor.u32 1.1754944e-38, %v1376_v2  ;;  %vm1266_vm6 = vweird.f32 %v4321_v16 }
 0x205   : > { %v4397_v10 = vadd.f32 1e-08, %v1171_v45  ;;  %v4975_v46 = vand.u32 2147483648, %v4024_v4  ;;  %vm1375_vm2 = vcmp.eq.f32.partialorder %v1374_v33, 8.507059e+37  ;;  %v1271_v24 = vand.u32 2147483648, %v4258_v32 }
 0x206   : > { %v1264_v5 = vadd.f32 %v4321_v16, %v1263_v21  ;;  %v4406_v48 = vpop.eup %2604  ;;  %v4409_v37 = vadd.f32 1e-08, %v4249_v11  ;;  %v1378_v13 = vsel %vm1375_vm2, %v1377_v53, %v1373_v8  ;;  %vm1265_vm10 = vweird.f32 %v4258_v32 }
 0x207   : > { %v1147_v61 = vsel %vm1145_vm8, %v4975_v46, %v1144_v42  ;;  %v1269_v7 = vand.u32 2147483647, %v4258_v32  ;;  %vm4976_vm9 = vcmp.eq.f32.partialorder %v4142_v23, 0.0  ;;  %v4415_v4 = vadd.f32 1e-08, %v1087_v60  ;;  %vm4417_vm8 = vmor %vm1265_vm10, %vm1266_vm6  ;;  %v4466_v42 = vld [vmem:[%s2739_s23 + $0x38] sm:$0xff] }
 0x208   : > { %v1075_v36 = vsel %vm4976_vm9, %v1074_v41, %v1072_v26  ;;  %v1276_v50 = vmul.f32 %v4393_v44, %v4315_v3  ;;  %v4979_v11 = vsel %vm4002_vm15, %v3580_v30, %v3981_v52  ;;  %v4431_v23 = vadd.f32 1e-08, %v1147_v61 }
 0x209   : > { %v1860_v32 = vsel %vm4333_vm3, %v4037_v62, %v4979_v11  ;;  %2606 = vrcp.f32 %v4397_v10  ;;  %v1174_v58 = vmul.f32 %v4355_v0, %v1173_v43  ;;  %v1268_v2 = vsel %vm4417_vm8, %v4321_v16, %v1264_v5  ;;  %v781_v16 = vpop.xlane.xlu1 %780 }
 0x20a   : > { %v1379_v55 = vmul.f32 %v1378_v13, %v3095_v54  ;;  %v1272_v33 = vor.u32 1.1754944e-38, %v1271_v24  ;;  %v1277_v30 = vsub.f32 1.0, %v1276_v50  ;;  %v4980_v52 = vsel %vm4155_vm0, %v3643_v35, %v4051_v6 }
 0x20b   : > { %v1905_v62 = vsel %vm4346_vm1, %v4171_v1, %v4980_v52  ;;  %2608 = vrcp.f32 %v4409_v37  ;;  %v4450_v39 = vadd.f32 1e-08, %v1075_v36  ;;  %vm1270_vm15 = vcmp.eq.f32.partialorder %v1269_v7, 8.507059e+37 }
 0x20c   : > { %v1396_v54 = vmul.f32 %v4406_v48, %v4327_v49  ;;  %2610 = vrcp.f32 %v4415_v4  ;;  %v1273_v22 = vsel %vm1270_vm15, %v1272_v33, %v1268_v2  ;;  %v1278_v9 = vmul.f32 %v4393_v44, %v1277_v30  ;;  %v841_v36 = vpop.permute.xlu2 %840 }
 0x20d   : > { %v4457_v35 = vmul.f32 %v3915_v18, %v1860_v32  ;;  %2612 = vrcp.f32 %v4431_v23  ;;  %v4460_v6 = vmul.f32 0.5, %v1174_v58  ;;  %v4463_v19 = vmul.f32 %v4132_v63, %v1905_v62 }
 0x20e   : > { %v1397_v1 = vsub.f32 1.0, %v1396_v54  ;;  %v813_v26 = vmul.f32 %v4466_v42, %v781_v16  ;;  %vm4981_vm1 = vcmask 23552   ;;  %v1963_v18 = vmul.f32 %v3765_v57, %v1379_v55 }
 0x20f   : > { %v1992_v41 = vsel %vm4981_vm1, %v4193_v51, 0.0  ;;  %vm4982_vm0 = vmmov %vm4981_vm1  ;;  %v4474_v28 = vpop.eup %2606  ;;  %2614 = vrcp.f32 %v4450_v39  ;;  %v1274_v45 = vmul.f32 %v1273_v22, %v3079_v17  ;;  %vm1281_vm13 = vweird.f32 %v4393_v44  ;;  %v5010_v22 = vld [vmem:[#allocation7_spill] sm:$0xff] }
 0x210   : > { %v1971_v25 = vsel %vm4982_vm0, %v4196_v40, 0.0  ;;  %v1284_v63 = vand.u32 2147483647, %v4315_v3  ;;  %v1279_v43 = vadd.f32 %v4393_v44, %v1278_v9  ;;  %v1286_v8 = vand.u32 2147483648, %v4315_v3  ;;  %vm4983_vm3 = vmmov %vm4982_vm0 }
 0x211   : > { %v1404_v51 = vand.u32 2147483647, %v4327_v49  ;;  %v1336_v40 = vmul.f32 %v4221_v47, %v4159_v31  ;;  %v4485_v57 = vpop.eup %2608  ;;  %v1176_v21 = vsub.f32 1.5, %v4460_v6  ;;  %v1974_v17 = vsel %vm4983_vm3, %v4325_v38, 0.0  ;;  %vm4984_vm4 = vmmov %vm4982_vm0 }
 0x212   : > { %v1998_v60 = vsel %vm4984_vm4, %v4360_v15, 0.0  ;;  %v1398_v53 = vmul.f32 %v4406_v48, %v1397_v1  ;;  %v4493_v46 = vpop.eup %2610  ;;  %vm4985_vm11 = vmmov %vm4982_vm0  ;;  %vm1280_vm12 = vweird.f32 %v4315_v3  ;;  %v1411_v5 = vmul.f32 %v4474_v28, %v4397_v10 }
 0x213   : > { %v4496_v61 = vsel %vm4985_vm11, %v1963_v18, 0.0  ;;  %v1337_v24 = vsub.f32 1.0, %v1336_v40  ;;  %v4501_v13 = vpop.eup %2612  ;;  %1993 = vadd.xlane.f32.xlu2 %v1992_v41  ;;  %v1956_v38 = vmul.f32 %v3771_v12, %v1274_v45  ;;  %vm4506_vm6 = vmor %vm1280_vm12, %vm1281_vm13  ;;  %vm4510_vm2 = vcmp.eq.f32.partialorder %v1284_v63, 8.507059e+37 }
 0x214   : > { %vm1400_vm10 = vweird.f32 %v4327_v49  ;;  %v1406_v3 = vand.u32 2147483648, %v4327_v49  ;;  %1972 = vadd.xlane.f32.xlu0 %v1971_v25  ;;  %v1283_v12 = vsel %vm4506_vm6, %v4393_v44, %v1279_v43  ;;  %v1287_v56 = vor.u32 1.1754944e-38, %v1286_v8  ;;  %vm4993_vm13 = vmmov %vm4983_vm3 }
 0x215   : > { %vm1401_vm9 = vweird.f32 %v4406_v48  ;;  %vm4520_vm8 = vcmp.eq.f32.partialorder %v1404_v51, 8.507059e+37  ;;  %v4524_v11 = vpop.eup %2614  ;;  %v1399_v32 = vadd.f32 %v4406_v48, %v1398_v53  ;;  %v1306_v58 = vmul.f32 %v4493_v46, %v4415_v4 }
 0x216   : > { %v1346_v2 = vand.u32 2147483648, %v4159_v31  ;;  %v1246_v55 = vmul.f32 %v4485_v57, %v4409_v37  ;;  %v1412_v44 = vsub.f32 1.0, %v1411_v5  ;;  %vm1415_vm15 = vweird.f32 %v4397_v10  ;;  %vm4546_vm3 = vmor %vm1400_vm10, %vm1401_vm9 }
 0x217   : > { %v1338_v33 = vmul.f32 %v4221_v47, %v1337_v24  ;;  %vm1341_vm1 = vweird.f32 %v4221_v47  ;;  %v1344_v30 = vand.u32 2147483647, %v4159_v31  ;;  %vm4992_vm0 = vcmask 7168   ;;  %852 = vrot.lane.b32.xlu1 %v813_v26, %s2656_s18  ;;  %v4996_v24 = vld [vmem:[#allocation11_spill] sm:$0xff] }
 0x218   : > { %v888_v52 = vsel %vm4992_vm0, %v841_v36, 0.0  ;;  %v4539_v62 = vsel %vm4993_vm13, %v1956_v38, 0.0  ;;  %v1407_v16 = vor.u32 1.1754944e-38, %v1406_v3  ;;  %v1419_v54 = vand.u32 2147483647, %v4397_v10 }
 0x219   : > { %vm1416_vm4 = vweird.f32 %v4474_v28  ;;  %v1307_v9 = vsub.f32 1.0, %v1306_v58  ;;  %v1339_v1 = vadd.f32 %v4221_v47, %v1338_v33  ;;  %vm1340_vm11 = vweird.f32 %v4159_v31  ;;  %v4617_v33 = vpop.xlane.xlu0 %804 }
 0x21a   : > { %v1288_v26 = vsel %vm4510_vm2, %v1287_v56, %v1283_v12  ;;  %v1421_v41 = vand.u32 2147483648, %v4397_v10  ;;  %vm1342_vm12 = vmor %vm1340_vm11, %vm1341_vm1  ;;  %v1347_v25 = vor.u32 1.1754944e-38, %v1346_v2  ;;  %v1247_v18 = vsub.f32 1.0, %v1246_v55  ;;  %v5036_v56 = vld [vmem:[#allocation2_spill] sm:$0xff] }
 0x21b   : > { %v1403_v49 = vsel %vm4546_vm3, %v4406_v48, %v1399_v32  ;;  %v1413_v45 = vmul.f32 %v4474_v28, %v1412_v44  ;;  %v1343_v63 = vsel %vm1342_vm12, %v4221_v47, %v1339_v1  ;;  %vm1345_vm6 = vcmp.eq.f32.partialorder %v1344_v30, 8.507059e+37  ;;  %1975 = vadd.xlane.f32.xlu2 %v1974_v17  ;;  %vm5000_vm1 = vmmov %vm4992_vm0 }
 0x21c   : > { %v1348_v43 = vsel %vm1345_vm6, %v1347_v25, %v1343_v63  ;;  %v1248_v31 = vmul.f32 %v4485_v57, %v1247_v18  ;;  %vm1251_vm2 = vweird.f32 %v4485_v57  ;;  %v1254_v8 = vand.u32 2147483647, %v4409_v37  ;;  %1999 = vadd.xlane.f32.xlu0 %v1998_v60  ;;  %v839_v47 = vpop.permute.xlu1 %838  ;;  %vm4609_vm6 = vmor %vm1415_vm15, %vm1416_vm4  ;;  %v5013_v25 = vld [vmem:[#allocation26_spill] sm:$0xff] }
 0x21d   : > { %v1308_v51 = vmul.f32 %v4493_v46, %v1307_v9  ;;  %v1349_v40 = vmul.f32 %v1348_v43, %v3029_v59  ;;  %v1256_v48 = vand.u32 2147483648, %v4409_v37  ;;  %v1381_v53 = vmul.f32 %v4501_v13, %v4431_v23  ;;  %v5016_v43 = vld [vmem:[#allocation5_spill] sm:$0xff] }
 0x21e   : > { %v1289_v17 = vmul.f32 %v1288_v26, %v3110_v20  ;;  %v1408_v5 = vsel %vm4520_vm8, %v1407_v16, %v1403_v49  ;;  %v4997_v38 = vand.u32 2147483647, %v4996_v24  ;;  %v1249_v60 = vadd.f32 %v4485_v57, %v1248_v31 }
 0x21f   : > { %vm1250_vm9 = vweird.f32 %v4409_v37  ;;  %v887_v59 = vsel %vm5000_vm1, %v839_v47, 0.0  ;;  %v1414_v7 = vadd.f32 %v4474_v28, %v1413_v45  ;;  %v4583_v3 = vmul.f32 %v4457_v35, %v1349_v40  ;;  %v5015_v45 = vld [vmem:[#allocation28_spill] sm:$0xff]  ;;  %v5019_v40 = vld [vmem:[#allocation18_spill] sm:$0xff] }
 0x220   : > { %vm4574_vm10 = vcmp.eq.f32.partialorder %v4997_v38, 8.507059e+37  ;;  %vm1252_vm8 = vmor %vm1250_vm9, %vm1251_vm2  ;;  %v1257_v20 = vor.u32 1.1754944e-38, %v1256_v48  ;;  %v4587_v36 = vadd.f32 %v888_v52, %v887_v59  ;;  %v5001_v12 = vand.u32 2147483647, %v3536_v27  ;;  %v5021_v48 = vld [vmem:[#allocation22_spill] sm:$0xff]  ;;  %v5023_v59 = vld [vmem:[#allocation9_spill] sm:$0xff] }
 0x221   : > { %v1253_v37 = vsel %vm1252_vm8, %v4485_v57, %v1249_v60  ;;  %vm1255_vm13 = vcmp.eq.f32.partialorder %v1254_v8, 8.507059e+37  ;;  %v1382_v50 = vsub.f32 1.0, %v1381_v53  ;;  %v5004_v32 = vand.u32 2147483647, %v3501_v14  ;;  %v5009_v14 = vld [vmem:[#allocation3_spill] sm:$0xff]  ;;  %v4673_v60 = vpop.permute.xlu2 %856  ;;  %v5031_v27 = vld [vmem:[#allocation24_spill] sm:$0xff] }
 0x222   : > { %vm4591_vm0 = vcmp.eq.f32.partialorder %v5001_v12, 8.507059e+37  ;;  %v1309_v58 = vadd.f32 %v4493_v46, %v1308_v51  ;;  %vm1311_vm11 = vweird.f32 %v4493_v46  ;;  %v1258_v2 = vsel %vm1255_vm13, %v1257_v20, %v1253_v37  ;;  %v5025_v12 = vld [vmem:[#allocation14_spill] sm:$0xff]  ;;  %v5026_v37 = vld [vmem:[#allocation19_spill] sm:$0xff] }
 0x223   : > { %vm4598_vm3 = vcmp.eq.f32.partialorder %v5004_v32, 8.507059e+37  ;;  %vm1385_vm12 = vweird.f32 %v4431_v23  ;;  %v1259_v57 = vmul.f32 %v1258_v2, %v5009_v14  ;;  %v1383_v55 = vmul.f32 %v4501_v13, %v1382_v50  ;;  %2002 = vadd.xlane.f32.xlu2 %v4496_v61  ;;  %v5030_v2 = vld [vmem:[#allocation13_spill] sm:$0xff] }
 0x224   : > { %vm1386_vm2 = vweird.f32 %v4501_v13  ;;  %v1389_v44 = vand.u32 2147483647, %v4431_v23  ;;  %vm1310_vm9 = vweird.f32 %v4415_v4  ;;  %v1314_v30 = vand.u32 2147483647, %v4415_v4  ;;  %1981 = vadd.xlane.f32.xlu0 %v4539_v62 }
 0x225   : > { %v1316_v52 = vand.u32 2147483648, %v4415_v4  ;;  %v1391_v16 = vand.u32 2147483648, %v4431_v23  ;;  %v1409_v9 = vmul.f32 %v1408_v5, %v5010_v22  ;;  %v1422_v1 = vor.u32 1.1754944e-38, %v1421_v41  ;;  %vm4627_vm15 = vmor %vm1310_vm9, %vm1311_vm11 }
 0x226   : > { %v4632_v18 = vmul.f32 %v5013_v25, %v1259_v57  ;;  %v1384_v49 = vadd.f32 %v4501_v13, %v1383_v55  ;;  %v1177_v4 = vmul.f32 %v4355_v0, %v1176_v21  ;;  %v1418_v61 = vsel %vm4609_vm6, %v4474_v28, %v1414_v7  ;;  %vm1387_vm1 = vmor %vm1385_vm12, %vm1386_vm2  ;;  %v5014_v28 = vld [vmem:[#allocation17_spill] sm:$0xff]  ;;  %v5033_v57 = vld [vmem:[#allocation27_spill] sm:$0xff] }
 0x227   : > { %vm1420_vm4 = vcmp.eq.f32.partialorder %v1419_v54, 8.507059e+37  ;;  %v1392_v41 = vor.u32 1.1754944e-38, %v1391_v16  ;;  %v1313_v6 = vsel %vm4627_vm15, %v4493_v46, %v1309_v58  ;;  %vm1390_vm8 = vcmp.eq.f32.partialorder %v1389_v44, 8.507059e+37  ;;  %v5018_v46 = vld [vmem:[#allocation12_spill] sm:$0xff] }
 0x228   : > { %v1388_v0 = vsel %vm1387_vm1, %v4501_v13, %v1384_v49  ;;  %v1291_v21 = vmul.f32 %v4524_v11, %v4450_v39  ;;  %v1957_v62 = vmul.f32 %v5014_v28, %v1289_v17  ;;  %vm1315_vm13 = vcmp.eq.f32.partialorder %v1314_v30, 8.507059e+37  ;;  %v5037_v25 = vld [vmem:[#allocation16_spill] sm:$0xff] }
 0x229   : > { %v1317_v10 = vor.u32 1.1754944e-38, %v1316_v52  ;;  %v1393_v54 = vsel %vm1390_vm8, %v1392_v41, %v1388_v0  ;;  %v1965_v63 = vmul.f32 %v5015_v45, %v1409_v9  ;;  %v1423_v23 = vsel %vm1420_vm4, %v1422_v1, %v1418_v61  ;;  %v5035_v52 = vld [vmem:[#allocation8_spill] sm:$0xff] }
 0x22a   : > { %v1394_v31 = vmul.f32 %v1393_v54, %v5016_v43  ;;  %v1292_v8 = vsub.f32 1.0, %v1291_v21  ;;  %v5020_v13 = vsel %vm3851_vm5, %v5018_v46, %v5019_v40  ;;  %vm1295_vm11 = vweird.f32 %v4450_v39  ;;  %v4702_v1 = vld [vmem:[%s2739_s23 + $0x70] sm:$0xff]  ;;  %v5038_v21 = vld [vmem:[#allocation30_spill] sm:$0xff] }
 0x22b   : > { %v1935_v53 = vsel %vm4574_vm10, %v5021_v48, %v5020_v13  ;;  %v1318_v47 = vsel %vm1315_vm13, %v1317_v10, %v1313_v6  ;;  %v1301_v17 = vand.u32 2147483648, %v4450_v39  ;;  %vm1296_vm12 = vweird.f32 %v4524_v11  ;;  %v5039_v10 = vld [vmem:[#allocation6_spill] sm:$0xff] }
 0x22c   : > { %v4668_v5 = vmul.f32 %v4463_v19, %v1394_v31  ;;  %v1293_v24 = vmul.f32 %v4524_v11, %v1292_v8  ;;  %v1299_v38 = vand.u32 2147483647, %v4450_v39  ;;  %vm5022_vm5 = vcmask 23552   ;;  %v5028_v19 = vld [vmem:[#allocation23_spill] sm:$0xff]  ;;  %v4699_v9 = vpop.permute.xlu0 %854 }
 0x22d   : > { %v1983_v15 = vsel %vm5022_vm5, %v1957_v62, 0.0  ;;  %v1424_v7 = vmul.f32 %v1423_v23, %v5023_v59  ;;  %v5027_v50 = vsel %vm3865_vm7, %v5025_v12, %v5026_v37  ;;  %v5032_v14 = vsel %vm3990_vm14, %v5030_v2, %v5031_v27  ;;  %vm5034_vm10 = vmmov %vm5022_vm5 }
 0x22e   : > { %v1830_v32 = vsel %vm4591_vm0, %v5028_v19, %v5027_v50  ;;  %v1815_v55 = vsel %vm4598_vm3, %v5033_v57, %v5032_v14  ;;  %v1178_v44 = vmul.f32 %v1177_v4, %v4297_v29  ;;  %1984 = vadd.xlane.f32.xlu2 %v1983_v15  ;;  %v2007_v30 = vsel %vm5034_vm10, %v1965_v63, 0.0  ;;  %vm1297_vm14 = vmor %vm1295_vm11, %vm1296_vm12 }
 0x22f   : > { %v1319_v16 = vmul.f32 %v1318_v47, %v5035_v52  ;;  %v1294_v22 = vadd.f32 %v4524_v11, %v1293_v24  ;;  %vm1691_vm7 = vcmp.eq.f32.partialorder %v5036_v56, inf  ;;  %vm1179_vm0 = vcmp.eq.f32.partialorder %v4297_v29, inf  ;;  %2008 = vadd.xlane.f32.xlu0 %v2007_v30  ;;  %vm5040_vm9 = vmmov %vm5022_vm5 }
 0x230   : > { %v1936_v35 = vmul.f32 %v4702_v1, %v1935_v53  ;;  %v1302_v26 = vor.u32 1.1754944e-38, %v1301_v17  ;;  %v1690_v49 = vmul.f32 %v5037_v25, %v5036_v56  ;;  %v1831_v4 = vmul.f32 %v4466_v42, %v1830_v32  ;;  %vm5041_vm15 = vmmov %vm5022_vm5 }
 0x231   : > { %v1298_v61 = vsel %vm1297_vm14, %v4524_v11, %v1294_v22  ;;  %vm1300_vm3 = vcmp.eq.f32.partialorder %v1299_v38, 8.507059e+37  ;;  %v1182_v41 = vand.u32 2147483648, %v4297_v29  ;;  %v1816_v28 = vmul.f32 %v5038_v21, %v1815_v55  ;;  %vm5044_vm8 = vmmov %vm5022_vm5 }
 0x232   : > { %v1966_v6 = vmul.f32 %v1936_v35, %v1424_v7  ;;  %v1303_v0 = vsel %vm1300_vm3, %v1302_v26, %v1298_v61  ;;  %v1180_v62 = vsel %vm1179_vm0, %v4297_v29, %v1178_v44  ;;  %vm1181_vm6 = vcmp.eq.f32.partialorder %v4297_v29, 0.0  ;;  %v845_v29 = vpop.permute.xlu2 %844  ;;  %vm5046_vm11 = vmmov %vm5022_vm5  ;;  %v5049_v26 = vld [vmem:[#allocation10_spill] sm:$0xff] }
 0x233   : > { %v1959_v39 = vmul.f32 %v1831_v4, %v1319_v16  ;;  %v1304_v54 = vmul.f32 %v1303_v0, %v5039_v10  ;;  %v1694_v45 = vand.u32 2147483648, %v5036_v56  ;;  %v1692_v11 = vsel %vm1691_vm7, %v5036_v56, %v1690_v49  ;;  %vm5047_vm14 = vmmov %vm5044_vm8  ;;  %v2636_v10 = vld [vmem:[%s2739_s23] sm:$0xff] }
 0x234   : > { %vm1693_vm2 = vcmp.eq.f32.partialorder %v5036_v56, 0.0  ;;  %v1183_v23 = vsel %vm1181_vm6, %v1182_v41, %v1180_v62  ;;  %v2010_v43 = vsel %vm5040_vm9, %v1966_v6, 0.0  ;;  %v843_v51 = vpop.permute.xlu0 %842  ;;  %vm5042_vm4 = vcmask 7168   ;;  %vm5048_vm9 = vmmov %vm5044_vm8 }
 0x235   : > { %v1958_v63 = vmul.f32 %v1816_v28, %v1304_v54  ;;  %v1989_v31 = vsel %vm5041_vm15, %v1959_v39, 0.0  ;;  %v1695_v8 = vsel %vm1693_vm2, %v1694_v45, %v1692_v11  ;;  %v1199_v46 = vadd.f32 1e-08, %v1183_v23  ;;  %vm5043_vm1 = vmmov %vm5042_vm4 }
 0x236   : > { %2011 = vadd.xlane.f32.xlu2 %v2010_v43  ;;  %v890_v40 = vsel %vm5042_vm4, %v843_v51, 0.0  ;;  %v1711_v48 = vadd.f32 1e-08, %v1695_v8  ;;  %v892_v53 = vsel %vm5043_vm1, %v845_v29, 0.0  ;;  %v1995_v38 = vsel %vm5044_vm8, %v4583_v3, 0.0  ;;  %vm5045_vm13 = vmmov %vm5043_vm1  ;;  %v2637_v51 = vld [vmem:[%s2739_s23 + $0x8] sm:$0xff] }
 0x237   : > { %1990 = vadd.xlane.f32.xlu0 %v1989_v31  ;;  %v891_v13 = vadd.f32 %v890_v40, %v4587_v36  ;;  %2616 = vrcp.f32 %v1199_v46  ;;  %v1977_v50 = vsel %vm5046_vm11, %v4632_v18, 0.0  ;;  %vm1430_vm12 = vweird.f32 %v1199_v46  ;;  %vm5050_vm15 = vmmov %vm5043_vm1 }
 0x238   : > { %2618 = vrcp.f32 %v1711_v48  ;;  %v1436_v2 = vand.u32 2147483648, %v1199_v46  ;;  %v1434_v27 = vand.u32 2147483647, %v1199_v46  ;;  %vm1942_vm10 = vweird.f32 %v1711_v48  ;;  %vm5051_vm4 = vmmov %vm5044_vm8 }
 0x239   : > { %v893_v47 = vadd.f32 %v892_v53, %v891_v13  ;;  %v1948_v14 = vand.u32 2147483648, %v1711_v48  ;;  %v2004_v57 = vsel %vm5047_vm14, %v4668_v5, 0.0  ;;  %v1946_v44 = vand.u32 2147483647, %v1711_v48  ;;  %v4740_v5 = vld [vmem:[%s2739_s23 + $0x78] sm:$0xff]  ;;  %vm5052_vm8 = vmmov %vm5043_vm1 }
 0x23a   : > { %v1437_v18 = vor.u32 1.1754944e-38, %v1436_v2  ;;  %vm1435_vm6 = vcmp.eq.f32.partialorder %v1434_v27, 8.507059e+37  ;;  %v1986_v35 = vsel %vm5048_vm9, %v1958_v63, 0.0  ;;  %v4745_v28 = vpop.permute.xlu2 %860  ;;  %vm5054_vm11 = vmmov %vm5043_vm1  ;;  %v2641_v2 = vld [vmem:[%s2739_s23 + $0x20] sm:$0xff] }
 0x23b   : > { %v1949_v52 = vor.u32 1.1754944e-38, %v1948_v14  ;;  %vm1947_vm2 = vcmp.eq.f32.partialorder %v1946_v44, 8.507059e+37 }
 0x23d   : > { %v2617_v24 = vpop.eup %2616 }
 0x23e   : > { %v4728_v17 = vpop.permute.xlu1 %858  ;;  %v2619_v15 = vpop.eup %2618  ;;  %v1426_v59 = vmul.f32 %v2617_v24, %v1199_v46  ;;  %vm1431_vm5 = vweird.f32 %v2617_v24 }
 0x23f   : > { %v1938_v7 = vmul.f32 %v2619_v15, %v1711_v48  ;;  %vm1943_vm7 = vweird.f32 %v2619_v15  ;;  %vm1432_vm0 = vmor %vm1430_vm12, %vm1431_vm5 }
 0x240   : > { %v1427_v12 = vsub.f32 1.0, %v1426_v59  ;;  %vm1944_vm3 = vmor %vm1942_vm10, %vm1943_vm7 }
 0x241   : > { %1996 = vadd.xlane.f32.xlu1 %v1995_v38  ;;  %v1939_v19 = vsub.f32 1.0, %v1938_v7  ;;  %vm5056_vm12 = vmmov %vm5043_vm1 }
 0x242   : > { %v1428_v32 = vmul.f32 %v2617_v24, %v1427_v12  ;;  %v863_v45 = vpop.permute.xlu2 %862  ;;  %vm5057_vm5 = vmmov %vm5043_vm1 }
 0x243   : > { %v1940_v58 = vmul.f32 %v2619_v15, %v1939_v19  ;;  %vm5058_vm10 = vmmov %vm5043_vm1 }
 0x244   : > { %v1429_v3 = vadd.f32 %v2617_v24, %v1428_v32  ;;  %v2640_v32 = vld [vmem:[%s2739_s23 + $0x10] sm:$0xff]  ;;  %vm5059_vm7 = vmmov %vm5043_vm1 }
 0x245   : > { %v1941_v55 = vadd.f32 %v2619_v15, %v1940_v58 }
 0x246   : > { %v847_v20 = vpop.permute.xlu1 %846  ;;  %v1433_v30 = vsel %vm1432_vm0, %v2617_v24, %v1429_v3  ;;  %vm5060_vm0 = vmmov %vm5043_vm1 }
 0x247   : > { %v894_v36 = vsel %vm5045_vm13, %v847_v20, 0.0  ;;  %v1945_v16 = vsel %vm1944_vm3, %v2619_v15, %v1941_v55  ;;  %v1438_v22 = vsel %vm1435_vm6, %v1437_v18, %v1433_v30  ;;  %vm5053_vm13 = vmmov %vm5043_vm1  ;;  %v2638_v20 = vld [vmem:[%s2739_s23 + $0x40] sm:$0xff]  ;;  %v2642_v55 = vld [vmem:[%s2739_s23 + $0x28] sm:$0xff] }
 0x248   : > { %v895_v37 = vadd.f32 %v894_v36, %v893_v47  ;;  %v1950_v56 = vsel %vm1947_vm2, %v1949_v52, %v1945_v16  ;;  %v1439_v25 = vmul.f32 %v1438_v22, %v5049_v26  ;;  %v902_v48 = vsel %vm5053_vm13, %v4699_v9, 0.0  ;;  %v2639_v36 = vld [vmem:[%s2739_s23 + $0x50] sm:$0xff]  ;;  %v2643_v18 = vld [vmem:[%s2739_s23 + $0x58] sm:$0xff]  ;;  %v2644_v52 = vld [vmem:[%s2739_s23 + $0x68] sm:$0xff] }
 0x249   : > { %1978 = vadd.xlane.f32.xlu1 %v1977_v50  ;;  %v1951_v49 = vmul.f32 %v4740_v5, %v1950_v56  ;;  %v904_v47 = vsel %vm5054_vm11, %v4673_v60, 0.0  ;;  %v5055_v16 = vld [vmem:[#allocation29_spill] sm:$0xff]  ;;  %v820_v56 = vmul.f32 %v4702_v1, %v4438_v34  ;;  %v821_v34 = vmul.f32 %v4740_v5, %v4617_v33  ;;  %vm5061_vm14 = vmmov %vm5060_vm0 }
 0x24a   : > { %v851_v11 = vpop.permute.xlu2 %850  ;;  %v819_v22 = vmul.f32 %v2644_v52, %v5055_v16  ;;  %vm5062_vm3 = vmmov %vm5060_vm0 }
 0x24b   : > { %v1967_v61 = vmul.f32 %v1951_v49, %v1439_v25  ;;  %v898_v43 = vsel %vm5043_vm1, %v851_v11, 0.0  ;;  %v906_v25 = vsel %vm5056_vm12, %v4728_v17, 0.0  ;;  %v2645_v49 = vld [vmem:[%s2739_s23 + $0x48] sm:$0xff]  ;;  %vm5063_vm6 = vmmov %vm5060_vm0 }
 0x24c   : > { %vm5064_vm2 = vmmov %vm5060_vm0 }
 0x24d   : > { %v2013_v0 = vsel %vm5051_vm4, %v1967_v61, 0.0  ;;  %vm5065_vm9 = vmmov %vm5060_vm0 }
 0x24e   : > { %vm5067_vm4 = vmmov %vm5060_vm0 }
 0x24f   : > { %vm5068_vm1 = vmmov %vm5060_vm0 }
 0x250   : > { %vm5070_vm13 = vmmov %vm5060_vm0 }
 0x251   : > { %2005 = vadd.xlane.f32.xlu1 %v2004_v57  ;;  %vm5071_vm11 = vmmov %vm5060_vm0 }
 0x252   : > { %vm5072_vm12 = vmmov %vm5060_vm0 }
 0x259   : > { %1987 = vadd.xlane.f32.xlu1 %v1986_v35 }
 0x25c   : > { %v849_v4 = vpop.permute.xlu0 %848 }
 0x25d   : > { %v896_v41 = vsel %vm5050_vm15, %v849_v4, 0.0  ;;  %vm5066_vm15 = vmmov %vm5060_vm0 }
 0x25e   : > { %v897_v6 = vadd.f32 %v896_v41, %v895_v37  ;;  %v908_v41 = vsel %vm5057_vm5, %v4745_v28, 0.0  ;;  %vm5074_vm5 = vmmov %vm5060_vm0 }
 0x260   : > { %v899_v29 = vadd.f32 %v898_v43, %v897_v6 }
 0x261   : > { %2014 = vadd.xlane.f32.xlu1 %v2013_v0  ;;  %v910_v0 = vsel %vm5058_vm10, %v863_v45, 0.0  ;;  %vm5075_vm10 = vmmov %vm5060_vm0 }
 0x271   : > { %v1970_v62 = vpop.xlane.xlu1 %1969 }
 0x272   : > { %v2016_v39 = vsub.f32 0.0, %v1970_v62 }
 0x274   : > { %v2032_v54 = vmul.f32 %v2636_v10, %v2016_v39  ;;  %v2646_v10 = vld [vmem:[%s2739_s23 + $0x18] sm:$0xff] }
 0x276   : > { %2064 = vrot.lane.b32.xlu0 %v2032_v54, %s2656_s18 }
 0x286   : > { %v1994_v63 = vpop.xlane.xlu2 %1993 }
 0x287   : > { %v1973_v23 = vpop.xlane.xlu0 %1972  ;;  %v2024_v24 = vsub.f32 0.0, %v1994_v63 }
 0x288   : > { %v2017_v31 = vsub.f32 0.0, %v1973_v23  ;;  %v2647_v23 = vld [vmem:[%s2739_s23 + $0x60] sm:$0xff] }
 0x289   : > { %v853_v8 = vpop.permute.xlu1 %852  ;;  %v2040_v12 = vmul.f32 %v2638_v20, %v2024_v24 }
 0x28a   : > { %v2033_v46 = vmul.f32 %v2637_v51, %v2017_v31  ;;  %v900_v40 = vsel %vm5052_vm8, %v853_v8, 0.0  ;;  %vm5069_vm8 = vmmov %vm5060_vm0 }
 0x28b   : > { %v901_v13 = vadd.f32 %v900_v40, %v899_v29 }
 0x28c   : > { %2066 = vrot.lane.b32.xlu2 %v2033_v46, %s2656_s18 }
 0x28d   : > { %v903_v53 = vadd.f32 %v902_v48, %v901_v13 }
 0x28e   : > { %v1976_v38 = vpop.xlane.xlu2 %1975 }
 0x28f   : > { %v905_v15 = vadd.f32 %v904_v47, %v903_v53  ;;  %v2000_v59 = vpop.xlane.xlu0 %1999  ;;  %v2018_v9 = vsub.f32 0.0, %v1976_v38 }
 0x290   : > { %v2026_v7 = vsub.f32 0.0, %v2000_v59 }
 0x291   : > { %v2034_v58 = vmul.f32 %v2640_v32, %v2018_v9  ;;  %v907_v61 = vadd.f32 %v906_v25, %v905_v15 }
 0x292   : > { %v2042_v37 = vmul.f32 %v2639_v36, %v2026_v7 }
 0x293   : > { %v909_v6 = vadd.f32 %v908_v41, %v907_v61 }
 0x294   : > { %2080 = vrot.lane.b32.xlu2 %v2040_v12, %s2656_s18  ;;  %2084 = vrot.lane.b32.xlu0 %v2042_v37, %s2656_s18 }
 0x295   : > { %v911_v39 = vadd.f32 %v910_v0, %v909_v6 }
 0x296   : > { %v2003_v50 = vpop.xlane.xlu2 %2002 }
 0x297   : > { %v1982_v60 = vpop.xlane.xlu0 %1981  ;;  %v2027_v27 = vsub.f32 0.0, %v2003_v50 }
 0x298   : > { %v2020_v19 = vsub.f32 0.0, %v1982_v60 }
 0x299   : > { %v2043_v30 = vmul.f32 %v2643_v18, %v2027_v27 }
 0x29a   : > { %v2036_v3 = vmul.f32 %v2641_v2, %v2020_v19 }
 0x29c   : > { %2068 = vrot.lane.b32.xlu2 %v2034_v58, %s2656_s18  ;;  %2072 = vrot.lane.b32.xlu0 %v2036_v3, %s2656_s18 }
 0x2a1   : > { %v1985_v14 = vpop.xlane.xlu2 %1984 }
 0x2a2   : > { %v2021_v57 = vsub.f32 0.0, %v1985_v14  ;;  %v2009_v28 = vpop.xlane.xlu0 %2008 }
 0x2a3   : > { %v2029_v33 = vsub.f32 0.0, %v2009_v28  ;;  %v5073_v28 = vld [vmem:[#allocation15_spill] sm:$0xff] }
 0x2a4   : > { %v2037_v44 = vmul.f32 %v2642_v55, %v2021_v57  ;;  %2086 = vrot.lane.b32.xlu0 %v2043_v30, %s2656_s18 }
 0x2a5   : > { %v2045_v45 = vmul.f32 %v2644_v52, %v2029_v33 }
 0x2a6   : > { %2074 = vrot.lane.b32.xlu2 %v2037_v44, %s2656_s18 }
 0x2a9   : > { %v2012_v13 = vpop.xlane.xlu2 %2011 }
 0x2aa   : > { %v1991_v51 = vpop.xlane.xlu0 %1990  ;;  %v2030_v48 = vsub.f32 0.0, %v2012_v13 }
 0x2ab   : > { %v2023_v46 = vsub.f32 0.0, %v1991_v51 }
 0x2ac   : > { %v2046_v53 = vmul.f32 %v4702_v1, %v2030_v48 }
 0x2ad   : > { %v2039_v40 = vmul.f32 %v4466_v42, %v2023_v46 }
 0x2ae   : > { %864 = vrot.lane.b32.xlu2 %v819_v22, %s2656_s18 }
 0x2b4   : > { %v1997_v35 = vpop.xlane.xlu1 %1996 }
 0x2b5   : > { %v2025_v26 = vsub.f32 0.0, %v1997_v35 }
 0x2b6   : > { %866 = vrot.lane.b32.xlu2 %v820_v56, %s2656_s18 }
 0x2b7   : > { %v2041_v4 = vmul.f32 %v2645_v49, %v2025_v26 }
 0x2b9   : > { %2082 = vrot.lane.b32.xlu1 %v2041_v4, %s2656_s18 }
 0x2bc   : > { %v1979_v62 = vpop.xlane.xlu1 %1978 }
 0x2bd   : > { %v2019_v17 = vsub.f32 0.0, %v1979_v62 }
 0x2be   : > { %868 = vrot.lane.b32.xlu2 %v821_v34, %s2656_s18 }
 0x2bf   : > { %v2035_v54 = vmul.f32 %v2646_v10, %v2019_v17 }
 0x2c1   : > { %2070 = vrot.lane.b32.xlu1 %v2035_v54, %s2656_s18 }
 0x2c4   : > { %v2006_v11 = vpop.xlane.xlu1 %2005 }
 0x2c5   : > { %v2028_v63 = vsub.f32 0.0, %v2006_v11 }
 0x2c7   : > { %v2044_v43 = vmul.f32 %v2647_v23, %v2028_v63  ;;  %v2240_v23 = vsel %vm5074_vm5, %v5073_v28, 0.0 }
 0x2c9   : > { %2088 = vrot.lane.b32.xlu0 %v2044_v43, %s2656_s18 }
 0x2cc   : > { %v1988_v31 = vpop.xlane.xlu1 %1987 }
 0x2cd   : > { %v2022_v8 = vsub.f32 0.0, %v1988_v31 }
 0x2cf   : > { %v2038_v29 = vmul.f32 %v5038_v21, %v2022_v8 }
 0x2d1   : > { %2076 = vrot.lane.b32.xlu1 %v2038_v29, %s2656_s18  ;;  %2090 = vrot.lane.b32.xlu0 %v2045_v45, %s2656_s18  ;;  %v5077_v45 = vld [vmem:[#allocation4_spill] sm:$0xff] }
 0x2d2   : > { %v2241_v29 = vadd.f32 %v2240_v23, %v5077_v45 }
 0x2d4   : > { %v2015_v47 = vpop.xlane.xlu1 %2014 }
 0x2d5   : > { %v2031_v21 = vsub.f32 0.0, %v2015_v47 }
 0x2d7   : > { %v2047_v38 = vmul.f32 %v4740_v5, %v2031_v21 }
 0x2d9   : > { %2195 = vrot.lane.b32.xlu1 %v2644_v52, %s2656_s18  ;;  %2078 = vrot.lane.b32.xlu0 %v2039_v40, %s2656_s18 }
 0x2e1   : > { %2197 = vrot.lane.b32.xlu1 %v4702_v1, %s2656_s18  ;;  %2092 = vrot.lane.b32.xlu0 %v2046_v53, %s2656_s18 }
 0x2e6   : > { %v2067_v24 = vpop.permute.xlu2 %2066 }
 0x2e7   : > { %v2113_v7 = vsel %vm5060_vm0, %v2067_v24, 0.0 }
 0x2e8   : > { %v2065_v15 = vpop.permute.xlu0 %2064 }
 0x2e9   : > { %2199 = vrot.lane.b32.xlu1 %v4740_v5, %s2656_s18  ;;  %2094 = vrot.lane.b32.xlu0 %v2047_v38, %s2656_s18  ;;  %v2112_v59 = vsel %vm5059_vm7, %v2065_v15, 0.0  ;;  %vm5076_vm7 = vmmov %vm5060_vm0 }
 0x2ea   : > { %v2114_v20 = vadd.f32 %v2113_v7, %v2112_v59 }
 0x2ee   : > { %v2081_v42 = vpop.permute.xlu2 %2080 }
 0x2ef   : > { %v2127_v0 = vsel %vm5070_vm13, %v2081_v42, 0.0 }
 0x2f6   : > { %v2069_v12 = vpop.permute.xlu2 %2068 }
 0x2f7   : > { %v2115_v1 = vsel %vm5061_vm14, %v2069_v12, 0.0  ;;  %vm5078_vm14 = vmmov %vm5060_vm0 }
 0x2f8   : > { %v2116_v36 = vadd.f32 %v2115_v1, %v2114_v20 }
 0x300   : > { %v2075_v37 = vpop.permute.xlu2 %2074 }
 0x301   : > { %v2121_v22 = vsel %vm5067_vm4, %v2075_v37, 0.0  ;;  %vm5083_vm4 = vmmov %vm5060_vm0 }
 0x306   : > { %v2085_v27 = vpop.permute.xlu0 %2084 }
 0x307   : > { %v2131_v10 = vsel %vm5072_vm12, %v2085_v27, 0.0 }
 0x308   : > { %v865_v9 = vpop.permute.xlu2 %864 }
 0x309   : > { %v912_v60 = vsel %vm5062_vm3, %v865_v9, 0.0  ;;  %vm5079_vm3 = vmmov %vm5060_vm0 }
 0x30a   : > { %v913_v19 = vadd.f32 %v912_v60, %v911_v39 }
 0x30e   : > { %v2073_v14 = vpop.permute.xlu0 %2072 }
 0x30f   : > { %v2119_v52 = vsel %vm5066_vm15, %v2073_v14, 0.0  ;;  %vm2259_vm15 = vcmask 15360  }
 0x310   : > { %v867_v50 = vpop.permute.xlu2 %866 }
 0x311   : > { %v914_v5 = vsel %vm5063_vm6, %v867_v50, 0.0  ;;  %vm5080_vm6 = vmmov %vm5060_vm0 }
 0x312   : > { %v915_v32 = vadd.f32 %v914_v5, %v913_v19 }
 0x316   : > { %v2087_v55 = vpop.permute.xlu0 %2086 }
 0x317   : > { %v2133_v43 = vsel %vm5075_vm10, %v2087_v55, 0.0 }
 0x318   : > { %v869_v58 = vpop.permute.xlu2 %868 }
 0x319   : > { %v916_v2 = vsel %vm5064_vm2, %v869_v58, 0.0  ;;  %vm5081_vm2 = vmmov %vm5060_vm0 }
 0x31a   : > { %v917_v3 = vadd.f32 %v916_v2, %v915_v32 }
 0x31c   : > { %918 = vadd.xlane.f32.xlu2 %v917_v3 }
 0x32b   : > { %v2083_v57 = vpop.permute.xlu1 %2082 }
 0x32c   : > { %v2129_v39 = vsel %vm5071_vm11, %v2083_v57, 0.0 }
 0x333   : > { %v2071_v44 = vpop.permute.xlu1 %2070 }
 0x334   : > { %v2117_v18 = vsel %vm5065_vm9, %v2071_v44, 0.0  ;;  %vm5082_vm9 = vmmov %vm5060_vm0 }
 0x335   : > { %v2118_v30 = vadd.f32 %v2117_v18, %v2116_v36 }
 0x337   : > { %v2120_v16 = vadd.f32 %v2119_v52, %v2118_v30 }
 0x339   : > { %v2122_v56 = vadd.f32 %v2121_v22, %v2120_v16 }
 0x33b   : > { %v2089_v35 = vpop.permute.xlu0 %2088 }
 0x33c   : > { %v2135_v31 = vsel %vm5076_vm7, %v2089_v35, 0.0 }
 0x343   : > { %v2077_v26 = vpop.permute.xlu1 %2076  ;;  %v2091_v25 = vpop.permute.xlu0 %2090 }
 0x344   : > { %v2123_v49 = vsel %vm5068_vm1, %v2077_v26, 0.0  ;;  %v2137_v46 = vsel %vm5078_vm14, %v2091_v25, 0.0  ;;  %vm2262_vm1 = vcmask 57344  }
 0x345   : > { %v2124_v4 = vadd.f32 %v2123_v49, %v2122_v56 }
 0x34b   : > { %v2196_v61 = vpop.permute.xlu1 %2195  ;;  %v2079_v41 = vpop.permute.xlu0 %2078 }
 0x34c   : > { %v2125_v34 = vsel %vm5069_vm8, %v2079_v41, 0.0  ;;  %v2242_v8 = vsel %vm5060_vm0, %v2196_v61, 0.0  ;;  %vm5084_vm8 = vcmask 23552  }
 0x34d   : > { %v2126_v6 = vadd.f32 %v2125_v34, %v2124_v4  ;;  %v2243_v13 = vadd.f32 %v2242_v8, %v2241_v29 }
 0x34f   : > { %v2128_v62 = vadd.f32 %v2127_v0, %v2126_v6 }
 0x351   : > { %v2130_v17 = vadd.f32 %v2129_v39, %v2128_v62 }
 0x353   : > { %v2132_v54 = vadd.f32 %v2131_v10, %v2130_v17  ;;  %v2198_v11 = vpop.permute.xlu1 %2197  ;;  %v2093_v63 = vpop.permute.xlu0 %2092 }
 0x354   : > { %v2244_v40 = vsel %vm5079_vm3, %v2198_v11, 0.0  ;;  %v2139_v53 = vsel %vm5080_vm6, %v2093_v63, 0.0 }
 0x355   : > { %v2134_v33 = vadd.f32 %v2133_v43, %v2132_v54  ;;  %v2245_v47 = vadd.f32 %v2244_v40, %v2243_v13 }
 0x357   : > { %v2136_v51 = vadd.f32 %v2135_v31, %v2134_v33 }
 0x359   : > { %v2138_v48 = vadd.f32 %v2137_v46, %v2136_v51 }
 0x35b   : > { %v2140_v21 = vadd.f32 %v2139_v53, %v2138_v48  ;;  %v2200_v24 = vpop.permute.xlu1 %2199  ;;  %v2095_v38 = vpop.permute.xlu0 %2094 }
 0x35c   : > { %v2246_v42 = vsel %vm5081_vm2, %v2200_v24, 0.0  ;;  %v2141_v15 = vsel %vm5082_vm9, %v2095_v38, 0.0 }
 0x35d   : > { %v2247_v59 = vadd.f32 %v2246_v42, %v2245_v47  ;;  %v2142_v7 = vadd.f32 %v2141_v15, %v2140_v21 }
 0x35f   : > { %2248 = vadd.xlane.f32.xlu1 %v2247_v59  ;;  %2143 = vadd.xlane.f32.xlu0 %v2142_v7 }
 0x38f   : > { %v919_v20 = vpop.xlane.xlu2 %918 }
 0x390   : > { %v920_v12 = vrot.slane %v919_v20, 4 }
 0x392   : > { %v921_v1 = vadd.f32 %v920_v12, %v919_v20 }
 0x394   : > { %v922_v36 = vrot.slane %v921_v1, 2 }
 0x396   : > { %v923_v37 = vadd.f32 %v922_v36, %v921_v1 }
 0x398   : > { %v924_v9 = vrot.slane %v923_v37, 1 }
 0x39a   : > { %v925_v50 = vadd.f32 %v924_v9, %v923_v37 }
 0x39c   : > { %2474 = vpush %v925_v50 }
 0x3cd   : > { %s2475_s9 = spop %2474 }
 0x3ce   : > { %v927_v52 = vstv %s2475_s9 }
 0x3d2   : > { %v2249_v60 = vpop.xlane.xlu1 %2248  ;;  %v2144_v5 = vpop.xlane.xlu0 %2143 }
 0x3d3   : > { %v2250_v19 = vrot.slane %v2249_v60, 4  ;;  %v2145_v32 = vrot.slane %v2144_v5, 4 }
 0x3d5   : > { %v2251_v58 = vadd.f32 %v2250_v19, %v2249_v60  ;;  %v2146_v2 = vadd.f32 %v2145_v32, %v2144_v5 }
 0x3d7   : > { %v2252_v3 = vrot.slane %v2251_v58, 2  ;;  %v2147_v27 = vrot.slane %v2146_v2, 2 }
 0x3d9   : > { %v2253_v14 = vadd.f32 %v2252_v3, %v2251_v58  ;;  %v2148_v57 = vadd.f32 %v2147_v27, %v2146_v2 }
 0x3db   : > { %v2149_v55 = vrot.slane %v2148_v57, 1  ;;  %v2254_v44 = vrot.slane %v2253_v14, 1 }
 0x3dd   : > { %v2150_v18 = vadd.f32 %v2149_v55, %v2148_v57  ;;  %v2255_v30 = vadd.f32 %v2254_v44, %v2253_v14 }
 0x3df   : > { %2476 = vpush %v2150_v18 }
 0x3e0   : > { %2478 = vpush %v2255_v30 }
 0x410   : > { %s2477_s14 = spop %2476 }
 0x411   : > { %v2152_v16 = vstv %s2477_s14  ;;  %s2479_s23 = spop %2478 }
 0x412   : > { %v2258_v22 = vsel %vm5083_vm4, %v927_v52, %v2152_v16  ;;  %v2257_v56 = vstv %s2479_s23 }
 0x413   : > { %v2260_v35 = vsel %vm2259_vm15, %v2258_v22, %v2257_v56 }
 0x414   : > { %v2261_v26 = vsel %vm5084_vm8, %v2260_v35, 0.0 }
 0x415   : > { %2263 = vst.msk [vmem:[%s339_s29] sm:$0x1] %vm2262_vm1, %v2261_v26 }
 0x416 PF: > { %s19_s27 = sadd.s32 1, %s2654_s27  }
 0x417   : > { %p16_p5 = scmp.ge.s32.totalorder %s19_s27, 5  }
 0x419   :  { %18 = sbr.rel (!%p16_p5) target bundleno = 1 (0x1), region = 93 }

</bundles_post_ra>
